<compile_context>
chip_gen: v5e
topology: v5e:2x2
jax: 0.10.0
libtpu: 0.0.40
codegen_flags: <defaults>
</compile_context>

<pallas_src>
import functools

import jax
import jax.numpy as jnp
from jax.experimental import pallas as pl
from jax.experimental.pallas import tpu as pltpu


# ----------------------------- Pallas kernels ------------------------------

def _conv_relu_pool_kernel(x_ref, w_ref, b_ref, o_ref):
    """Fused 3x3 conv (pad=1) + bias + ReLU + 2x2 max-pool for ONE image.

    x_ref: (1, 8, (Ho+1)*Wo, Cin) bf16  parity-split padded input;
           plane p = 4*row_parity + 2*col_parity + col_shift, row = i*Wo + j
    w_ref: (9, Cin, Cout)         bf16  taps ordered t = dy*3 + dx
    b_ref: (1, Cout)              f32
    o_ref: (1, Ho*Wo, Cout)       bf16  pooled output, row = ho*Wo + wo
    """
    M = o_ref.shape[1]              # Ho*Wo pooled positions
    Wo = x_ref.shape[2] - M         # (Ho+1)*Wo - Ho*Wo = Wo
    Cout = w_ref.shape[2]
    bias = b_ref[...]               # (1, Cout) f32, loaded once

    # relu(max_{py,px} conv) == max_{py,px} relu(conv), and the bias is shared,
    # so pool the pre-activation accumulators and apply bias + ReLU once.
    pooled_max = None
    for py in range(2):
        for px in range(2):
            acc = jnp.zeros((M, Cout), jnp.float32)
            for dy in range(3):
                for dx in range(3):
                    ay, ax = py + dy, px + dx
                    plane = 4 * (ay % 2) + 2 * (ax % 2) + (ax // 2)
                    row0 = (ay // 2) * Wo
                    patch = x_ref[0, plane, row0:row0 + M, :]      # (M, Cin) bf16
                    acc = acc + jnp.dot(patch, w_ref[dy * 3 + dx],
                                        preferred_element_type=jnp.float32)
            pooled_max = acc if pooled_max is None else jnp.maximum(pooled_max, acc)

    o_ref[0] = jnp.maximum(pooled_max + bias, 0.0).astype(o_ref.dtype)


def _conv_gap_head_kernel(x_ref, w_ref, b_ref, wf_ref, bf_ref, o_ref, *, H, W):
    """Fused 3x3 conv (pad=1) + ReLU + global-avg-pool + FC + L2-normalize, ONE image.

    x_ref: (1, 3, (H+2)*W, Cin) bf16  column-shifted padded input (plane = dx)
    w_ref: (9, Cin, Cout) bf16 ; b_ref: (1, Cout) f32
    wf_ref: (Cout, D) f32 ; bf_ref: (1, D) f32
    o_ref: (1, 1, D) f32
    """
    M = H * W
    Cout = w_ref.shape[2]

    acc = jnp.zeros((M, Cout), jnp.float32)
    for dy in range(3):
        for dx in range(3):
            patch = x_ref[0, dx, dy * W:dy * W + M, :]             # (M, Cin) bf16
            acc = acc + jnp.dot(patch, w_ref[dy * 3 + dx],
                                preferred_element_type=jnp.float32)

    act = jnp.maximum(acc + b_ref[...], 0.0)                       # (M, Cout) f32
    pooled = jnp.mean(act, axis=0, keepdims=True)                  # (1, Cout)
    y = jnp.dot(pooled, wf_ref[...],
                preferred_element_type=jnp.float32) + bf_ref[...]  # (1, D)
    # F.normalize(p=2, dim=1, eps=1e-12): y / max(||y||, eps) == y * rsqrt(max(ss, eps^2))
    ss = jnp.sum(y * y, axis=1, keepdims=True)
    o_ref[0] = (y * jax.lax.rsqrt(jnp.maximum(ss, 1e-24))).astype(o_ref.dtype)


# ------------------------- XLA-side layout glue ----------------------------

def _prep_pool_input(x_sp):
    """(N, H, W, C) -> (N, 8, (H//2+1)*(W//2), C) parity-split padded planes.

    Plane p = 4*r + 2*q + dj holds xp[2a+r, 2(b+dj)+q] at row a*Wo + b, where xp is
    the zero-padded (pad=1) input.  Pure permutation (~2x input bytes), no 9x im2col.
    """
    N, H, W, C = x_sp.shape
    Ho, Wo = H // 2, W // 2
    Hp2, Wp2 = Ho + 1, Wo + 1
    xp = jnp.pad(x_sp, ((0, 0), (1, 1), (1, 1), (0, 0)))
    xs = xp.reshape(N, Hp2, 2, Wp2, 2, C).transpose(0, 2, 4, 1, 3, 5)   # (N,r,q,a,b,C)
    slabs = jnp.stack([xs[..., 0:Wo, :], xs[..., 1:Wo + 1, :]], axis=3)  # (N,r,q,dj,a,b,C)
    return slabs.reshape(N, 8, Hp2 * Wo, C)


def _prep_conv_input(x_sp):
    """(N, H, W, C) -> (N, 3, (H+2)*W, C); plane dx = padded input shifted by dx cols."""
    N, H, W, C = x_sp.shape
    xp = jnp.pad(x_sp, ((0, 0), (1, 1), (1, 1), (0, 0)))
    slabs = jnp.stack([xp[:, :, dx:dx + W, :] for dx in range(3)], axis=1)
    return slabs.reshape(N, 3, (H + 2) * W, C)


# ------------------------------ layer wrappers ------------------------------

def conv3x3_relu_maxpool(x_sp, w_hwio, b):
    """Conv2d(Cin,Cout,3,padding=1) + ReLU + MaxPool2d(2).  x_sp: (N,H,W,Cin) bf16."""
    N, H, W, Cin = x_sp.shape
    Ho, Wo = H // 2, W // 2
    Cout = w_hwio.shape[-1]
    xs = _prep_pool_input(x_sp)
    w9 = w_hwio.reshape(9, Cin, Cout).astype(jnp.bfloat16)
    out = pl.pallas_call(
        _conv_relu_pool_kernel,
        out_shape=jax.ShapeDtypeStruct((N, Ho * Wo, Cout), jnp.bfloat16),
        grid=(N,),
        in_specs=[
            pl.BlockSpec((1, 8, (Ho + 1) * Wo, Cin), lambda n: (n, 0, 0, 0)),
            pl.BlockSpec((9, Cin, Cout), lambda n: (0, 0, 0)),
            pl.BlockSpec((1, Cout), lambda n: (0, 0)),
        ],
        out_specs=pl.BlockSpec((1, Ho * Wo, Cout), lambda n: (n, 0, 0)),
        compiler_params=pltpu.CompilerParams(dimension_semantics=("parallel",)),
    )(xs, w9, b.astype(jnp.float32).reshape(1, Cout))
    return out.reshape(N, Ho, Wo, Cout)


def conv3x3_relu_gap_fc_norm(x_sp, w_hwio, b, wfc, bfc):
    """Conv2d(...,3,padding=1)+ReLU + AdaptiveAvgPool2d(1) + Linear + L2-normalize."""
    N, H, W, Cin = x_sp.shape
    Cout = w_hwio.shape[-1]
    D = wfc.shape[1]
    xs = _prep_conv_input(x_sp)
    w9 = w_hwio.reshape(9, Cin, Cout).astype(jnp.bfloat16)
    kernel = functools.partial(_conv_gap_head_kernel, H=H, W=W)
    out = pl.pallas_call(
        kernel,
        out_shape=jax.ShapeDtypeStruct((N, 1, D), jnp.float32),
        grid=(N,),
        in_specs=[
            pl.BlockSpec((1, 3, (H + 2) * W, Cin), lambda n: (n, 0, 0, 0)),
            pl.BlockSpec((9, Cin, Cout), lambda n: (0, 0, 0)),
            pl.BlockSpec((1, Cout), lambda n: (0, 0)),
            pl.BlockSpec((Cout, D), lambda n: (0, 0)),
            pl.BlockSpec((1, D), lambda n: (0, 0)),
        ],
        out_specs=pl.BlockSpec((1, 1, D), lambda n: (n, 0, 0)),
        compiler_params=pltpu.CompilerParams(dimension_semantics=("parallel",)),
    )(xs, w9, b.astype(jnp.float32).reshape(1, Cout),
      wfc.astype(jnp.float32), bfc.astype(jnp.float32).reshape(1, D))
    return out.reshape(N, D)


# ------------------------------- full forward -------------------------------

def init_params(key, output_dim=64):
    ks = jax.random.split(key, 8)

    def conv_w(k, cin, cout):
        return jax.random.normal(k, (3, 3, cin, cout), jnp.float32) / jnp.sqrt(9.0 * cin)

    return {
        "w1": conv_w(ks[0], 3, 32),
        "b1": jax.random.normal(ks[1], (32,), jnp.float32) * 0.01,
        "w2": conv_w(ks[2], 32, 64),
        "b2": jax.random.normal(ks[3], (64,), jnp.float32) * 0.01,
        "w3": conv_w(ks[4], 64, 128),
        "b3": jax.random.normal(ks[5], (128,), jnp.float32) * 0.01,
        "wfc": jax.random.normal(ks[6], (128, output_dim), jnp.float32) / jnp.sqrt(128.0),
        "bfc": jax.random.normal(ks[7], (output_dim,), jnp.float32) * 0.01,
    }


def embedding_net_forward(x_nchw, params):
    # NCHW -> NHWC; bf16 activations feed the MXU directly (f32 accumulation in-kernel).
    x = jnp.transpose(x_nchw, (0, 2, 3, 1)).astype(jnp.bfloat16)
    x = conv3x3_relu_maxpool(x, params["w1"], params["b1"])        # (N, H/2, W/2, 32)
    x = conv3x3_relu_maxpool(x, params["w2"], params["b2"])        # (N, H/4, W/4, 64)
    return conv3x3_relu_gap_fc_norm(x, params["w3"], params["b3"],
                                    params["wfc"], params["bfc"])  # (N, 64) f32


# Pure-JAX reference (same math, XLA ops) used only for a correctness check.
# Inputs / conv weights are rounded through bf16 so the comparison isolates the
# kernel logic from bf16 quantization of the operands.
def reference_forward(x_nchw, params):
    def bf(a):
        return a.astype(jnp.bfloat16).astype(jnp.float32)

    x = bf(jnp.transpose(x_nchw, (0, 2, 3, 1)))

    def conv(x, w, b):
        y = jax.lax.conv_general_dilated(
            x, bf(w), window_strides=(1, 1), padding="SAME",
            dimension_numbers=("NHWC", "HWIO", "NHWC"))
        return jnp.maximum(y + b, 0.0)

    def pool(x):
        return jax.lax.reduce_window(
            x, -jnp.inf, jax.lax.max, (1, 2, 2, 1), (1, 2, 2, 1), "VALID")

    x = bf(pool(conv(x, params["w1"], params["b1"])))
    x = bf(pool(conv(x, params["w2"], params["b2"])))
    x = conv(x, params["w3"], params["b3"])
    x = jnp.mean(x, axis=(1, 2))
    y = x @ params["wfc"] + params["bfc"]
    n = jnp.sqrt(jnp.sum(y * y, axis=1, keepdims=True))
    return y / jnp.maximum(n, 1e-12)


if __name__ == "__main__":
    key = jax.random.PRNGKey(0)
    kx, kp = jax.random.split(key)
    x = jax.random.normal(kx, (2, 3, 16, 16), jnp.float32)   # NCHW like PyTorch
    params = init_params(kp, output_dim=64)

    out = jax.block_until_ready(jax.jit(embedding_net_forward)(x, params))
    assert out.shape == (2, 64) and out.dtype == jnp.float32

    ref = jax.block_until_ready(reference_forward(x, params))
    # bf16 MXU operands (f32 accumulation) + inter-layer bf16 rounding vs. the
    # f32-accumulated XLA reference -> modest tolerance on unit-norm outputs.
    assert jnp.allclose(out, ref, rtol=2e-2, atol=2e-2), "mismatch vs JAX reference"
    # L2-normalized rows should have unit norm (normalize is done in f32 in-kernel).
    assert jnp.allclose(jnp.linalg.norm(out, axis=1), 1.0, atol=1e-3)

    print("KERNEL_OK")
</pallas_src>

<mosaic_0001>
module attributes {stable_mosaic.version = 11 : i64} {
  func.func @_conv_relu_pool_kernel(%arg0: i32, %arg1: memref<1x8x72x3xbf16, #tpu.memory_space<vmem>>, %arg2: memref<9x3x32xbf16, #tpu.memory_space<vmem>>, %arg3: memref<1x32xf32, #tpu.memory_space<vmem>>, %arg4: memref<1x64x32xbf16, #tpu.memory_space<vmem>>) attributes {dimension_semantics = [#tpu.dimension_semantics<parallel>], iteration_bounds = array<i64: 2>, scalar_prefetch = 0 : i64, scratch_operands = 0 : i64, tpu.core_type = #tpu.core_type<tc>, window_params = [{transform_indices = @transform_0, window_bounds = array<i64: 1, 8, 72, 3>}, {pipeline_mode = #tpu.pipeline_mode<synchronous>, transform_indices = @transform_1, window_bounds = array<i64: 9, 3, 32>}, {pipeline_mode = #tpu.pipeline_mode<synchronous>, transform_indices = @transform_2, window_bounds = array<i64: 1, 32>}, {transform_indices = @transform_3, window_bounds = array<i64: 1, 64, 32>}]} {
    %c0 = arith.constant 0 : index
    %c0_0 = arith.constant 0 : index
    %0 = vector.load %arg3[%c0, %c0_0] : memref<1x32xf32, #tpu.memory_space<vmem>>, vector<1x32xf32>
    %cst = arith.constant 0.000000e+00 : f32
    %1 = vector.broadcast %cst : f32 to vector<64x32xf32>
    %c0_1 = arith.constant 0 : index
    %c0_2 = arith.constant 0 : index
    %c0_3 = arith.constant 0 : index
    %c0_4 = arith.constant 0 : index
    %2 = vector.load %arg1[%c0_1, %c0_2, %c0_3, %c0_4] : memref<1x8x72x3xbf16, #tpu.memory_space<vmem>>, vector<1x1x64x3xbf16>
    %3 = vector.shape_cast %2 : vector<1x1x64x3xbf16> to vector<64x3xbf16>
    %c0_5 = arith.constant 0 : index
    %c0_6 = arith.constant 0 : index
    %c0_7 = arith.constant 0 : index
    %4 = vector.load %arg2[%c0_5, %c0_6, %c0_7] : memref<9x3x32xbf16, #tpu.memory_space<vmem>>, vector<1x3x32xbf16>
    %5 = vector.shape_cast %4 : vector<1x3x32xbf16> to vector<3x32xbf16>
    %cst_8 = arith.constant dense<0.000000e+00> : vector<64x32xf32>
    %6 = tpu.matmul %3, %5, %cst_8 {dimension_numbers = #tpu.dot_dimension_numbers<[1], [0], [0], [1], [0, 0, 1, 1], [], []>} : vector<64x3xbf16>, vector<3x32xbf16>, vector<64x32xf32> -> vector<64x32xf32>
    %7 = arith.addf %1, %6 : vector<64x32xf32>
    %c0_9 = arith.constant 0 : index
    %c2 = arith.constant 2 : index
    %c0_10 = arith.constant 0 : index
    %c0_11 = arith.constant 0 : index
    %8 = vector.load %arg1[%c0_9, %c2, %c0_10, %c0_11] : memref<1x8x72x3xbf16, #tpu.memory_space<vmem>>, vector<1x1x64x3xbf16>
    %9 = vector.shape_cast %8 : vector<1x1x64x3xbf16> to vector<64x3xbf16>
    %c1 = arith.constant 1 : index
    %c0_12 = arith.constant 0 : index
    %c0_13 = arith.constant 0 : index
    %10 = vector.load %arg2[%c1, %c0_12, %c0_13] : memref<9x3x32xbf16, #tpu.memory_space<vmem>>, vector<1x3x32xbf16>
    %11 = vector.shape_cast %10 : vector<1x3x32xbf16> to vector<3x32xbf16>
    %cst_14 = arith.constant dense<0.000000e+00> : vector<64x32xf32>
    %12 = tpu.matmul %9, %11, %cst_14 {dimension_numbers = #tpu.dot_dimension_numbers<[1], [0], [0], [1], [0, 0, 1, 1], [], []>} : vector<64x3xbf16>, vector<3x32xbf16>, vector<64x32xf32> -> vector<64x32xf32>
    %13 = arith.addf %7, %12 : vector<64x32xf32>
    %c0_15 = arith.constant 0 : index
    %c1_16 = arith.constant 1 : index
    %c0_17 = arith.constant 0 : index
    %c0_18 = arith.constant 0 : index
    %14 = vector.load %arg1[%c0_15, %c1_16, %c0_17, %c0_18] : memref<1x8x72x3xbf16, #tpu.memory_space<vmem>>, vector<1x1x64x3xbf16>
    %15 = vector.shape_cast %14 : vector<1x1x64x3xbf16> to vector<64x3xbf16>
    %c2_19 = arith.constant 2 : index
    %c0_20 = arith.constant 0 : index
    %c0_21 = arith.constant 0 : index
    %16 = vector.load %arg2[%c2_19, %c0_20, %c0_21] : memref<9x3x32xbf16, #tpu.memory_space<vmem>>, vector<1x3x32xbf16>
    %17 = vector.shape_cast %16 : vector<1x3x32xbf16> to vector<3x32xbf16>
    %cst_22 = arith.constant dense<0.000000e+00> : vector<64x32xf32>
    %18 = tpu.matmul %15, %17, %cst_22 {dimension_numbers = #tpu.dot_dimension_numbers<[1], [0], [0], [1], [0, 0, 1, 1], [], []>} : vector<64x3xbf16>, vector<3x32xbf16>, vector<64x32xf32> -> vector<64x32xf32>
    %19 = arith.addf %13, %18 : vector<64x32xf32>
    %c0_23 = arith.constant 0 : index
    %c4 = arith.constant 4 : index
    %c0_24 = arith.constant 0 : index
    %c0_25 = arith.constant 0 : index
    %20 = vector.load %arg1[%c0_23, %c4, %c0_24, %c0_25] : memref<1x8x72x3xbf16, #tpu.memory_space<vmem>>, vector<1x1x64x3xbf16>
    %21 = vector.shape_cast %20 : vector<1x1x64x3xbf16> to vector<64x3xbf16>
    %c3 = arith.constant 3 : index
    %c0_26 = arith.constant 0 : index
    %c0_27 = arith.constant 0 : index
    %22 = vector.load %arg2[%c3, %c0_26, %c0_27] : memref<9x3x32xbf16, #tpu.memory_space<vmem>>, vector<1x3x32xbf16>
    %23 = vector.shape_cast %22 : vector<1x3x32xbf16> to vector<3x32xbf16>
    %cst_28 = arith.constant dense<0.000000e+00> : vector<64x32xf32>
    %24 = tpu.matmul %21, %23, %cst_28 {dimension_numbers = #tpu.dot_dimension_numbers<[1], [0], [0], [1], [0, 0, 1, 1], [], []>} : vector<64x3xbf16>, vector<3x32xbf16>, vector<64x32xf32> -> vector<64x32xf32>
    %25 = arith.addf %19, %24 : vector<64x32xf32>
    %c0_29 = arith.constant 0 : index
    %c6 = arith.constant 6 : index
    %c0_30 = arith.constant 0 : index
    %c0_31 = arith.constant 0 : index
    %26 = vector.load %arg1[%c0_29, %c6, %c0_30, %c0_31] : memref<1x8x72x3xbf16, #tpu.memory_space<vmem>>, vector<1x1x64x3xbf16>
    %27 = vector.shape_cast %26 : vector<1x1x64x3xbf16> to vector<64x3xbf16>
    %c4_32 = arith.constant 4 : index
    %c0_33 = arith.constant 0 : index
    %c0_34 = arith.constant 0 : index
    %28 = vector.load %arg2[%c4_32, %c0_33, %c0_34] : memref<9x3x32xbf16, #tpu.memory_space<vmem>>, vector<1x3x32xbf16>
    %29 = vector.shape_cast %28 : vector<1x3x32xbf16> to vector<3x32xbf16>
    %cst_35 = arith.constant dense<0.000000e+00> : vector<64x32xf32>
    %30 = tpu.matmul %27, %29, %cst_35 {dimension_numbers = #tpu.dot_dimension_numbers<[1], [0], [0], [1], [0, 0, 1, 1], [], []>} : vector<64x3xbf16>, vector<3x32xbf16>, vector<64x32xf32> -> vector<64x32xf32>
    %31 = arith.addf %25, %30 : vector<64x32xf32>
    %c0_36 = arith.constant 0 : index
    %c5 = arith.constant 5 : index
    %c0_37 = arith.constant 0 : index
    %c0_38 = arith.constant 0 : index
    %32 = vector.load %arg1[%c0_36, %c5, %c0_37, %c0_38] : memref<1x8x72x3xbf16, #tpu.memory_space<vmem>>, vector<1x1x64x3xbf16>
    %33 = vector.shape_cast %32 : vector<1x1x64x3xbf16> to vector<64x3xbf16>
    %c5_39 = arith.constant 5 : index
    %c0_40 = arith.constant 0 : index
    %c0_41 = arith.constant 0 : index
    %34 = vector.load %arg2[%c5_39, %c0_40, %c0_41] : memref<9x3x32xbf16, #tpu.memory_space<vmem>>, vector<1x3x32xbf16>
    %35 = vector.shape_cast %34 : vector<1x3x32xbf16> to vector<3x32xbf16>
    %cst_42 = arith.constant dense<0.000000e+00> : vector<64x32xf32>
    %36 = tpu.matmul %33, %35, %cst_42 {dimension_numbers = #tpu.dot_dimension_numbers<[1], [0], [0], [1], [0, 0, 1, 1], [], []>} : vector<64x3xbf16>, vector<3x32xbf16>, vector<64x32xf32> -> vector<64x32xf32>
    %37 = arith.addf %31, %36 : vector<64x32xf32>
    %c0_43 = arith.constant 0 : index
    %c0_44 = arith.constant 0 : index
    %c8 = arith.constant 8 : index
    %c0_45 = arith.constant 0 : index
    %38 = vector.load %arg1[%c0_43, %c0_44, %c8, %c0_45] : memref<1x8x72x3xbf16, #tpu.memory_space<vmem>>, vector<1x1x64x3xbf16>
    %39 = vector.shape_cast %38 : vector<1x1x64x3xbf16> to vector<64x3xbf16>
    %c6_46 = arith.constant 6 : index
    %c0_47 = arith.constant 0 : index
    %c0_48 = arith.constant 0 : index
    %40 = vector.load %arg2[%c6_46, %c0_47, %c0_48] : memref<9x3x32xbf16, #tpu.memory_space<vmem>>, vector<1x3x32xbf16>
    %41 = vector.shape_cast %40 : vector<1x3x32xbf16> to vector<3x32xbf16>
    %cst_49 = arith.constant dense<0.000000e+00> : vector<64x32xf32>
    %42 = tpu.matmul %39, %41, %cst_49 {dimension_numbers = #tpu.dot_dimension_numbers<[1], [0], [0], [1], [0, 0, 1, 1], [], []>} : vector<64x3xbf16>, vector<3x32xbf16>, vector<64x32xf32> -> vector<64x32xf32>
    %43 = arith.addf %37, %42 : vector<64x32xf32>
    %c0_50 = arith.constant 0 : index
    %c2_51 = arith.constant 2 : index
    %c8_52 = arith.constant 8 : index
    %c0_53 = arith.constant 0 : index
    %44 = vector.load %arg1[%c0_50, %c2_51, %c8_52, %c0_53] : memref<1x8x72x3xbf16, #tpu.memory_space<vmem>>, vector<1x1x64x3xbf16>
    %45 = vector.shape_cast %44 : vector<1x1x64x3xbf16> to vector<64x3xbf16>
    %c7 = arith.constant 7 : index
    %c0_54 = arith.constant 0 : index
    %c0_55 = arith.constant 0 : index
    %46 = vector.load %arg2[%c7, %c0_54, %c0_55] : memref<9x3x32xbf16, #tpu.memory_space<vmem>>, vector<1x3x32xbf16>
    %47 = vector.shape_cast %46 : vector<1x3x32xbf16> to vector<3x32xbf16>
    %cst_56 = arith.constant dense<0.000000e+00> : vector<64x32xf32>
    %48 = tpu.matmul %45, %47, %cst_56 {dimension_numbers = #tpu.dot_dimension_numbers<[1], [0], [0], [1], [0, 0, 1, 1], [], []>} : vector<64x3xbf16>, vector<3x32xbf16>, vector<64x32xf32> -> vector<64x32xf32>
    %49 = arith.addf %43, %48 : vector<64x32xf32>
    %c0_57 = arith.constant 0 : index
    %c1_58 = arith.constant 1 : index
    %c8_59 = arith.constant 8 : index
    %c0_60 = arith.constant 0 : index
    %50 = vector.load %arg1[%c0_57, %c1_58, %c8_59, %c0_60] : memref<1x8x72x3xbf16, #tpu.memory_space<vmem>>, vector<1x1x64x3xbf16>
    %51 = vector.shape_cast %50 : vector<1x1x64x3xbf16> to vector<64x3xbf16>
    %c8_61 = arith.constant 8 : index
    %c0_62 = arith.constant 0 : index
    %c0_63 = arith.constant 0 : index
    %52 = vector.load %arg2[%c8_61, %c0_62, %c0_63] : memref<9x3x32xbf16, #tpu.memory_space<vmem>>, vector<1x3x32xbf16>
    %53 = vector.shape_cast %52 : vector<1x3x32xbf16> to vector<3x32xbf16>
    %cst_64 = arith.constant dense<0.000000e+00> : vector<64x32xf32>
    %54 = tpu.matmul %51, %53, %cst_64 {dimension_numbers = #tpu.dot_dimension_numbers<[1], [0], [0], [1], [0, 0, 1, 1], [], []>} : vector<64x3xbf16>, vector<3x32xbf16>, vector<64x32xf32> -> vector<64x32xf32>
    %55 = arith.addf %49, %54 : vector<64x32xf32>
    %cst_65 = arith.constant 0.000000e+00 : f32
    %56 = vector.broadcast %cst_65 : f32 to vector<64x32xf32>
    %c0_66 = arith.constant 0 : index
    %c2_67 = arith.constant 2 : index
    %c0_68 = arith.constant 0 : index
    %c0_69 = arith.constant 0 : index
    %57 = vector.load %arg1[%c0_66, %c2_67, %c0_68, %c0_69] : memref<1x8x72x3xbf16, #tpu.memory_space<vmem>>, vector<1x1x64x3xbf16>
    %58 = vector.shape_cast %57 : vector<1x1x64x3xbf16> to vector<64x3xbf16>
    %c0_70 = arith.constant 0 : index
    %c0_71 = arith.constant 0 : index
    %c0_72 = arith.constant 0 : index
    %59 = vector.load %arg2[%c0_70, %c0_71, %c0_72] : memref<9x3x32xbf16, #tpu.memory_space<vmem>>, vector<1x3x32xbf16>
    %60 = vector.shape_cast %59 : vector<1x3x32xbf16> to vector<3x32xbf16>
    %cst_73 = arith.constant dense<0.000000e+00> : vector<64x32xf32>
    %61 = tpu.matmul %58, %60, %cst_73 {dimension_numbers = #tpu.dot_dimension_numbers<[1], [0], [0], [1], [0, 0, 1, 1], [], []>} : vector<64x3xbf16>, vector<3x32xbf16>, vector<64x32xf32> -> vector<64x32xf32>
    %62 = arith.addf %56, %61 : vector<64x32xf32>
    %c0_74 = arith.constant 0 : index
    %c1_75 = arith.constant 1 : index
    %c0_76 = arith.constant 0 : index
    %c0_77 = arith.constant 0 : index
    %63 = vector.load %arg1[%c0_74, %c1_75, %c0_76, %c0_77] : memref<1x8x72x3xbf16, #tpu.memory_space<vmem>>, vector<1x1x64x3xbf16>
    %64 = vector.shape_cast %63 : vector<1x1x64x3xbf16> to vector<64x3xbf16>
    %c1_78 = arith.constant 1 : index
    %c0_79 = arith.constant 0 : index
    %c0_80 = arith.constant 0 : index
    %65 = vector.load %arg2[%c1_78, %c0_79, %c0_80] : memref<9x3x32xbf16, #tpu.memory_space<vmem>>, vector<1x3x32xbf16>
    %66 = vector.shape_cast %65 : vector<1x3x32xbf16> to vector<3x32xbf16>
    %cst_81 = arith.constant dense<0.000000e+00> : vector<64x32xf32>
    %67 = tpu.matmul %64, %66, %cst_81 {dimension_numbers = #tpu.dot_dimension_numbers<[1], [0], [0], [1], [0, 0, 1, 1], [], []>} : vector<64x3xbf16>, vector<3x32xbf16>, vector<64x32xf32> -> vector<64x32xf32>
    %68 = arith.addf %62, %67 : vector<64x32xf32>
    %c0_82 = arith.constant 0 : index
    %c3_83 = arith.constant 3 : index
    %c0_84 = arith.constant 0 : index
    %c0_85 = arith.constant 0 : index
    %69 = vector.load %arg1[%c0_82, %c3_83, %c0_84, %c0_85] : memref<1x8x72x3xbf16, #tpu.memory_space<vmem>>, vector<1x1x64x3xbf16>
    %70 = vector.shape_cast %69 : vector<1x1x64x3xbf16> to vector<64x3xbf16>
    %c2_86 = arith.constant 2 : index
    %c0_87 = arith.constant 0 : index
    %c0_88 = arith.constant 0 : index
    %71 = vector.load %arg2[%c2_86, %c0_87, %c0_88] : memref<9x3x32xbf16, #tpu.memory_space<vmem>>, vector<1x3x32xbf16>
    %72 = vector.shape_cast %71 : vector<1x3x32xbf16> to vector<3x32xbf16>
    %cst_89 = arith.constant dense<0.000000e+00> : vector<64x32xf32>
    %73 = tpu.matmul %70, %72, %cst_89 {dimension_numbers = #tpu.dot_dimension_numbers<[1], [0], [0], [1], [0, 0, 1, 1], [], []>} : vector<64x3xbf16>, vector<3x32xbf16>, vector<64x32xf32> -> vector<64x32xf32>
    %74 = arith.addf %68, %73 : vector<64x32xf32>
    %c0_90 = arith.constant 0 : index
    %c6_91 = arith.constant 6 : index
    %c0_92 = arith.constant 0 : index
    %c0_93 = arith.constant 0 : index
    %75 = vector.load %arg1[%c0_90, %c6_91, %c0_92, %c0_93] : memref<1x8x72x3xbf16, #tpu.memory_space<vmem>>, vector<1x1x64x3xbf16>
    %76 = vector.shape_cast %75 : vector<1x1x64x3xbf16> to vector<64x3xbf16>
    %c3_94 = arith.constant 3 : index
    %c0_95 = arith.constant 0 : index
    %c0_96 = arith.constant 0 : index
    %77 = vector.load %arg2[%c3_94, %c0_95, %c0_96] : memref<9x3x32xbf16, #tpu.memory_space<vmem>>, vector<1x3x32xbf16>
    %78 = vector.shape_cast %77 : vector<1x3x32xbf16> to vector<3x32xbf16>
    %cst_97 = arith.constant dense<0.000000e+00> : vector<64x32xf32>
    %79 = tpu.matmul %76, %78, %cst_97 {dimension_numbers = #tpu.dot_dimension_numbers<[1], [0], [0], [1], [0, 0, 1, 1], [], []>} : vector<64x3xbf16>, vector<3x32xbf16>, vector<64x32xf32> -> vector<64x32xf32>
    %80 = arith.addf %74, %79 : vector<64x32xf32>
    %c0_98 = arith.constant 0 : index
    %c5_99 = arith.constant 5 : index
    %c0_100 = arith.constant 0 : index
    %c0_101 = arith.constant 0 : index
    %81 = vector.load %arg1[%c0_98, %c5_99, %c0_100, %c0_101] : memref<1x8x72x3xbf16, #tpu.memory_space<vmem>>, vector<1x1x64x3xbf16>
    %82 = vector.shape_cast %81 : vector<1x1x64x3xbf16> to vector<64x3xbf16>
    %c4_102 = arith.constant 4 : index
    %c0_103 = arith.constant 0 : index
    %c0_104 = arith.constant 0 : index
    %83 = vector.load %arg2[%c4_102, %c0_103, %c0_104] : memref<9x3x32xbf16, #tpu.memory_space<vmem>>, vector<1x3x32xbf16>
    %84 = vector.shape_cast %83 : vector<1x3x32xbf16> to vector<3x32xbf16>
    %cst_105 = arith.constant dense<0.000000e+00> : vector<64x32xf32>
    %85 = tpu.matmul %82, %84, %cst_105 {dimension_numbers = #tpu.dot_dimension_numbers<[1], [0], [0], [1], [0, 0, 1, 1], [], []>} : vector<64x3xbf16>, vector<3x32xbf16>, vector<64x32xf32> -> vector<64x32xf32>
    %86 = arith.addf %80, %85 : vector<64x32xf32>
    %c0_106 = arith.constant 0 : index
    %c7_107 = arith.constant 7 : index
    %c0_108 = arith.constant 0 : index
    %c0_109 = arith.constant 0 : index
    %87 = vector.load %arg1[%c0_106, %c7_107, %c0_108, %c0_109] : memref<1x8x72x3xbf16, #tpu.memory_space<vmem>>, vector<1x1x64x3xbf16>
    %88 = vector.shape_cast %87 : vector<1x1x64x3xbf16> to vector<64x3xbf16>
    %c5_110 = arith.constant 5 : index
    %c0_111 = arith.constant 0 : index
    %c0_112 = arith.constant 0 : index
    %89 = vector.load %arg2[%c5_110, %c0_111, %c0_112] : memref<9x3x32xbf16, #tpu.memory_space<vmem>>, vector<1x3x32xbf16>
    %90 = vector.shape_cast %89 : vector<1x3x32xbf16> to vector<3x32xbf16>
    %cst_113 = arith.constant dense<0.000000e+00> : vector<64x32xf32>
    %91 = tpu.matmul %88, %90, %cst_113 {dimension_numbers = #tpu.dot_dimension_numbers<[1], [0], [0], [1], [0, 0, 1, 1], [], []>} : vector<64x3xbf16>, vector<3x32xbf16>, vector<64x32xf32> -> vector<64x32xf32>
    %92 = arith.addf %86, %91 : vector<64x32xf32>
    %c0_114 = arith.constant 0 : index
    %c2_115 = arith.constant 2 : index
    %c8_116 = arith.constant 8 : index
    %c0_117 = arith.constant 0 : index
    %93 = vector.load %arg1[%c0_114, %c2_115, %c8_116, %c0_117] : memref<1x8x72x3xbf16, #tpu.memory_space<vmem>>, vector<1x1x64x3xbf16>
    %94 = vector.shape_cast %93 : vector<1x1x64x3xbf16> to vector<64x3xbf16>
    %c6_118 = arith.constant 6 : index
    %c0_119 = arith.constant 0 : index
    %c0_120 = arith.constant 0 : index
    %95 = vector.load %arg2[%c6_118, %c0_119, %c0_120] : memref<9x3x32xbf16, #tpu.memory_space<vmem>>, vector<1x3x32xbf16>
    %96 = vector.shape_cast %95 : vector<1x3x32xbf16> to vector<3x32xbf16>
    %cst_121 = arith.constant dense<0.000000e+00> : vector<64x32xf32>
    %97 = tpu.matmul %94, %96, %cst_121 {dimension_numbers = #tpu.dot_dimension_numbers<[1], [0], [0], [1], [0, 0, 1, 1], [], []>} : vector<64x3xbf16>, vector<3x32xbf16>, vector<64x32xf32> -> vector<64x32xf32>
    %98 = arith.addf %92, %97 : vector<64x32xf32>
    %c0_122 = arith.constant 0 : index
    %c1_123 = arith.constant 1 : index
    %c8_124 = arith.constant 8 : index
    %c0_125 = arith.constant 0 : index
    %99 = vector.load %arg1[%c0_122, %c1_123, %c8_124, %c0_125] : memref<1x8x72x3xbf16, #tpu.memory_space<vmem>>, vector<1x1x64x3xbf16>
    %100 = vector.shape_cast %99 : vector<1x1x64x3xbf16> to vector<64x3xbf16>
    %c7_126 = arith.constant 7 : index
    %c0_127 = arith.constant 0 : index
    %c0_128 = arith.constant 0 : index
    %101 = vector.load %arg2[%c7_126, %c0_127, %c0_128] : memref<9x3x32xbf16, #tpu.memory_space<vmem>>, vector<1x3x32xbf16>
    %102 = vector.shape_cast %101 : vector<1x3x32xbf16> to vector<3x32xbf16>
    %cst_129 = arith.constant dense<0.000000e+00> : vector<64x32xf32>
    %103 = tpu.matmul %100, %102, %cst_129 {dimension_numbers = #tpu.dot_dimension_numbers<[1], [0], [0], [1], [0, 0, 1, 1], [], []>} : vector<64x3xbf16>, vector<3x32xbf16>, vector<64x32xf32> -> vector<64x32xf32>
    %104 = arith.addf %98, %103 : vector<64x32xf32>
    %c0_130 = arith.constant 0 : index
    %c3_131 = arith.constant 3 : index
    %c8_132 = arith.constant 8 : index
    %c0_133 = arith.constant 0 : index
    %105 = vector.load %arg1[%c0_130, %c3_131, %c8_132, %c0_133] : memref<1x8x72x3xbf16, #tpu.memory_space<vmem>>, vector<1x1x64x3xbf16>
    %106 = vector.shape_cast %105 : vector<1x1x64x3xbf16> to vector<64x3xbf16>
    %c8_134 = arith.constant 8 : index
    %c0_135 = arith.constant 0 : index
    %c0_136 = arith.constant 0 : index
    %107 = vector.load %arg2[%c8_134, %c0_135, %c0_136] : memref<9x3x32xbf16, #tpu.memory_space<vmem>>, vector<1x3x32xbf16>
    %108 = vector.shape_cast %107 : vector<1x3x32xbf16> to vector<3x32xbf16>
    %cst_137 = arith.constant dense<0.000000e+00> : vector<64x32xf32>
    %109 = tpu.matmul %106, %108, %cst_137 {dimension_numbers = #tpu.dot_dimension_numbers<[1], [0], [0], [1], [0, 0, 1, 1], [], []>} : vector<64x3xbf16>, vector<3x32xbf16>, vector<64x32xf32> -> vector<64x32xf32>
    %110 = arith.addf %104, %109 : vector<64x32xf32>
    %111 = arith.maximumf %55, %110 : vector<64x32xf32>
    %cst_138 = arith.constant 0.000000e+00 : f32
    %112 = vector.broadcast %cst_138 : f32 to vector<64x32xf32>
    %c0_139 = arith.constant 0 : index
    %c4_140 = arith.constant 4 : index
    %c0_141 = arith.constant 0 : index
    %c0_142 = arith.constant 0 : index
    %113 = vector.load %arg1[%c0_139, %c4_140, %c0_141, %c0_142] : memref<1x8x72x3xbf16, #tpu.memory_space<vmem>>, vector<1x1x64x3xbf16>
    %114 = vector.shape_cast %113 : vector<1x1x64x3xbf16> to vector<64x3xbf16>
    %c0_143 = arith.constant 0 : index
    %c0_144 = arith.constant 0 : index
    %c0_145 = arith.constant 0 : index
    %115 = vector.load %arg2[%c0_143, %c0_144, %c0_145] : memref<9x3x32xbf16, #tpu.memory_space<vmem>>, vector<1x3x32xbf16>
    %116 = vector.shape_cast %115 : vector<1x3x32xbf16> to vector<3x32xbf16>
    %cst_146 = arith.constant dense<0.000000e+00> : vector<64x32xf32>
    %117 = tpu.matmul %114, %116, %cst_146 {dimension_numbers = #tpu.dot_dimension_numbers<[1], [0], [0], [1], [0, 0, 1, 1], [], []>} : vector<64x3xbf16>, vector<3x32xbf16>, vector<64x32xf32> -> vector<64x32xf32>
    %118 = arith.addf %112, %117 : vector<64x32xf32>
    %c0_147 = arith.constant 0 : index
    %c6_148 = arith.constant 6 : index
    %c0_149 = arith.constant 0 : index
    %c0_150 = arith.constant 0 : index
    %119 = vector.load %arg1[%c0_147, %c6_148, %c0_149, %c0_150] : memref<1x8x72x3xbf16, #tpu.memory_space<vmem>>, vector<1x1x64x3xbf16>
    %120 = vector.shape_cast %119 : vector<1x1x64x3xbf16> to vector<64x3xbf16>
    %c1_151 = arith.constant 1 : index
    %c0_152 = arith.constant 0 : index
    %c0_153 = arith.constant 0 : index
    %121 = vector.load %arg2[%c1_151, %c0_152, %c0_153] : memref<9x3x32xbf16, #tpu.memory_space<vmem>>, vector<1x3x32xbf16>
    %122 = vector.shape_cast %121 : vector<1x3x32xbf16> to vector<3x32xbf16>
    %cst_154 = arith.constant dense<0.000000e+00> : vector<64x32xf32>
    %123 = tpu.matmul %120, %122, %cst_154 {dimension_numbers = #tpu.dot_dimension_numbers<[1], [0], [0], [1], [0, 0, 1, 1], [], []>} : vector<64x3xbf16>, vector<3x32xbf16>, vector<64x32xf32> -> vector<64x32xf32>
    %124 = arith.addf %118, %123 : vector<64x32xf32>
    %c0_155 = arith.constant 0 : index
    %c5_156 = arith.constant 5 : index
    %c0_157 = arith.constant 0 : index
    %c0_158 = arith.constant 0 : index
    %125 = vector.load %arg1[%c0_155, %c5_156, %c0_157, %c0_158] : memref<1x8x72x3xbf16, #tpu.memory_space<vmem>>, vector<1x1x64x3xbf16>
    %126 = vector.shape_cast %125 : vector<1x1x64x3xbf16> to vector<64x3xbf16>
    %c2_159 = arith.constant 2 : index
    %c0_160 = arith.constant 0 : index
    %c0_161 = arith.constant 0 : index
    %127 = vector.load %arg2[%c2_159, %c0_160, %c0_161] : memref<9x3x32xbf16, #tpu.memory_space<vmem>>, vector<1x3x32xbf16>
    %128 = vector.shape_cast %127 : vector<1x3x32xbf16> to vector<3x32xbf16>
    %cst_162 = arith.constant dense<0.000000e+00> : vector<64x32xf32>
    %129 = tpu.matmul %126, %128, %cst_162 {dimension_numbers = #tpu.dot_dimension_numbers<[1], [0], [0], [1], [0, 0, 1, 1], [], []>} : vector<64x3xbf16>, vector<3x32xbf16>, vector<64x32xf32> -> vector<64x32xf32>
    %130 = arith.addf %124, %129 : vector<64x32xf32>
    %c0_163 = arith.constant 0 : index
    %c0_164 = arith.constant 0 : index
    %c8_165 = arith.constant 8 : index
    %c0_166 = arith.constant 0 : index
    %131 = vector.load %arg1[%c0_163, %c0_164, %c8_165, %c0_166] : memref<1x8x72x3xbf16, #tpu.memory_space<vmem>>, vector<1x1x64x3xbf16>
    %132 = vector.shape_cast %131 : vector<1x1x64x3xbf16> to vector<64x3xbf16>
    %c3_167 = arith.constant 3 : index
    %c0_168 = arith.constant 0 : index
    %c0_169 = arith.constant 0 : index
    %133 = vector.load %arg2[%c3_167, %c0_168, %c0_169] : memref<9x3x32xbf16, #tpu.memory_space<vmem>>, vector<1x3x32xbf16>
    %134 = vector.shape_cast %133 : vector<1x3x32xbf16> to vector<3x32xbf16>
    %cst_170 = arith.constant dense<0.000000e+00> : vector<64x32xf32>
    %135 = tpu.matmul %132, %134, %cst_170 {dimension_numbers = #tpu.dot_dimension_numbers<[1], [0], [0], [1], [0, 0, 1, 1], [], []>} : vector<64x3xbf16>, vector<3x32xbf16>, vector<64x32xf32> -> vector<64x32xf32>
    %136 = arith.addf %130, %135 : vector<64x32xf32>
    %c0_171 = arith.constant 0 : index
    %c2_172 = arith.constant 2 : index
    %c8_173 = arith.constant 8 : index
    %c0_174 = arith.constant 0 : index
    %137 = vector.load %arg1[%c0_171, %c2_172, %c8_173, %c0_174] : memref<1x8x72x3xbf16, #tpu.memory_space<vmem>>, vector<1x1x64x3xbf16>
    %138 = vector.shape_cast %137 : vector<1x1x64x3xbf16> to vector<64x3xbf16>
    %c4_175 = arith.constant 4 : index
    %c0_176 = arith.constant 0 : index
    %c0_177 = arith.constant 0 : index
    %139 = vector.load %arg2[%c4_175, %c0_176, %c0_177] : memref<9x3x32xbf16, #tpu.memory_space<vmem>>, vector<1x3x32xbf16>
    %140 = vector.shape_cast %139 : vector<1x3x32xbf16> to vector<3x32xbf16>
    %cst_178 = arith.constant dense<0.000000e+00> : vector<64x32xf32>
    %141 = tpu.matmul %138, %140, %cst_178 {dimension_numbers = #tpu.dot_dimension_numbers<[1], [0], [0], [1], [0, 0, 1, 1], [], []>} : vector<64x3xbf16>, vector<3x32xbf16>, vector<64x32xf32> -> vector<64x32xf32>
    %142 = arith.addf %136, %141 : vector<64x32xf32>
    %c0_179 = arith.constant 0 : index
    %c1_180 = arith.constant 1 : index
    %c8_181 = arith.constant 8 : index
    %c0_182 = arith.constant 0 : index
    %143 = vector.load %arg1[%c0_179, %c1_180, %c8_181, %c0_182] : memref<1x8x72x3xbf16, #tpu.memory_space<vmem>>, vector<1x1x64x3xbf16>
    %144 = vector.shape_cast %143 : vector<1x1x64x3xbf16> to vector<64x3xbf16>
    %c5_183 = arith.constant 5 : index
    %c0_184 = arith.constant 0 : index
    %c0_185 = arith.constant 0 : index
    %145 = vector.load %arg2[%c5_183, %c0_184, %c0_185] : memref<9x3x32xbf16, #tpu.memory_space<vmem>>, vector<1x3x32xbf16>
    %146 = vector.shape_cast %145 : vector<1x3x32xbf16> to vector<3x32xbf16>
    %cst_186 = arith.constant dense<0.000000e+00> : vector<64x32xf32>
    %147 = tpu.matmul %144, %146, %cst_186 {dimension_numbers = #tpu.dot_dimension_numbers<[1], [0], [0], [1], [0, 0, 1, 1], [], []>} : vector<64x3xbf16>, vector<3x32xbf16>, vector<64x32xf32> -> vector<64x32xf32>
    %148 = arith.addf %142, %147 : vector<64x32xf32>
    %c0_187 = arith.constant 0 : index
    %c4_188 = arith.constant 4 : index
    %c8_189 = arith.constant 8 : index
    %c0_190 = arith.constant 0 : index
    %149 = vector.load %arg1[%c0_187, %c4_188, %c8_189, %c0_190] : memref<1x8x72x3xbf16, #tpu.memory_space<vmem>>, vector<1x1x64x3xbf16>
    %150 = vector.shape_cast %149 : vector<1x1x64x3xbf16> to vector<64x3xbf16>
    %c6_191 = arith.constant 6 : index
    %c0_192 = arith.constant 0 : index
    %c0_193 = arith.constant 0 : index
    %151 = vector.load %arg2[%c6_191, %c0_192, %c0_193] : memref<9x3x32xbf16, #tpu.memory_space<vmem>>, vector<1x3x32xbf16>
    %152 = vector.shape_cast %151 : vector<1x3x32xbf16> to vector<3x32xbf16>
    %cst_194 = arith.constant dense<0.000000e+00> : vector<64x32xf32>
    %153 = tpu.matmul %150, %152, %cst_194 {dimension_numbers = #tpu.dot_dimension_numbers<[1], [0], [0], [1], [0, 0, 1, 1], [], []>} : vector<64x3xbf16>, vector<3x32xbf16>, vector<64x32xf32> -> vector<64x32xf32>
    %154 = arith.addf %148, %153 : vector<64x32xf32>
    %c0_195 = arith.constant 0 : index
    %c6_196 = arith.constant 6 : index
    %c8_197 = arith.constant 8 : index
    %c0_198 = arith.constant 0 : index
    %155 = vector.load %arg1[%c0_195, %c6_196, %c8_197, %c0_198] : memref<1x8x72x3xbf16, #tpu.memory_space<vmem>>, vector<1x1x64x3xbf16>
    %156 = vector.shape_cast %155 : vector<1x1x64x3xbf16> to vector<64x3xbf16>
    %c7_199 = arith.constant 7 : index
    %c0_200 = arith.constant 0 : index
    %c0_201 = arith.constant 0 : index
    %157 = vector.load %arg2[%c7_199, %c0_200, %c0_201] : memref<9x3x32xbf16, #tpu.memory_space<vmem>>, vector<1x3x32xbf16>
    %158 = vector.shape_cast %157 : vector<1x3x32xbf16> to vector<3x32xbf16>
    %cst_202 = arith.constant dense<0.000000e+00> : vector<64x32xf32>
    %159 = tpu.matmul %156, %158, %cst_202 {dimension_numbers = #tpu.dot_dimension_numbers<[1], [0], [0], [1], [0, 0, 1, 1], [], []>} : vector<64x3xbf16>, vector<3x32xbf16>, vector<64x32xf32> -> vector<64x32xf32>
    %160 = arith.addf %154, %159 : vector<64x32xf32>
    %c0_203 = arith.constant 0 : index
    %c5_204 = arith.constant 5 : index
    %c8_205 = arith.constant 8 : index
    %c0_206 = arith.constant 0 : index
    %161 = vector.load %arg1[%c0_203, %c5_204, %c8_205, %c0_206] : memref<1x8x72x3xbf16, #tpu.memory_space<vmem>>, vector<1x1x64x3xbf16>
    %162 = vector.shape_cast %161 : vector<1x1x64x3xbf16> to vector<64x3xbf16>
    %c8_207 = arith.constant 8 : index
    %c0_208 = arith.constant 0 : index
    %c0_209 = arith.constant 0 : index
    %163 = vector.load %arg2[%c8_207, %c0_208, %c0_209] : memref<9x3x32xbf16, #tpu.memory_space<vmem>>, vector<1x3x32xbf16>
    %164 = vector.shape_cast %163 : vector<1x3x32xbf16> to vector<3x32xbf16>
    %cst_210 = arith.constant dense<0.000000e+00> : vector<64x32xf32>
    %165 = tpu.matmul %162, %164, %cst_210 {dimension_numbers = #tpu.dot_dimension_numbers<[1], [0], [0], [1], [0, 0, 1, 1], [], []>} : vector<64x3xbf16>, vector<3x32xbf16>, vector<64x32xf32> -> vector<64x32xf32>
    %166 = arith.addf %160, %165 : vector<64x32xf32>
    %167 = arith.maximumf %111, %166 : vector<64x32xf32>
    %cst_211 = arith.constant 0.000000e+00 : f32
    %168 = vector.broadcast %cst_211 : f32 to vector<64x32xf32>
    %c0_212 = arith.constant 0 : index
    %c6_213 = arith.constant 6 : index
    %c0_214 = arith.constant 0 : index
    %c0_215 = arith.constant 0 : index
    %169 = vector.load %arg1[%c0_212, %c6_213, %c0_214, %c0_215] : memref<1x8x72x3xbf16, #tpu.memory_space<vmem>>, vector<1x1x64x3xbf16>
    %170 = vector.shape_cast %169 : vector<1x1x64x3xbf16> to vector<64x3xbf16>
    %c0_216 = arith.constant 0 : index
    %c0_217 = arith.constant 0 : index
    %c0_218 = arith.constant 0 : index
    %171 = vector.load %arg2[%c0_216, %c0_217, %c0_218] : memref<9x3x32xbf16, #tpu.memory_space<vmem>>, vector<1x3x32xbf16>
    %172 = vector.shape_cast %171 : vector<1x3x32xbf16> to vector<3x32xbf16>
    %cst_219 = arith.constant dense<0.000000e+00> : vector<64x32xf32>
    %173 = tpu.matmul %170, %172, %cst_219 {dimension_numbers = #tpu.dot_dimension_numbers<[1], [0], [0], [1], [0, 0, 1, 1], [], []>} : vector<64x3xbf16>, vector<3x32xbf16>, vector<64x32xf32> -> vector<64x32xf32>
    %174 = arith.addf %168, %173 : vector<64x32xf32>
    %c0_220 = arith.constant 0 : index
    %c5_221 = arith.constant 5 : index
    %c0_222 = arith.constant 0 : index
    %c0_223 = arith.constant 0 : index
    %175 = vector.load %arg1[%c0_220, %c5_221, %c0_222, %c0_223] : memref<1x8x72x3xbf16, #tpu.memory_space<vmem>>, vector<1x1x64x3xbf16>
    %176 = vector.shape_cast %175 : vector<1x1x64x3xbf16> to vector<64x3xbf16>
    %c1_224 = arith.constant 1 : index
    %c0_225 = arith.constant 0 : index
    %c0_226 = arith.constant 0 : index
    %177 = vector.load %arg2[%c1_224, %c0_225, %c0_226] : memref<9x3x32xbf16, #tpu.memory_space<vmem>>, vector<1x3x32xbf16>
    %178 = vector.shape_cast %177 : vector<1x3x32xbf16> to vector<3x32xbf16>
    %cst_227 = arith.constant dense<0.000000e+00> : vector<64x32xf32>
    %179 = tpu.matmul %176, %178, %cst_227 {dimension_numbers = #tpu.dot_dimension_numbers<[1], [0], [0], [1], [0, 0, 1, 1], [], []>} : vector<64x3xbf16>, vector<3x32xbf16>, vector<64x32xf32> -> vector<64x32xf32>
    %180 = arith.addf %174, %179 : vector<64x32xf32>
    %c0_228 = arith.constant 0 : index
    %c7_229 = arith.constant 7 : index
    %c0_230 = arith.constant 0 : index
    %c0_231 = arith.constant 0 : index
    %181 = vector.load %arg1[%c0_228, %c7_229, %c0_230, %c0_231] : memref<1x8x72x3xbf16, #tpu.memory_space<vmem>>, vector<1x1x64x3xbf16>
    %182 = vector.shape_cast %181 : vector<1x1x64x3xbf16> to vector<64x3xbf16>
    %c2_232 = arith.constant 2 : index
    %c0_233 = arith.constant 0 : index
    %c0_234 = arith.constant 0 : index
    %183 = vector.load %arg2[%c2_232, %c0_233, %c0_234] : memref<9x3x32xbf16, #tpu.memory_space<vmem>>, vector<1x3x32xbf16>
    %184 = vector.shape_cast %183 : vector<1x3x32xbf16> to vector<3x32xbf16>
    %cst_235 = arith.constant dense<0.000000e+00> : vector<64x32xf32>
    %185 = tpu.matmul %182, %184, %cst_235 {dimension_numbers = #tpu.dot_dimension_numbers<[1], [0], [0], [1], [0, 0, 1, 1], [], []>} : vector<64x3xbf16>, vector<3x32xbf16>, vector<64x32xf32> -> vector<64x32xf32>
    %186 = arith.addf %180, %185 : vector<64x32xf32>
    %c0_236 = arith.constant 0 : index
    %c2_237 = arith.constant 2 : index
    %c8_238 = arith.constant 8 : index
    %c0_239 = arith.constant 0 : index
    %187 = vector.load %arg1[%c0_236, %c2_237, %c8_238, %c0_239] : memref<1x8x72x3xbf16, #tpu.memory_space<vmem>>, vector<1x1x64x3xbf16>
    %188 = vector.shape_cast %187 : vector<1x1x64x3xbf16> to vector<64x3xbf16>
    %c3_240 = arith.constant 3 : index
    %c0_241 = arith.constant 0 : index
    %c0_242 = arith.constant 0 : index
    %189 = vector.load %arg2[%c3_240, %c0_241, %c0_242] : memref<9x3x32xbf16, #tpu.memory_space<vmem>>, vector<1x3x32xbf16>
    %190 = vector.shape_cast %189 : vector<1x3x32xbf16> to vector<3x32xbf16>
    %cst_243 = arith.constant dense<0.000000e+00> : vector<64x32xf32>
    %191 = tpu.matmul %188, %190, %cst_243 {dimension_numbers = #tpu.dot_dimension_numbers<[1], [0], [0], [1], [0, 0, 1, 1], [], []>} : vector<64x3xbf16>, vector<3x32xbf16>, vector<64x32xf32> -> vector<64x32xf32>
    %192 = arith.addf %186, %191 : vector<64x32xf32>
    %c0_244 = arith.constant 0 : index
    %c1_245 = arith.constant 1 : index
    %c8_246 = arith.constant 8 : index
    %c0_247 = arith.constant 0 : index
    %193 = vector.load %arg1[%c0_244, %c1_245, %c8_246, %c0_247] : memref<1x8x72x3xbf16, #tpu.memory_space<vmem>>, vector<1x1x64x3xbf16>
    %194 = vector.shape_cast %193 : vector<1x1x64x3xbf16> to vector<64x3xbf16>
    %c4_248 = arith.constant 4 : index
    %c0_249 = arith.constant 0 : index
    %c0_250 = arith.constant 0 : index
    %195 = vector.load %arg2[%c4_248, %c0_249, %c0_250] : memref<9x3x32xbf16, #tpu.memory_space<vmem>>, vector<1x3x32xbf16>
    %196 = vector.shape_cast %195 : vector<1x3x32xbf16> to vector<3x32xbf16>
    %cst_251 = arith.constant dense<0.000000e+00> : vector<64x32xf32>
    %197 = tpu.matmul %194, %196, %cst_251 {dimension_numbers = #tpu.dot_dimension_numbers<[1], [0], [0], [1], [0, 0, 1, 1], [], []>} : vector<64x3xbf16>, vector<3x32xbf16>, vector<64x32xf32> -> vector<64x32xf32>
    %198 = arith.addf %192, %197 : vector<64x32xf32>
    %c0_252 = arith.constant 0 : index
    %c3_253 = arith.constant 3 : index
    %c8_254 = arith.constant 8 : index
    %c0_255 = arith.constant 0 : index
    %199 = vector.load %arg1[%c0_252, %c3_253, %c8_254, %c0_255] : memref<1x8x72x3xbf16, #tpu.memory_space<vmem>>, vector<1x1x64x3xbf16>
    %200 = vector.shape_cast %199 : vector<1x1x64x3xbf16> to vector<64x3xbf16>
    %c5_256 = arith.constant 5 : index
    %c0_257 = arith.constant 0 : index
    %c0_258 = arith.constant 0 : index
    %201 = vector.load %arg2[%c5_256, %c0_257, %c0_258] : memref<9x3x32xbf16, #tpu.memory_space<vmem>>, vector<1x3x32xbf16>
    %202 = vector.shape_cast %201 : vector<1x3x32xbf16> to vector<3x32xbf16>
    %cst_259 = arith.constant dense<0.000000e+00> : vector<64x32xf32>
    %203 = tpu.matmul %200, %202, %cst_259 {dimension_numbers = #tpu.dot_dimension_numbers<[1], [0], [0], [1], [0, 0, 1, 1], [], []>} : vector<64x3xbf16>, vector<3x32xbf16>, vector<64x32xf32> -> vector<64x32xf32>
    %204 = arith.addf %198, %203 : vector<64x32xf32>
    %c0_260 = arith.constant 0 : index
    %c6_261 = arith.constant 6 : index
    %c8_262 = arith.constant 8 : index
    %c0_263 = arith.constant 0 : index
    %205 = vector.load %arg1[%c0_260, %c6_261, %c8_262, %c0_263] : memref<1x8x72x3xbf16, #tpu.memory_space<vmem>>, vector<1x1x64x3xbf16>
    %206 = vector.shape_cast %205 : vector<1x1x64x3xbf16> to vector<64x3xbf16>
    %c6_264 = arith.constant 6 : index
    %c0_265 = arith.constant 0 : index
    %c0_266 = arith.constant 0 : index
    %207 = vector.load %arg2[%c6_264, %c0_265, %c0_266] : memref<9x3x32xbf16, #tpu.memory_space<vmem>>, vector<1x3x32xbf16>
    %208 = vector.shape_cast %207 : vector<1x3x32xbf16> to vector<3x32xbf16>
    %cst_267 = arith.constant dense<0.000000e+00> : vector<64x32xf32>
    %209 = tpu.matmul %206, %208, %cst_267 {dimension_numbers = #tpu.dot_dimension_numbers<[1], [0], [0], [1], [0, 0, 1, 1], [], []>} : vector<64x3xbf16>, vector<3x32xbf16>, vector<64x32xf32> -> vector<64x32xf32>
    %210 = arith.addf %204, %209 : vector<64x32xf32>
    %c0_268 = arith.constant 0 : index
    %c5_269 = arith.constant 5 : index
    %c8_270 = arith.constant 8 : index
    %c0_271 = arith.constant 0 : index
    %211 = vector.load %arg1[%c0_268, %c5_269, %c8_270, %c0_271] : memref<1x8x72x3xbf16, #tpu.memory_space<vmem>>, vector<1x1x64x3xbf16>
    %212 = vector.shape_cast %211 : vector<1x1x64x3xbf16> to vector<64x3xbf16>
    %c7_272 = arith.constant 7 : index
    %c0_273 = arith.constant 0 : index
    %c0_274 = arith.constant 0 : index
    %213 = vector.load %arg2[%c7_272, %c0_273, %c0_274] : memref<9x3x32xbf16, #tpu.memory_space<vmem>>, vector<1x3x32xbf16>
    %214 = vector.shape_cast %213 : vector<1x3x32xbf16> to vector<3x32xbf16>
    %cst_275 = arith.constant dense<0.000000e+00> : vector<64x32xf32>
    %215 = tpu.matmul %212, %214, %cst_275 {dimension_numbers = #tpu.dot_dimension_numbers<[1], [0], [0], [1], [0, 0, 1, 1], [], []>} : vector<64x3xbf16>, vector<3x32xbf16>, vector<64x32xf32> -> vector<64x32xf32>
    %216 = arith.addf %210, %215 : vector<64x32xf32>
    %c0_276 = arith.constant 0 : index
    %c7_277 = arith.constant 7 : index
    %c8_278 = arith.constant 8 : index
    %c0_279 = arith.constant 0 : index
    %217 = vector.load %arg1[%c0_276, %c7_277, %c8_278, %c0_279] : memref<1x8x72x3xbf16, #tpu.memory_space<vmem>>, vector<1x1x64x3xbf16>
    %218 = vector.shape_cast %217 : vector<1x1x64x3xbf16> to vector<64x3xbf16>
    %c8_280 = arith.constant 8 : index
    %c0_281 = arith.constant 0 : index
    %c0_282 = arith.constant 0 : index
    %219 = vector.load %arg2[%c8_280, %c0_281, %c0_282] : memref<9x3x32xbf16, #tpu.memory_space<vmem>>, vector<1x3x32xbf16>
    %220 = vector.shape_cast %219 : vector<1x3x32xbf16> to vector<3x32xbf16>
    %cst_283 = arith.constant dense<0.000000e+00> : vector<64x32xf32>
    %221 = tpu.matmul %218, %220, %cst_283 {dimension_numbers = #tpu.dot_dimension_numbers<[1], [0], [0], [1], [0, 0, 1, 1], [], []>} : vector<64x3xbf16>, vector<3x32xbf16>, vector<64x32xf32> -> vector<64x32xf32>
    %222 = arith.addf %216, %221 : vector<64x32xf32>
    %223 = arith.maximumf %167, %222 : vector<64x32xf32>
    %224 = vector.broadcast %0 : vector<1x32xf32> to vector<64x32xf32>
    %225 = arith.addf %223, %224 : vector<64x32xf32>
    %cst_284 = arith.constant 0.000000e+00 : f32
    %226 = vector.broadcast %cst_284 : f32 to vector<64x32xf32>
    %227 = arith.maximumf %225, %226 : vector<64x32xf32>
    %228 = arith.truncf %227 : vector<64x32xf32> to vector<64x32xbf16>
    %c0_285 = arith.constant 0 : index
    %c0_286 = arith.constant 0 : index
    %c0_287 = arith.constant 0 : index
    %229 = vector.load %arg4[%c0_285, %c0_286, %c0_287] : memref<1x64x32xbf16, #tpu.memory_space<vmem>>, vector<1x64x32xbf16>
    %230 = vector.shape_cast %229 : vector<1x64x32xbf16> to vector<64x32xbf16>
    %231 = vector.shape_cast %228 : vector<64x32xbf16> to vector<1x64x32xbf16>
    tpu.vector_store %arg4[%c0_285, %c0_286, %c0_287], %231 {strides = array<i32>} : memref<1x64x32xbf16, #tpu.memory_space<vmem>>, vector<1x64x32xbf16>,
    return
  }
  func.func @transform_0(%arg0: i32) -> (i32, i32, i32, i32) {
    %c0_i32 = arith.constant 0 : i32
    %c0_i32_0 = arith.constant 0 : i32
    %c0_i32_1 = arith.constant 0 : i32
    %c0_i32_2 = arith.constant 0 : i32
    return %arg0, %c0_i32, %c0_i32_0, %c0_i32_1 : i32, i32, i32, i32
  }
  func.func @transform_1(%arg0: i32) -> (i32, i32, i32) {
    %c0_i32 = arith.constant 0 : i32
    %c0_i32_0 = arith.constant 0 : i32
    %c0_i32_1 = arith.constant 0 : i32
    %c0_i32_2 = arith.constant 0 : i32
    return %c0_i32, %c0_i32_0, %c0_i32_1 : i32, i32, i32
  }
  func.func @transform_2(%arg0: i32) -> (i32, i32) {
    %c0_i32 = arith.constant 0 : i32
    %c0_i32_0 = arith.constant 0 : i32
    %c0_i32_1 = arith.constant 0 : i32
    return %c0_i32, %c0_i32_0 : i32, i32
  }
  func.func @transform_3(%arg0: i32) -> (i32, i32, i32) {
    %c0_i32 = arith.constant 0 : i32
    %c0_i32_0 = arith.constant 0 : i32
    %c0_i32_1 = arith.constant 0 : i32
    return %arg0, %c0_i32, %c0_i32_0 : i32, i32, i32
  }
}

module attributes {stable_mosaic.version = 11 : i64} {
  func.func @_conv_relu_pool_kernel(%arg0: i32, %arg1: memref<1x8x20x32xbf16, #tpu.memory_space<vmem>>, %arg2: memref<9x32x64xbf16, #tpu.memory_space<vmem>>, %arg3: memref<1x64xf32, #tpu.memory_space<vmem>>, %arg4: memref<1x16x64xbf16, #tpu.memory_space<vmem>>) attributes {dimension_semantics = [#tpu.dimension_semantics<parallel>], iteration_bounds = array<i64: 2>, scalar_prefetch = 0 : i64, scratch_operands = 0 : i64, tpu.core_type = #tpu.core_type<tc>, window_params = [{transform_indices = @transform_0, window_bounds = array<i64: 1, 8, 20, 32>}, {pipeline_mode = #tpu.pipeline_mode<synchronous>, transform_indices = @transform_1, window_bounds = array<i64: 9, 32, 64>}, {pipeline_mode = #tpu.pipeline_mode<synchronous>, transform_indices = @transform_2, window_bounds = array<i64: 1, 64>}, {transform_indices = @transform_3, window_bounds = array<i64: 1, 16, 64>}]} {
    %c0 = arith.constant 0 : index
    %c0_0 = arith.constant 0 : index
    %0 = vector.load %arg3[%c0, %c0_0] : memref<1x64xf32, #tpu.memory_space<vmem>>, vector<1x64xf32>
    %cst = arith.constant 0.000000e+00 : f32
    %1 = vector.broadcast %cst : f32 to vector<16x64xf32>
    %c0_1 = arith.constant 0 : index
    %c0_2 = arith.constant 0 : index
    %c0_3 = arith.constant 0 : index
    %c0_4 = arith.constant 0 : index
    %2 = vector.load %arg1[%c0_1, %c0_2, %c0_3, %c0_4] : memref<1x8x20x32xbf16, #tpu.memory_space<vmem>>, vector<1x1x16x32xbf16>
    %3 = vector.shape_cast %2 : vector<1x1x16x32xbf16> to vector<16x32xbf16>
    %c0_5 = arith.constant 0 : index
    %c0_6 = arith.constant 0 : index
    %c0_7 = arith.constant 0 : index
    %4 = vector.load %arg2[%c0_5, %c0_6, %c0_7] : memref<9x32x64xbf16, #tpu.memory_space<vmem>>, vector<1x32x64xbf16>
    %5 = vector.shape_cast %4 : vector<1x32x64xbf16> to vector<32x64xbf16>
    %cst_8 = arith.constant dense<0.000000e+00> : vector<16x64xf32>
    %6 = tpu.matmul %3, %5, %cst_8 {dimension_numbers = #tpu.dot_dimension_numbers<[1], [0], [0], [1], [0, 0, 1, 1], [], []>} : vector<16x32xbf16>, vector<32x64xbf16>, vector<16x64xf32> -> vector<16x64xf32>
    %7 = arith.addf %1, %6 : vector<16x64xf32>
    %c0_9 = arith.constant 0 : index
    %c2 = arith.constant 2 : index
    %c0_10 = arith.constant 0 : index
    %c0_11 = arith.constant 0 : index
    %8 = vector.load %arg1[%c0_9, %c2, %c0_10, %c0_11] : memref<1x8x20x32xbf16, #tpu.memory_space<vmem>>, vector<1x1x16x32xbf16>
    %9 = vector.shape_cast %8 : vector<1x1x16x32xbf16> to vector<16x32xbf16>
    %c1 = arith.constant 1 : index
    %c0_12 = arith.constant 0 : index
    %c0_13 = arith.constant 0 : index
    %10 = vector.load %arg2[%c1, %c0_12, %c0_13] : memref<9x32x64xbf16, #tpu.memory_space<vmem>>, vector<1x32x64xbf16>
    %11 = vector.shape_cast %10 : vector<1x32x64xbf16> to vector<32x64xbf16>
    %cst_14 = arith.constant dense<0.000000e+00> : vector<16x64xf32>
    %12 = tpu.matmul %9, %11, %cst_14 {dimension_numbers = #tpu.dot_dimension_numbers<[1], [0], [0], [1], [0, 0, 1, 1], [], []>} : vector<16x32xbf16>, vector<32x64xbf16>, vector<16x64xf32> -> vector<16x64xf32>
    %13 = arith.addf %7, %12 : vector<16x64xf32>
    %c0_15 = arith.constant 0 : index
    %c1_16 = arith.constant 1 : index
    %c0_17 = arith.constant 0 : index
    %c0_18 = arith.constant 0 : index
    %14 = vector.load %arg1[%c0_15, %c1_16, %c0_17, %c0_18] : memref<1x8x20x32xbf16, #tpu.memory_space<vmem>>, vector<1x1x16x32xbf16>
    %15 = vector.shape_cast %14 : vector<1x1x16x32xbf16> to vector<16x32xbf16>
    %c2_19 = arith.constant 2 : index
    %c0_20 = arith.constant 0 : index
    %c0_21 = arith.constant 0 : index
    %16 = vector.load %arg2[%c2_19, %c0_20, %c0_21] : memref<9x32x64xbf16, #tpu.memory_space<vmem>>, vector<1x32x64xbf16>
    %17 = vector.shape_cast %16 : vector<1x32x64xbf16> to vector<32x64xbf16>
    %cst_22 = arith.constant dense<0.000000e+00> : vector<16x64xf32>
    %18 = tpu.matmul %15, %17, %cst_22 {dimension_numbers = #tpu.dot_dimension_numbers<[1], [0], [0], [1], [0, 0, 1, 1], [], []>} : vector<16x32xbf16>, vector<32x64xbf16>, vector<16x64xf32> -> vector<16x64xf32>
    %19 = arith.addf %13, %18 : vector<16x64xf32>
    %c0_23 = arith.constant 0 : index
    %c4 = arith.constant 4 : index
    %c0_24 = arith.constant 0 : index
    %c0_25 = arith.constant 0 : index
    %20 = vector.load %arg1[%c0_23, %c4, %c0_24, %c0_25] : memref<1x8x20x32xbf16, #tpu.memory_space<vmem>>, vector<1x1x16x32xbf16>
    %21 = vector.shape_cast %20 : vector<1x1x16x32xbf16> to vector<16x32xbf16>
    %c3 = arith.constant 3 : index
    %c0_26 = arith.constant 0 : index
    %c0_27 = arith.constant 0 : index
    %22 = vector.load %arg2[%c3, %c0_26, %c0_27] : memref<9x32x64xbf16, #tpu.memory_space<vmem>>, vector<1x32x64xbf16>
    %23 = vector.shape_cast %22 : vector<1x32x64xbf16> to vector<32x64xbf16>
    %cst_28 = arith.constant dense<0.000000e+00> : vector<16x64xf32>
    %24 = tpu.matmul %21, %23, %cst_28 {dimension_numbers = #tpu.dot_dimension_numbers<[1], [0], [0], [1], [0, 0, 1, 1], [], []>} : vector<16x32xbf16>, vector<32x64xbf16>, vector<16x64xf32> -> vector<16x64xf32>
    %25 = arith.addf %19, %24 : vector<16x64xf32>
    %c0_29 = arith.constant 0 : index
    %c6 = arith.constant 6 : index
    %c0_30 = arith.constant 0 : index
    %c0_31 = arith.constant 0 : index
    %26 = vector.load %arg1[%c0_29, %c6, %c0_30, %c0_31] : memref<1x8x20x32xbf16, #tpu.memory_space<vmem>>, vector<1x1x16x32xbf16>
    %27 = vector.shape_cast %26 : vector<1x1x16x32xbf16> to vector<16x32xbf16>
    %c4_32 = arith.constant 4 : index
    %c0_33 = arith.constant 0 : index
    %c0_34 = arith.constant 0 : index
    %28 = vector.load %arg2[%c4_32, %c0_33, %c0_34] : memref<9x32x64xbf16, #tpu.memory_space<vmem>>, vector<1x32x64xbf16>
    %29 = vector.shape_cast %28 : vector<1x32x64xbf16> to vector<32x64xbf16>
    %cst_35 = arith.constant dense<0.000000e+00> : vector<16x64xf32>
    %30 = tpu.matmul %27, %29, %cst_35 {dimension_numbers = #tpu.dot_dimension_numbers<[1], [0], [0], [1], [0, 0, 1, 1], [], []>} : vector<16x32xbf16>, vector<32x64xbf16>, vector<16x64xf32> -> vector<16x64xf32>
    %31 = arith.addf %25, %30 : vector<16x64xf32>
    %c0_36 = arith.constant 0 : index
    %c5 = arith.constant 5 : index
    %c0_37 = arith.constant 0 : index
    %c0_38 = arith.constant 0 : index
    %32 = vector.load %arg1[%c0_36, %c5, %c0_37, %c0_38] : memref<1x8x20x32xbf16, #tpu.memory_space<vmem>>, vector<1x1x16x32xbf16>
    %33 = vector.shape_cast %32 : vector<1x1x16x32xbf16> to vector<16x32xbf16>
    %c5_39 = arith.constant 5 : index
    %c0_40 = arith.constant 0 : index
    %c0_41 = arith.constant 0 : index
    %34 = vector.load %arg2[%c5_39, %c0_40, %c0_41] : memref<9x32x64xbf16, #tpu.memory_space<vmem>>, vector<1x32x64xbf16>
    %35 = vector.shape_cast %34 : vector<1x32x64xbf16> to vector<32x64xbf16>
    %cst_42 = arith.constant dense<0.000000e+00> : vector<16x64xf32>
    %36 = tpu.matmul %33, %35, %cst_42 {dimension_numbers = #tpu.dot_dimension_numbers<[1], [0], [0], [1], [0, 0, 1, 1], [], []>} : vector<16x32xbf16>, vector<32x64xbf16>, vector<16x64xf32> -> vector<16x64xf32>
    %37 = arith.addf %31, %36 : vector<16x64xf32>
    %c0_43 = arith.constant 0 : index
    %c0_44 = arith.constant 0 : index
    %c4_45 = arith.constant 4 : index
    %c0_46 = arith.constant 0 : index
    %38 = vector.load %arg1[%c0_43, %c0_44, %c4_45, %c0_46] : memref<1x8x20x32xbf16, #tpu.memory_space<vmem>>, vector<1x1x16x32xbf16>
    %39 = vector.shape_cast %38 : vector<1x1x16x32xbf16> to vector<16x32xbf16>
    %c6_47 = arith.constant 6 : index
    %c0_48 = arith.constant 0 : index
    %c0_49 = arith.constant 0 : index
    %40 = vector.load %arg2[%c6_47, %c0_48, %c0_49] : memref<9x32x64xbf16, #tpu.memory_space<vmem>>, vector<1x32x64xbf16>
    %41 = vector.shape_cast %40 : vector<1x32x64xbf16> to vector<32x64xbf16>
    %cst_50 = arith.constant dense<0.000000e+00> : vector<16x64xf32>
    %42 = tpu.matmul %39, %41, %cst_50 {dimension_numbers = #tpu.dot_dimension_numbers<[1], [0], [0], [1], [0, 0, 1, 1], [], []>} : vector<16x32xbf16>, vector<32x64xbf16>, vector<16x64xf32> -> vector<16x64xf32>
    %43 = arith.addf %37, %42 : vector<16x64xf32>
    %c0_51 = arith.constant 0 : index
    %c2_52 = arith.constant 2 : index
    %c4_53 = arith.constant 4 : index
    %c0_54 = arith.constant 0 : index
    %44 = vector.load %arg1[%c0_51, %c2_52, %c4_53, %c0_54] : memref<1x8x20x32xbf16, #tpu.memory_space<vmem>>, vector<1x1x16x32xbf16>
    %45 = vector.shape_cast %44 : vector<1x1x16x32xbf16> to vector<16x32xbf16>
    %c7 = arith.constant 7 : index
    %c0_55 = arith.constant 0 : index
    %c0_56 = arith.constant 0 : index
    %46 = vector.load %arg2[%c7, %c0_55, %c0_56] : memref<9x32x64xbf16, #tpu.memory_space<vmem>>, vector<1x32x64xbf16>
    %47 = vector.shape_cast %46 : vector<1x32x64xbf16> to vector<32x64xbf16>
    %cst_57 = arith.constant dense<0.000000e+00> : vector<16x64xf32>
    %48 = tpu.matmul %45, %47, %cst_57 {dimension_numbers = #tpu.dot_dimension_numbers<[1], [0], [0], [1], [0, 0, 1, 1], [], []>} : vector<16x32xbf16>, vector<32x64xbf16>, vector<16x64xf32> -> vector<16x64xf32>
    %49 = arith.addf %43, %48 : vector<16x64xf32>
    %c0_58 = arith.constant 0 : index
    %c1_59 = arith.constant 1 : index
    %c4_60 = arith.constant 4 : index
    %c0_61 = arith.constant 0 : index
    %50 = vector.load %arg1[%c0_58, %c1_59, %c4_60, %c0_61] : memref<1x8x20x32xbf16, #tpu.memory_space<vmem>>, vector<1x1x16x32xbf16>
    %51 = vector.shape_cast %50 : vector<1x1x16x32xbf16> to vector<16x32xbf16>
    %c8 = arith.constant 8 : index
    %c0_62 = arith.constant 0 : index
    %c0_63 = arith.constant 0 : index
    %52 = vector.load %arg2[%c8, %c0_62, %c0_63] : memref<9x32x64xbf16, #tpu.memory_space<vmem>>, vector<1x32x64xbf16>
    %53 = vector.shape_cast %52 : vector<1x32x64xbf16> to vector<32x64xbf16>
    %cst_64 = arith.constant dense<0.000000e+00> : vector<16x64xf32>
    %54 = tpu.matmul %51, %53, %cst_64 {dimension_numbers = #tpu.dot_dimension_numbers<[1], [0], [0], [1], [0, 0, 1, 1], [], []>} : vector<16x32xbf16>, vector<32x64xbf16>, vector<16x64xf32> -> vector<16x64xf32>
    %55 = arith.addf %49, %54 : vector<16x64xf32>
    %cst_65 = arith.constant 0.000000e+00 : f32
    %56 = vector.broadcast %cst_65 : f32 to vector<16x64xf32>
    %c0_66 = arith.constant 0 : index
    %c2_67 = arith.constant 2 : index
    %c0_68 = arith.constant 0 : index
    %c0_69 = arith.constant 0 : index
    %57 = vector.load %arg1[%c0_66, %c2_67, %c0_68, %c0_69] : memref<1x8x20x32xbf16, #tpu.memory_space<vmem>>, vector<1x1x16x32xbf16>
    %58 = vector.shape_cast %57 : vector<1x1x16x32xbf16> to vector<16x32xbf16>
    %c0_70 = arith.constant 0 : index
    %c0_71 = arith.constant 0 : index
    %c0_72 = arith.constant 0 : index
    %59 = vector.load %arg2[%c0_70, %c0_71, %c0_72] : memref<9x32x64xbf16, #tpu.memory_space<vmem>>, vector<1x32x64xbf16>
    %60 = vector.shape_cast %59 : vector<1x32x64xbf16> to vector<32x64xbf16>
    %cst_73 = arith.constant dense<0.000000e+00> : vector<16x64xf32>
    %61 = tpu.matmul %58, %60, %cst_73 {dimension_numbers = #tpu.dot_dimension_numbers<[1], [0], [0], [1], [0, 0, 1, 1], [], []>} : vector<16x32xbf16>, vector<32x64xbf16>, vector<16x64xf32> -> vector<16x64xf32>
    %62 = arith.addf %56, %61 : vector<16x64xf32>
    %c0_74 = arith.constant 0 : index
    %c1_75 = arith.constant 1 : index
    %c0_76 = arith.constant 0 : index
    %c0_77 = arith.constant 0 : index
    %63 = vector.load %arg1[%c0_74, %c1_75, %c0_76, %c0_77] : memref<1x8x20x32xbf16, #tpu.memory_space<vmem>>, vector<1x1x16x32xbf16>
    %64 = vector.shape_cast %63 : vector<1x1x16x32xbf16> to vector<16x32xbf16>
    %c1_78 = arith.constant 1 : index
    %c0_79 = arith.constant 0 : index
    %c0_80 = arith.constant 0 : index
    %65 = vector.load %arg2[%c1_78, %c0_79, %c0_80] : memref<9x32x64xbf16, #tpu.memory_space<vmem>>, vector<1x32x64xbf16>
    %66 = vector.shape_cast %65 : vector<1x32x64xbf16> to vector<32x64xbf16>
    %cst_81 = arith.constant dense<0.000000e+00> : vector<16x64xf32>
    %67 = tpu.matmul %64, %66, %cst_81 {dimension_numbers = #tpu.dot_dimension_numbers<[1], [0], [0], [1], [0, 0, 1, 1], [], []>} : vector<16x32xbf16>, vector<32x64xbf16>, vector<16x64xf32> -> vector<16x64xf32>
    %68 = arith.addf %62, %67 : vector<16x64xf32>
    %c0_82 = arith.constant 0 : index
    %c3_83 = arith.constant 3 : index
    %c0_84 = arith.constant 0 : index
    %c0_85 = arith.constant 0 : index
    %69 = vector.load %arg1[%c0_82, %c3_83, %c0_84, %c0_85] : memref<1x8x20x32xbf16, #tpu.memory_space<vmem>>, vector<1x1x16x32xbf16>
    %70 = vector.shape_cast %69 : vector<1x1x16x32xbf16> to vector<16x32xbf16>
    %c2_86 = arith.constant 2 : index
    %c0_87 = arith.constant 0 : index
    %c0_88 = arith.constant 0 : index
    %71 = vector.load %arg2[%c2_86, %c0_87, %c0_88] : memref<9x32x64xbf16, #tpu.memory_space<vmem>>, vector<1x32x64xbf16>
    %72 = vector.shape_cast %71 : vector<1x32x64xbf16> to vector<32x64xbf16>
    %cst_89 = arith.constant dense<0.000000e+00> : vector<16x64xf32>
    %73 = tpu.matmul %70, %72, %cst_89 {dimension_numbers = #tpu.dot_dimension_numbers<[1], [0], [0], [1], [0, 0, 1, 1], [], []>} : vector<16x32xbf16>, vector<32x64xbf16>, vector<16x64xf32> -> vector<16x64xf32>
    %74 = arith.addf %68, %73 : vector<16x64xf32>
    %c0_90 = arith.constant 0 : index
    %c6_91 = arith.constant 6 : index
    %c0_92 = arith.constant 0 : index
    %c0_93 = arith.constant 0 : index
    %75 = vector.load %arg1[%c0_90, %c6_91, %c0_92, %c0_93] : memref<1x8x20x32xbf16, #tpu.memory_space<vmem>>, vector<1x1x16x32xbf16>
    %76 = vector.shape_cast %75 : vector<1x1x16x32xbf16> to vector<16x32xbf16>
    %c3_94 = arith.constant 3 : index
    %c0_95 = arith.constant 0 : index
    %c0_96 = arith.constant 0 : index
    %77 = vector.load %arg2[%c3_94, %c0_95, %c0_96] : memref<9x32x64xbf16, #tpu.memory_space<vmem>>, vector<1x32x64xbf16>
    %78 = vector.shape_cast %77 : vector<1x32x64xbf16> to vector<32x64xbf16>
    %cst_97 = arith.constant dense<0.000000e+00> : vector<16x64xf32>
    %79 = tpu.matmul %76, %78, %cst_97 {dimension_numbers = #tpu.dot_dimension_numbers<[1], [0], [0], [1], [0, 0, 1, 1], [], []>} : vector<16x32xbf16>, vector<32x64xbf16>, vector<16x64xf32> -> vector<16x64xf32>
    %80 = arith.addf %74, %79 : vector<16x64xf32>
    %c0_98 = arith.constant 0 : index
    %c5_99 = arith.constant 5 : index
    %c0_100 = arith.constant 0 : index
    %c0_101 = arith.constant 0 : index
    %81 = vector.load %arg1[%c0_98, %c5_99, %c0_100, %c0_101] : memref<1x8x20x32xbf16, #tpu.memory_space<vmem>>, vector<1x1x16x32xbf16>
    %82 = vector.shape_cast %81 : vector<1x1x16x32xbf16> to vector<16x32xbf16>
    %c4_102 = arith.constant 4 : index
    %c0_103 = arith.constant 0 : index
    %c0_104 = arith.constant 0 : index
    %83 = vector.load %arg2[%c4_102, %c0_103, %c0_104] : memref<9x32x64xbf16, #tpu.memory_space<vmem>>, vector<1x32x64xbf16>
    %84 = vector.shape_cast %83 : vector<1x32x64xbf16> to vector<32x64xbf16>
    %cst_105 = arith.constant dense<0.000000e+00> : vector<16x64xf32>
    %85 = tpu.matmul %82, %84, %cst_105 {dimension_numbers = #tpu.dot_dimension_numbers<[1], [0], [0], [1], [0, 0, 1, 1], [], []>} : vector<16x32xbf16>, vector<32x64xbf16>, vector<16x64xf32> -> vector<16x64xf32>
    %86 = arith.addf %80, %85 : vector<16x64xf32>
    %c0_106 = arith.constant 0 : index
    %c7_107 = arith.constant 7 : index
    %c0_108 = arith.constant 0 : index
    %c0_109 = arith.constant 0 : index
    %87 = vector.load %arg1[%c0_106, %c7_107, %c0_108, %c0_109] : memref<1x8x20x32xbf16, #tpu.memory_space<vmem>>, vector<1x1x16x32xbf16>
    %88 = vector.shape_cast %87 : vector<1x1x16x32xbf16> to vector<16x32xbf16>
    %c5_110 = arith.constant 5 : index
    %c0_111 = arith.constant 0 : index
    %c0_112 = arith.constant 0 : index
    %89 = vector.load %arg2[%c5_110, %c0_111, %c0_112] : memref<9x32x64xbf16, #tpu.memory_space<vmem>>, vector<1x32x64xbf16>
    %90 = vector.shape_cast %89 : vector<1x32x64xbf16> to vector<32x64xbf16>
    %cst_113 = arith.constant dense<0.000000e+00> : vector<16x64xf32>
    %91 = tpu.matmul %88, %90, %cst_113 {dimension_numbers = #tpu.dot_dimension_numbers<[1], [0], [0], [1], [0, 0, 1, 1], [], []>} : vector<16x32xbf16>, vector<32x64xbf16>, vector<16x64xf32> -> vector<16x64xf32>
    %92 = arith.addf %86, %91 : vector<16x64xf32>
    %c0_114 = arith.constant 0 : index
    %c2_115 = arith.constant 2 : index
    %c4_116 = arith.constant 4 : index
    %c0_117 = arith.constant 0 : index
    %93 = vector.load %arg1[%c0_114, %c2_115, %c4_116, %c0_117] : memref<1x8x20x32xbf16, #tpu.memory_space<vmem>>, vector<1x1x16x32xbf16>
    %94 = vector.shape_cast %93 : vector<1x1x16x32xbf16> to vector<16x32xbf16>
    %c6_118 = arith.constant 6 : index
    %c0_119 = arith.constant 0 : index
    %c0_120 = arith.constant 0 : index
    %95 = vector.load %arg2[%c6_118, %c0_119, %c0_120] : memref<9x32x64xbf16, #tpu.memory_space<vmem>>, vector<1x32x64xbf16>
    %96 = vector.shape_cast %95 : vector<1x32x64xbf16> to vector<32x64xbf16>
    %cst_121 = arith.constant dense<0.000000e+00> : vector<16x64xf32>
    %97 = tpu.matmul %94, %96, %cst_121 {dimension_numbers = #tpu.dot_dimension_numbers<[1], [0], [0], [1], [0, 0, 1, 1], [], []>} : vector<16x32xbf16>, vector<32x64xbf16>, vector<16x64xf32> -> vector<16x64xf32>
    %98 = arith.addf %92, %97 : vector<16x64xf32>
    %c0_122 = arith.constant 0 : index
    %c1_123 = arith.constant 1 : index
    %c4_124 = arith.constant 4 : index
    %c0_125 = arith.constant 0 : index
    %99 = vector.load %arg1[%c0_122, %c1_123, %c4_124, %c0_125] : memref<1x8x20x32xbf16, #tpu.memory_space<vmem>>, vector<1x1x16x32xbf16>
    %100 = vector.shape_cast %99 : vector<1x1x16x32xbf16> to vector<16x32xbf16>
    %c7_126 = arith.constant 7 : index
    %c0_127 = arith.constant 0 : index
    %c0_128 = arith.constant 0 : index
    %101 = vector.load %arg2[%c7_126, %c0_127, %c0_128] : memref<9x32x64xbf16, #tpu.memory_space<vmem>>, vector<1x32x64xbf16>
    %102 = vector.shape_cast %101 : vector<1x32x64xbf16> to vector<32x64xbf16>
    %cst_129 = arith.constant dense<0.000000e+00> : vector<16x64xf32>
    %103 = tpu.matmul %100, %102, %cst_129 {dimension_numbers = #tpu.dot_dimension_numbers<[1], [0], [0], [1], [0, 0, 1, 1], [], []>} : vector<16x32xbf16>, vector<32x64xbf16>, vector<16x64xf32> -> vector<16x64xf32>
    %104 = arith.addf %98, %103 : vector<16x64xf32>
    %c0_130 = arith.constant 0 : index
    %c3_131 = arith.constant 3 : index
    %c4_132 = arith.constant 4 : index
    %c0_133 = arith.constant 0 : index
    %105 = vector.load %arg1[%c0_130, %c3_131, %c4_132, %c0_133] : memref<1x8x20x32xbf16, #tpu.memory_space<vmem>>, vector<1x1x16x32xbf16>
    %106 = vector.shape_cast %105 : vector<1x1x16x32xbf16> to vector<16x32xbf16>
    %c8_134 = arith.constant 8 : index
    %c0_135 = arith.constant 0 : index
    %c0_136 = arith.constant 0 : index
    %107 = vector.load %arg2[%c8_134, %c0_135, %c0_136] : memref<9x32x64xbf16, #tpu.memory_space<vmem>>, vector<1x32x64xbf16>
    %108 = vector.shape_cast %107 : vector<1x32x64xbf16> to vector<32x64xbf16>
    %cst_137 = arith.constant dense<0.000000e+00> : vector<16x64xf32>
    %109 = tpu.matmul %106, %108, %cst_137 {dimension_numbers = #tpu.dot_dimension_numbers<[1], [0], [0], [1], [0, 0, 1, 1], [], []>} : vector<16x32xbf16>, vector<32x64xbf16>, vector<16x64xf32> -> vector<16x64xf32>
    %110 = arith.addf %104, %109 : vector<16x64xf32>
    %111 = arith.maximumf %55, %110 : vector<16x64xf32>
    %cst_138 = arith.constant 0.000000e+00 : f32
    %112 = vector.broadcast %cst_138 : f32 to vector<16x64xf32>
    %c0_139 = arith.constant 0 : index
    %c4_140 = arith.constant 4 : index
    %c0_141 = arith.constant 0 : index
    %c0_142 = arith.constant 0 : index
    %113 = vector.load %arg1[%c0_139, %c4_140, %c0_141, %c0_142] : memref<1x8x20x32xbf16, #tpu.memory_space<vmem>>, vector<1x1x16x32xbf16>
    %114 = vector.shape_cast %113 : vector<1x1x16x32xbf16> to vector<16x32xbf16>
    %c0_143 = arith.constant 0 : index
    %c0_144 = arith.constant 0 : index
    %c0_145 = arith.constant 0 : index
    %115 = vector.load %arg2[%c0_143, %c0_144, %c0_145] : memref<9x32x64xbf16, #tpu.memory_space<vmem>>, vector<1x32x64xbf16>
    %116 = vector.shape_cast %115 : vector<1x32x64xbf16> to vector<32x64xbf16>
    %cst_146 = arith.constant dense<0.000000e+00> : vector<16x64xf32>
    %117 = tpu.matmul %114, %116, %cst_146 {dimension_numbers = #tpu.dot_dimension_numbers<[1], [0], [0], [1], [0, 0, 1, 1], [], []>} : vector<16x32xbf16>, vector<32x64xbf16>, vector<16x64xf32> -> vector<16x64xf32>
    %118 = arith.addf %112, %117 : vector<16x64xf32>
    %c0_147 = arith.constant 0 : index
    %c6_148 = arith.constant 6 : index
    %c0_149 = arith.constant 0 : index
    %c0_150 = arith.constant 0 : index
    %119 = vector.load %arg1[%c0_147, %c6_148, %c0_149, %c0_150] : memref<1x8x20x32xbf16, #tpu.memory_space<vmem>>, vector<1x1x16x32xbf16>
    %120 = vector.shape_cast %119 : vector<1x1x16x32xbf16> to vector<16x32xbf16>
    %c1_151 = arith.constant 1 : index
    %c0_152 = arith.constant 0 : index
    %c0_153 = arith.constant 0 : index
    %121 = vector.load %arg2[%c1_151, %c0_152, %c0_153] : memref<9x32x64xbf16, #tpu.memory_space<vmem>>, vector<1x32x64xbf16>
    %122 = vector.shape_cast %121 : vector<1x32x64xbf16> to vector<32x64xbf16>
    %cst_154 = arith.constant dense<0.000000e+00> : vector<16x64xf32>
    %123 = tpu.matmul %120, %122, %cst_154 {dimension_numbers = #tpu.dot_dimension_numbers<[1], [0], [0], [1], [0, 0, 1, 1], [], []>} : vector<16x32xbf16>, vector<32x64xbf16>, vector<16x64xf32> -> vector<16x64xf32>
    %124 = arith.addf %118, %123 : vector<16x64xf32>
    %c0_155 = arith.constant 0 : index
    %c5_156 = arith.constant 5 : index
    %c0_157 = arith.constant 0 : index
    %c0_158 = arith.constant 0 : index
    %125 = vector.load %arg1[%c0_155, %c5_156, %c0_157, %c0_158] : memref<1x8x20x32xbf16, #tpu.memory_space<vmem>>, vector<1x1x16x32xbf16>
    %126 = vector.shape_cast %125 : vector<1x1x16x32xbf16> to vector<16x32xbf16>
    %c2_159 = arith.constant 2 : index
    %c0_160 = arith.constant 0 : index
    %c0_161 = arith.constant 0 : index
    %127 = vector.load %arg2[%c2_159, %c0_160, %c0_161] : memref<9x32x64xbf16, #tpu.memory_space<vmem>>, vector<1x32x64xbf16>
    %128 = vector.shape_cast %127 : vector<1x32x64xbf16> to vector<32x64xbf16>
    %cst_162 = arith.constant dense<0.000000e+00> : vector<16x64xf32>
    %129 = tpu.matmul %126, %128, %cst_162 {dimension_numbers = #tpu.dot_dimension_numbers<[1], [0], [0], [1], [0, 0, 1, 1], [], []>} : vector<16x32xbf16>, vector<32x64xbf16>, vector<16x64xf32> -> vector<16x64xf32>
    %130 = arith.addf %124, %129 : vector<16x64xf32>
    %c0_163 = arith.constant 0 : index
    %c0_164 = arith.constant 0 : index
    %c4_165 = arith.constant 4 : index
    %c0_166 = arith.constant 0 : index
    %131 = vector.load %arg1[%c0_163, %c0_164, %c4_165, %c0_166] : memref<1x8x20x32xbf16, #tpu.memory_space<vmem>>, vector<1x1x16x32xbf16>
    %132 = vector.shape_cast %131 : vector<1x1x16x32xbf16> to vector<16x32xbf16>
    %c3_167 = arith.constant 3 : index
    %c0_168 = arith.constant 0 : index
    %c0_169 = arith.constant 0 : index
    %133 = vector.load %arg2[%c3_167, %c0_168, %c0_169] : memref<9x32x64xbf16, #tpu.memory_space<vmem>>, vector<1x32x64xbf16>
    %134 = vector.shape_cast %133 : vector<1x32x64xbf16> to vector<32x64xbf16>
    %cst_170 = arith.constant dense<0.000000e+00> : vector<16x64xf32>
    %135 = tpu.matmul %132, %134, %cst_170 {dimension_numbers = #tpu.dot_dimension_numbers<[1], [0], [0], [1], [0, 0, 1, 1], [], []>} : vector<16x32xbf16>, vector<32x64xbf16>, vector<16x64xf32> -> vector<16x64xf32>
    %136 = arith.addf %130, %135 : vector<16x64xf32>
    %c0_171 = arith.constant 0 : index
    %c2_172 = arith.constant 2 : index
    %c4_173 = arith.constant 4 : index
    %c0_174 = arith.constant 0 : index
    %137 = vector.load %arg1[%c0_171, %c2_172, %c4_173, %c0_174] : memref<1x8x20x32xbf16, #tpu.memory_space<vmem>>, vector<1x1x16x32xbf16>
    %138 = vector.shape_cast %137 : vector<1x1x16x32xbf16> to vector<16x32xbf16>
    %c4_175 = arith.constant 4 : index
    %c0_176 = arith.constant 0 : index
    %c0_177 = arith.constant 0 : index
    %139 = vector.load %arg2[%c4_175, %c0_176, %c0_177] : memref<9x32x64xbf16, #tpu.memory_space<vmem>>, vector<1x32x64xbf16>
    %140 = vector.shape_cast %139 : vector<1x32x64xbf16> to vector<32x64xbf16>
    %cst_178 = arith.constant dense<0.000000e+00> : vector<16x64xf32>
    %141 = tpu.matmul %138, %140, %cst_178 {dimension_numbers = #tpu.dot_dimension_numbers<[1], [0], [0], [1], [0, 0, 1, 1], [], []>} : vector<16x32xbf16>, vector<32x64xbf16>, vector<16x64xf32> -> vector<16x64xf32>
    %142 = arith.addf %136, %141 : vector<16x64xf32>
    %c0_179 = arith.constant 0 : index
    %c1_180 = arith.constant 1 : index
    %c4_181 = arith.constant 4 : index
    %c0_182 = arith.constant 0 : index
    %143 = vector.load %arg1[%c0_179, %c1_180, %c4_181, %c0_182] : memref<1x8x20x32xbf16, #tpu.memory_space<vmem>>, vector<1x1x16x32xbf16>
    %144 = vector.shape_cast %143 : vector<1x1x16x32xbf16> to vector<16x32xbf16>
    %c5_183 = arith.constant 5 : index
    %c0_184 = arith.constant 0 : index
    %c0_185 = arith.constant 0 : index
    %145 = vector.load %arg2[%c5_183, %c0_184, %c0_185] : memref<9x32x64xbf16, #tpu.memory_space<vmem>>, vector<1x32x64xbf16>
    %146 = vector.shape_cast %145 : vector<1x32x64xbf16> to vector<32x64xbf16>
    %cst_186 = arith.constant dense<0.000000e+00> : vector<16x64xf32>
    %147 = tpu.matmul %144, %146, %cst_186 {dimension_numbers = #tpu.dot_dimension_numbers<[1], [0], [0], [1], [0, 0, 1, 1], [], []>} : vector<16x32xbf16>, vector<32x64xbf16>, vector<16x64xf32> -> vector<16x64xf32>
    %148 = arith.addf %142, %147 : vector<16x64xf32>
    %c0_187 = arith.constant 0 : index
    %c4_188 = arith.constant 4 : index
    %c4_189 = arith.constant 4 : index
    %c0_190 = arith.constant 0 : index
    %149 = vector.load %arg1[%c0_187, %c4_188, %c4_189, %c0_190] : memref<1x8x20x32xbf16, #tpu.memory_space<vmem>>, vector<1x1x16x32xbf16>
    %150 = vector.shape_cast %149 : vector<1x1x16x32xbf16> to vector<16x32xbf16>
    %c6_191 = arith.constant 6 : index
    %c0_192 = arith.constant 0 : index
    %c0_193 = arith.constant 0 : index
    %151 = vector.load %arg2[%c6_191, %c0_192, %c0_193] : memref<9x32x64xbf16, #tpu.memory_space<vmem>>, vector<1x32x64xbf16>
    %152 = vector.shape_cast %151 : vector<1x32x64xbf16> to vector<32x64xbf16>
    %cst_194 = arith.constant dense<0.000000e+00> : vector<16x64xf32>
    %153 = tpu.matmul %150, %152, %cst_194 {dimension_numbers = #tpu.dot_dimension_numbers<[1], [0], [0], [1], [0, 0, 1, 1], [], []>} : vector<16x32xbf16>, vector<32x64xbf16>, vector<16x64xf32> -> vector<16x64xf32>
    %154 = arith.addf %148, %153 : vector<16x64xf32>
    %c0_195 = arith.constant 0 : index
    %c6_196 = arith.constant 6 : index
    %c4_197 = arith.constant 4 : index
    %c0_198 = arith.constant 0 : index
    %155 = vector.load %arg1[%c0_195, %c6_196, %c4_197, %c0_198] : memref<1x8x20x32xbf16, #tpu.memory_space<vmem>>, vector<1x1x16x32xbf16>
    %156 = vector.shape_cast %155 : vector<1x1x16x32xbf16> to vector<16x32xbf16>
    %c7_199 = arith.constant 7 : index
    %c0_200 = arith.constant 0 : index
    %c0_201 = arith.constant 0 : index
    %157 = vector.load %arg2[%c7_199, %c0_200, %c0_201] : memref<9x32x64xbf16, #tpu.memory_space<vmem>>, vector<1x32x64xbf16>
    %158 = vector.shape_cast %157 : vector<1x32x64xbf16> to vector<32x64xbf16>
    %cst_202 = arith.constant dense<0.000000e+00> : vector<16x64xf32>
    %159 = tpu.matmul %156, %158, %cst_202 {dimension_numbers = #tpu.dot_dimension_numbers<[1], [0], [0], [1], [0, 0, 1, 1], [], []>} : vector<16x32xbf16>, vector<32x64xbf16>, vector<16x64xf32> -> vector<16x64xf32>
    %160 = arith.addf %154, %159 : vector<16x64xf32>
    %c0_203 = arith.constant 0 : index
    %c5_204 = arith.constant 5 : index
    %c4_205 = arith.constant 4 : index
    %c0_206 = arith.constant 0 : index
    %161 = vector.load %arg1[%c0_203, %c5_204, %c4_205, %c0_206] : memref<1x8x20x32xbf16, #tpu.memory_space<vmem>>, vector<1x1x16x32xbf16>
    %162 = vector.shape_cast %161 : vector<1x1x16x32xbf16> to vector<16x32xbf16>
    %c8_207 = arith.constant 8 : index
    %c0_208 = arith.constant 0 : index
    %c0_209 = arith.constant 0 : index
    %163 = vector.load %arg2[%c8_207, %c0_208, %c0_209] : memref<9x32x64xbf16, #tpu.memory_space<vmem>>, vector<1x32x64xbf16>
    %164 = vector.shape_cast %163 : vector<1x32x64xbf16> to vector<32x64xbf16>
    %cst_210 = arith.constant dense<0.000000e+00> : vector<16x64xf32>
    %165 = tpu.matmul %162, %164, %cst_210 {dimension_numbers = #tpu.dot_dimension_numbers<[1], [0], [0], [1], [0, 0, 1, 1], [], []>} : vector<16x32xbf16>, vector<32x64xbf16>, vector<16x64xf32> -> vector<16x64xf32>
    %166 = arith.addf %160, %165 : vector<16x64xf32>
    %167 = arith.maximumf %111, %166 : vector<16x64xf32>
    %cst_211 = arith.constant 0.000000e+00 : f32
    %168 = vector.broadcast %cst_211 : f32 to vector<16x64xf32>
    %c0_212 = arith.constant 0 : index
    %c6_213 = arith.constant 6 : index
    %c0_214 = arith.constant 0 : index
    %c0_215 = arith.constant 0 : index
    %169 = vector.load %arg1[%c0_212, %c6_213, %c0_214, %c0_215] : memref<1x8x20x32xbf16, #tpu.memory_space<vmem>>, vector<1x1x16x32xbf16>
    %170 = vector.shape_cast %169 : vector<1x1x16x32xbf16> to vector<16x32xbf16>
    %c0_216 = arith.constant 0 : index
    %c0_217 = arith.constant 0 : index
    %c0_218 = arith.constant 0 : index
    %171 = vector.load %arg2[%c0_216, %c0_217, %c0_218] : memref<9x32x64xbf16, #tpu.memory_space<vmem>>, vector<1x32x64xbf16>
    %172 = vector.shape_cast %171 : vector<1x32x64xbf16> to vector<32x64xbf16>
    %cst_219 = arith.constant dense<0.000000e+00> : vector<16x64xf32>
    %173 = tpu.matmul %170, %172, %cst_219 {dimension_numbers = #tpu.dot_dimension_numbers<[1], [0], [0], [1], [0, 0, 1, 1], [], []>} : vector<16x32xbf16>, vector<32x64xbf16>, vector<16x64xf32> -> vector<16x64xf32>
    %174 = arith.addf %168, %173 : vector<16x64xf32>
    %c0_220 = arith.constant 0 : index
    %c5_221 = arith.constant 5 : index
    %c0_222 = arith.constant 0 : index
    %c0_223 = arith.constant 0 : index
    %175 = vector.load %arg1[%c0_220, %c5_221, %c0_222, %c0_223] : memref<1x8x20x32xbf16, #tpu.memory_space<vmem>>, vector<1x1x16x32xbf16>
    %176 = vector.shape_cast %175 : vector<1x1x16x32xbf16> to vector<16x32xbf16>
    %c1_224 = arith.constant 1 : index
    %c0_225 = arith.constant 0 : index
    %c0_226 = arith.constant 0 : index
    %177 = vector.load %arg2[%c1_224, %c0_225, %c0_226] : memref<9x32x64xbf16, #tpu.memory_space<vmem>>, vector<1x32x64xbf16>
    %178 = vector.shape_cast %177 : vector<1x32x64xbf16> to vector<32x64xbf16>
    %cst_227 = arith.constant dense<0.000000e+00> : vector<16x64xf32>
    %179 = tpu.matmul %176, %178, %cst_227 {dimension_numbers = #tpu.dot_dimension_numbers<[1], [0], [0], [1], [0, 0, 1, 1], [], []>} : vector<16x32xbf16>, vector<32x64xbf16>, vector<16x64xf32> -> vector<16x64xf32>
    %180 = arith.addf %174, %179 : vector<16x64xf32>
    %c0_228 = arith.constant 0 : index
    %c7_229 = arith.constant 7 : index
    %c0_230 = arith.constant 0 : index
    %c0_231 = arith.constant 0 : index
    %181 = vector.load %arg1[%c0_228, %c7_229, %c0_230, %c0_231] : memref<1x8x20x32xbf16, #tpu.memory_space<vmem>>, vector<1x1x16x32xbf16>
    %182 = vector.shape_cast %181 : vector<1x1x16x32xbf16> to vector<16x32xbf16>
    %c2_232 = arith.constant 2 : index
    %c0_233 = arith.constant 0 : index
    %c0_234 = arith.constant 0 : index
    %183 = vector.load %arg2[%c2_232, %c0_233, %c0_234] : memref<9x32x64xbf16, #tpu.memory_space<vmem>>, vector<1x32x64xbf16>
    %184 = vector.shape_cast %183 : vector<1x32x64xbf16> to vector<32x64xbf16>
    %cst_235 = arith.constant dense<0.000000e+00> : vector<16x64xf32>
    %185 = tpu.matmul %182, %184, %cst_235 {dimension_numbers = #tpu.dot_dimension_numbers<[1], [0], [0], [1], [0, 0, 1, 1], [], []>} : vector<16x32xbf16>, vector<32x64xbf16>, vector<16x64xf32> -> vector<16x64xf32>
    %186 = arith.addf %180, %185 : vector<16x64xf32>
    %c0_236 = arith.constant 0 : index
    %c2_237 = arith.constant 2 : index
    %c4_238 = arith.constant 4 : index
    %c0_239 = arith.constant 0 : index
    %187 = vector.load %arg1[%c0_236, %c2_237, %c4_238, %c0_239] : memref<1x8x20x32xbf16, #tpu.memory_space<vmem>>, vector<1x1x16x32xbf16>
    %188 = vector.shape_cast %187 : vector<1x1x16x32xbf16> to vector<16x32xbf16>
    %c3_240 = arith.constant 3 : index
    %c0_241 = arith.constant 0 : index
    %c0_242 = arith.constant 0 : index
    %189 = vector.load %arg2[%c3_240, %c0_241, %c0_242] : memref<9x32x64xbf16, #tpu.memory_space<vmem>>, vector<1x32x64xbf16>
    %190 = vector.shape_cast %189 : vector<1x32x64xbf16> to vector<32x64xbf16>
    %cst_243 = arith.constant dense<0.000000e+00> : vector<16x64xf32>
    %191 = tpu.matmul %188, %190, %cst_243 {dimension_numbers = #tpu.dot_dimension_numbers<[1], [0], [0], [1], [0, 0, 1, 1], [], []>} : vector<16x32xbf16>, vector<32x64xbf16>, vector<16x64xf32> -> vector<16x64xf32>
    %192 = arith.addf %186, %191 : vector<16x64xf32>
    %c0_244 = arith.constant 0 : index
    %c1_245 = arith.constant 1 : index
    %c4_246 = arith.constant 4 : index
    %c0_247 = arith.constant 0 : index
    %193 = vector.load %arg1[%c0_244, %c1_245, %c4_246, %c0_247] : memref<1x8x20x32xbf16, #tpu.memory_space<vmem>>, vector<1x1x16x32xbf16>
    %194 = vector.shape_cast %193 : vector<1x1x16x32xbf16> to vector<16x32xbf16>
    %c4_248 = arith.constant 4 : index
    %c0_249 = arith.constant 0 : index
    %c0_250 = arith.constant 0 : index
    %195 = vector.load %arg2[%c4_248, %c0_249, %c0_250] : memref<9x32x64xbf16, #tpu.memory_space<vmem>>, vector<1x32x64xbf16>
    %196 = vector.shape_cast %195 : vector<1x32x64xbf16> to vector<32x64xbf16>
    %cst_251 = arith.constant dense<0.000000e+00> : vector<16x64xf32>
    %197 = tpu.matmul %194, %196, %cst_251 {dimension_numbers = #tpu.dot_dimension_numbers<[1], [0], [0], [1], [0, 0, 1, 1], [], []>} : vector<16x32xbf16>, vector<32x64xbf16>, vector<16x64xf32> -> vector<16x64xf32>
    %198 = arith.addf %192, %197 : vector<16x64xf32>
    %c0_252 = arith.constant 0 : index
    %c3_253 = arith.constant 3 : index
    %c4_254 = arith.constant 4 : index
    %c0_255 = arith.constant 0 : index
    %199 = vector.load %arg1[%c0_252, %c3_253, %c4_254, %c0_255] : memref<1x8x20x32xbf16, #tpu.memory_space<vmem>>, vector<1x1x16x32xbf16>
    %200 = vector.shape_cast %199 : vector<1x1x16x32xbf16> to vector<16x32xbf16>
    %c5_256 = arith.constant 5 : index
    %c0_257 = arith.constant 0 : index
    %c0_258 = arith.constant 0 : index
    %201 = vector.load %arg2[%c5_256, %c0_257, %c0_258] : memref<9x32x64xbf16, #tpu.memory_space<vmem>>, vector<1x32x64xbf16>
    %202 = vector.shape_cast %201 : vector<1x32x64xbf16> to vector<32x64xbf16>
    %cst_259 = arith.constant dense<0.000000e+00> : vector<16x64xf32>
    %203 = tpu.matmul %200, %202, %cst_259 {dimension_numbers = #tpu.dot_dimension_numbers<[1], [0], [0], [1], [0, 0, 1, 1], [], []>} : vector<16x32xbf16>, vector<32x64xbf16>, vector<16x64xf32> -> vector<16x64xf32>
    %204 = arith.addf %198, %203 : vector<16x64xf32>
    %c0_260 = arith.constant 0 : index
    %c6_261 = arith.constant 6 : index
    %c4_262 = arith.constant 4 : index
    %c0_263 = arith.constant 0 : index
    %205 = vector.load %arg1[%c0_260, %c6_261, %c4_262, %c0_263] : memref<1x8x20x32xbf16, #tpu.memory_space<vmem>>, vector<1x1x16x32xbf16>
    %206 = vector.shape_cast %205 : vector<1x1x16x32xbf16> to vector<16x32xbf16>
    %c6_264 = arith.constant 6 : index
    %c0_265 = arith.constant 0 : index
    %c0_266 = arith.constant 0 : index
    %207 = vector.load %arg2[%c6_264, %c0_265, %c0_266] : memref<9x32x64xbf16, #tpu.memory_space<vmem>>, vector<1x32x64xbf16>
    %208 = vector.shape_cast %207 : vector<1x32x64xbf16> to vector<32x64xbf16>
    %cst_267 = arith.constant dense<0.000000e+00> : vector<16x64xf32>
    %209 = tpu.matmul %206, %208, %cst_267 {dimension_numbers = #tpu.dot_dimension_numbers<[1], [0], [0], [1], [0, 0, 1, 1], [], []>} : vector<16x32xbf16>, vector<32x64xbf16>, vector<16x64xf32> -> vector<16x64xf32>
    %210 = arith.addf %204, %209 : vector<16x64xf32>
    %c0_268 = arith.constant 0 : index
    %c5_269 = arith.constant 5 : index
    %c4_270 = arith.constant 4 : index
    %c0_271 = arith.constant 0 : index
    %211 = vector.load %arg1[%c0_268, %c5_269, %c4_270, %c0_271] : memref<1x8x20x32xbf16, #tpu.memory_space<vmem>>, vector<1x1x16x32xbf16>
    %212 = vector.shape_cast %211 : vector<1x1x16x32xbf16> to vector<16x32xbf16>
    %c7_272 = arith.constant 7 : index
    %c0_273 = arith.constant 0 : index
    %c0_274 = arith.constant 0 : index
    %213 = vector.load %arg2[%c7_272, %c0_273, %c0_274] : memref<9x32x64xbf16, #tpu.memory_space<vmem>>, vector<1x32x64xbf16>
    %214 = vector.shape_cast %213 : vector<1x32x64xbf16> to vector<32x64xbf16>
    %cst_275 = arith.constant dense<0.000000e+00> : vector<16x64xf32>
    %215 = tpu.matmul %212, %214, %cst_275 {dimension_numbers = #tpu.dot_dimension_numbers<[1], [0], [0], [1], [0, 0, 1, 1], [], []>} : vector<16x32xbf16>, vector<32x64xbf16>, vector<16x64xf32> -> vector<16x64xf32>
    %216 = arith.addf %210, %215 : vector<16x64xf32>
    %c0_276 = arith.constant 0 : index
    %c7_277 = arith.constant 7 : index
    %c4_278 = arith.constant 4 : index
    %c0_279 = arith.constant 0 : index
    %217 = vector.load %arg1[%c0_276, %c7_277, %c4_278, %c0_279] : memref<1x8x20x32xbf16, #tpu.memory_space<vmem>>, vector<1x1x16x32xbf16>
    %218 = vector.shape_cast %217 : vector<1x1x16x32xbf16> to vector<16x32xbf16>
    %c8_280 = arith.constant 8 : index
    %c0_281 = arith.constant 0 : index
    %c0_282 = arith.constant 0 : index
    %219 = vector.load %arg2[%c8_280, %c0_281, %c0_282] : memref<9x32x64xbf16, #tpu.memory_space<vmem>>, vector<1x32x64xbf16>
    %220 = vector.shape_cast %219 : vector<1x32x64xbf16> to vector<32x64xbf16>
    %cst_283 = arith.constant dense<0.000000e+00> : vector<16x64xf32>
    %221 = tpu.matmul %218, %220, %cst_283 {dimension_numbers = #tpu.dot_dimension_numbers<[1], [0], [0], [1], [0, 0, 1, 1], [], []>} : vector<16x32xbf16>, vector<32x64xbf16>, vector<16x64xf32> -> vector<16x64xf32>
    %222 = arith.addf %216, %221 : vector<16x64xf32>
    %223 = arith.maximumf %167, %222 : vector<16x64xf32>
    %224 = vector.broadcast %0 : vector<1x64xf32> to vector<16x64xf32>
    %225 = arith.addf %223, %224 : vector<16x64xf32>
    %cst_284 = arith.constant 0.000000e+00 : f32
    %226 = vector.broadcast %cst_284 : f32 to vector<16x64xf32>
    %227 = arith.maximumf %225, %226 : vector<16x64xf32>
    %228 = arith.truncf %227 : vector<16x64xf32> to vector<16x64xbf16>
    %c0_285 = arith.constant 0 : index
    %c0_286 = arith.constant 0 : index
    %c0_287 = arith.constant 0 : index
    %229 = vector.load %arg4[%c0_285, %c0_286, %c0_287] : memref<1x16x64xbf16, #tpu.memory_space<vmem>>, vector<1x16x64xbf16>
    %230 = vector.shape_cast %229 : vector<1x16x64xbf16> to vector<16x64xbf16>
    %231 = vector.shape_cast %228 : vector<16x64xbf16> to vector<1x16x64xbf16>
    tpu.vector_store %arg4[%c0_285, %c0_286, %c0_287], %231 {strides = array<i32>} : memref<1x16x64xbf16, #tpu.memory_space<vmem>>, vector<1x16x64xbf16>,
    return
  }
  func.func @transform_0(%arg0: i32) -> (i32, i32, i32, i32) {
    %c0_i32 = arith.constant 0 : i32
    %c0_i32_0 = arith.constant 0 : i32
    %c0_i32_1 = arith.constant 0 : i32
    %c0_i32_2 = arith.constant 0 : i32
    return %arg0, %c0_i32, %c0_i32_0, %c0_i32_1 : i32, i32, i32, i32
  }
  func.func @transform_1(%arg0: i32) -> (i32, i32, i32) {
    %c0_i32 = arith.constant 0 : i32
    %c0_i32_0 = arith.constant 0 : i32
    %c0_i32_1 = arith.constant 0 : i32
    %c0_i32_2 = arith.constant 0 : i32
    return %c0_i32, %c0_i32_0, %c0_i32_1 : i32, i32, i32
  }
  func.func @transform_2(%arg0: i32) -> (i32, i32) {
    %c0_i32 = arith.constant 0 : i32
    %c0_i32_0 = arith.constant 0 : i32
    %c0_i32_1 = arith.constant 0 : i32
    return %c0_i32, %c0_i32_0 : i32, i32
  }
  func.func @transform_3(%arg0: i32) -> (i32, i32, i32) {
    %c0_i32 = arith.constant 0 : i32
    %c0_i32_0 = arith.constant 0 : i32
    %c0_i32_1 = arith.constant 0 : i32
    return %arg0, %c0_i32, %c0_i32_0 : i32, i32, i32
  }
}

module attributes {stable_mosaic.version = 11 : i64} {
  func.func @_conv_gap_head_kernel(%arg0: i32, %arg1: memref<1x3x24x64xbf16, #tpu.memory_space<vmem>>, %arg2: memref<9x64x128xbf16, #tpu.memory_space<vmem>>, %arg3: memref<1x128xf32, #tpu.memory_space<vmem>>, %arg4: memref<128x64xf32, #tpu.memory_space<vmem>>, %arg5: memref<1x64xf32, #tpu.memory_space<vmem>>, %arg6: memref<1x1x64xf32, #tpu.memory_space<vmem>>) attributes {dimension_semantics = [#tpu.dimension_semantics<parallel>], iteration_bounds = array<i64: 2>, scalar_prefetch = 0 : i64, scratch_operands = 0 : i64, tpu.core_type = #tpu.core_type<tc>, window_params = [{transform_indices = @transform_0, window_bounds = array<i64: 1, 3, 24, 64>}, {pipeline_mode = #tpu.pipeline_mode<synchronous>, transform_indices = @transform_1, window_bounds = array<i64: 9, 64, 128>}, {pipeline_mode = #tpu.pipeline_mode<synchronous>, transform_indices = @transform_2, window_bounds = array<i64: 1, 128>}, {pipeline_mode = #tpu.pipeline_mode<synchronous>, transform_indices = @transform_3, window_bounds = array<i64: 128, 64>}, {pipeline_mode = #tpu.pipeline_mode<synchronous>, transform_indices = @transform_4, window_bounds = array<i64: 1, 64>}, {transform_indices = @transform_5, window_bounds = array<i64: 1, 1, 64>}]} {
    %cst = arith.constant 0.000000e+00 : f32
    %0 = vector.broadcast %cst : f32 to vector<16x128xf32>
    %c0 = arith.constant 0 : index
    %c0_0 = arith.constant 0 : index
    %c0_1 = arith.constant 0 : index
    %c0_2 = arith.constant 0 : index
    %1 = vector.load %arg1[%c0, %c0_0, %c0_1, %c0_2] : memref<1x3x24x64xbf16, #tpu.memory_space<vmem>>, vector<1x1x16x64xbf16>
    %2 = vector.shape_cast %1 : vector<1x1x16x64xbf16> to vector<16x64xbf16>
    %c0_3 = arith.constant 0 : index
    %c0_4 = arith.constant 0 : index
    %c0_5 = arith.constant 0 : index
    %3 = vector.load %arg2[%c0_3, %c0_4, %c0_5] : memref<9x64x128xbf16, #tpu.memory_space<vmem>>, vector<1x64x128xbf16>
    %4 = vector.shape_cast %3 : vector<1x64x128xbf16> to vector<64x128xbf16>
    %cst_6 = arith.constant dense<0.000000e+00> : vector<16x128xf32>
    %5 = tpu.matmul %2, %4, %cst_6 {dimension_numbers = #tpu.dot_dimension_numbers<[1], [0], [0], [1], [0, 0, 1, 1], [], []>} : vector<16x64xbf16>, vector<64x128xbf16>, vector<16x128xf32> -> vector<16x128xf32>
    %6 = arith.addf %0, %5 : vector<16x128xf32>
    %c0_7 = arith.constant 0 : index
    %c1 = arith.constant 1 : index
    %c0_8 = arith.constant 0 : index
    %c0_9 = arith.constant 0 : index
    %7 = vector.load %arg1[%c0_7, %c1, %c0_8, %c0_9] : memref<1x3x24x64xbf16, #tpu.memory_space<vmem>>, vector<1x1x16x64xbf16>
    %8 = vector.shape_cast %7 : vector<1x1x16x64xbf16> to vector<16x64xbf16>
    %c1_10 = arith.constant 1 : index
    %c0_11 = arith.constant 0 : index
    %c0_12 = arith.constant 0 : index
    %9 = vector.load %arg2[%c1_10, %c0_11, %c0_12] : memref<9x64x128xbf16, #tpu.memory_space<vmem>>, vector<1x64x128xbf16>
    %10 = vector.shape_cast %9 : vector<1x64x128xbf16> to vector<64x128xbf16>
    %cst_13 = arith.constant dense<0.000000e+00> : vector<16x128xf32>
    %11 = tpu.matmul %8, %10, %cst_13 {dimension_numbers = #tpu.dot_dimension_numbers<[1], [0], [0], [1], [0, 0, 1, 1], [], []>} : vector<16x64xbf16>, vector<64x128xbf16>, vector<16x128xf32> -> vector<16x128xf32>
    %12 = arith.addf %6, %11 : vector<16x128xf32>
    %c0_14 = arith.constant 0 : index
    %c2 = arith.constant 2 : index
    %c0_15 = arith.constant 0 : index
    %c0_16 = arith.constant 0 : index
    %13 = vector.load %arg1[%c0_14, %c2, %c0_15, %c0_16] : memref<1x3x24x64xbf16, #tpu.memory_space<vmem>>, vector<1x1x16x64xbf16>
    %14 = vector.shape_cast %13 : vector<1x1x16x64xbf16> to vector<16x64xbf16>
    %c2_17 = arith.constant 2 : index
    %c0_18 = arith.constant 0 : index
    %c0_19 = arith.constant 0 : index
    %15 = vector.load %arg2[%c2_17, %c0_18, %c0_19] : memref<9x64x128xbf16, #tpu.memory_space<vmem>>, vector<1x64x128xbf16>
    %16 = vector.shape_cast %15 : vector<1x64x128xbf16> to vector<64x128xbf16>
    %cst_20 = arith.constant dense<0.000000e+00> : vector<16x128xf32>
    %17 = tpu.matmul %14, %16, %cst_20 {dimension_numbers = #tpu.dot_dimension_numbers<[1], [0], [0], [1], [0, 0, 1, 1], [], []>} : vector<16x64xbf16>, vector<64x128xbf16>, vector<16x128xf32> -> vector<16x128xf32>
    %18 = arith.addf %12, %17 : vector<16x128xf32>
    %c0_21 = arith.constant 0 : index
    %c0_22 = arith.constant 0 : index
    %c4 = arith.constant 4 : index
    %c0_23 = arith.constant 0 : index
    %19 = vector.load %arg1[%c0_21, %c0_22, %c4, %c0_23] : memref<1x3x24x64xbf16, #tpu.memory_space<vmem>>, vector<1x1x16x64xbf16>
    %20 = vector.shape_cast %19 : vector<1x1x16x64xbf16> to vector<16x64xbf16>
    %c3 = arith.constant 3 : index
    %c0_24 = arith.constant 0 : index
    %c0_25 = arith.constant 0 : index
    %21 = vector.load %arg2[%c3, %c0_24, %c0_25] : memref<9x64x128xbf16, #tpu.memory_space<vmem>>, vector<1x64x128xbf16>
    %22 = vector.shape_cast %21 : vector<1x64x128xbf16> to vector<64x128xbf16>
    %cst_26 = arith.constant dense<0.000000e+00> : vector<16x128xf32>
    %23 = tpu.matmul %20, %22, %cst_26 {dimension_numbers = #tpu.dot_dimension_numbers<[1], [0], [0], [1], [0, 0, 1, 1], [], []>} : vector<16x64xbf16>, vector<64x128xbf16>, vector<16x128xf32> -> vector<16x128xf32>
    %24 = arith.addf %18, %23 : vector<16x128xf32>
    %c0_27 = arith.constant 0 : index
    %c1_28 = arith.constant 1 : index
    %c4_29 = arith.constant 4 : index
    %c0_30 = arith.constant 0 : index
    %25 = vector.load %arg1[%c0_27, %c1_28, %c4_29, %c0_30] : memref<1x3x24x64xbf16, #tpu.memory_space<vmem>>, vector<1x1x16x64xbf16>
    %26 = vector.shape_cast %25 : vector<1x1x16x64xbf16> to vector<16x64xbf16>
    %c4_31 = arith.constant 4 : index
    %c0_32 = arith.constant 0 : index
    %c0_33 = arith.constant 0 : index
    %27 = vector.load %arg2[%c4_31, %c0_32, %c0_33] : memref<9x64x128xbf16, #tpu.memory_space<vmem>>, vector<1x64x128xbf16>
    %28 = vector.shape_cast %27 : vector<1x64x128xbf16> to vector<64x128xbf16>
    %cst_34 = arith.constant dense<0.000000e+00> : vector<16x128xf32>
    %29 = tpu.matmul %26, %28, %cst_34 {dimension_numbers = #tpu.dot_dimension_numbers<[1], [0], [0], [1], [0, 0, 1, 1], [], []>} : vector<16x64xbf16>, vector<64x128xbf16>, vector<16x128xf32> -> vector<16x128xf32>
    %30 = arith.addf %24, %29 : vector<16x128xf32>
    %c0_35 = arith.constant 0 : index
    %c2_36 = arith.constant 2 : index
    %c4_37 = arith.constant 4 : index
    %c0_38 = arith.constant 0 : index
    %31 = vector.load %arg1[%c0_35, %c2_36, %c4_37, %c0_38] : memref<1x3x24x64xbf16, #tpu.memory_space<vmem>>, vector<1x1x16x64xbf16>
    %32 = vector.shape_cast %31 : vector<1x1x16x64xbf16> to vector<16x64xbf16>
    %c5 = arith.constant 5 : index
    %c0_39 = arith.constant 0 : index
    %c0_40 = arith.constant 0 : index
    %33 = vector.load %arg2[%c5, %c0_39, %c0_40] : memref<9x64x128xbf16, #tpu.memory_space<vmem>>, vector<1x64x128xbf16>
    %34 = vector.shape_cast %33 : vector<1x64x128xbf16> to vector<64x128xbf16>
    %cst_41 = arith.constant dense<0.000000e+00> : vector<16x128xf32>
    %35 = tpu.matmul %32, %34, %cst_41 {dimension_numbers = #tpu.dot_dimension_numbers<[1], [0], [0], [1], [0, 0, 1, 1], [], []>} : vector<16x64xbf16>, vector<64x128xbf16>, vector<16x128xf32> -> vector<16x128xf32>
    %36 = arith.addf %30, %35 : vector<16x128xf32>
    %c0_42 = arith.constant 0 : index
    %c0_43 = arith.constant 0 : index
    %c8 = arith.constant 8 : index
    %c0_44 = arith.constant 0 : index
    %37 = vector.load %arg1[%c0_42, %c0_43, %c8, %c0_44] : memref<1x3x24x64xbf16, #tpu.memory_space<vmem>>, vector<1x1x16x64xbf16>
    %38 = vector.shape_cast %37 : vector<1x1x16x64xbf16> to vector<16x64xbf16>
    %c6 = arith.constant 6 : index
    %c0_45 = arith.constant 0 : index
    %c0_46 = arith.constant 0 : index
    %39 = vector.load %arg2[%c6, %c0_45, %c0_46] : memref<9x64x128xbf16, #tpu.memory_space<vmem>>, vector<1x64x128xbf16>
    %40 = vector.shape_cast %39 : vector<1x64x128xbf16> to vector<64x128xbf16>
    %cst_47 = arith.constant dense<0.000000e+00> : vector<16x128xf32>
    %41 = tpu.matmul %38, %40, %cst_47 {dimension_numbers = #tpu.dot_dimension_numbers<[1], [0], [0], [1], [0, 0, 1, 1], [], []>} : vector<16x64xbf16>, vector<64x128xbf16>, vector<16x128xf32> -> vector<16x128xf32>
    %42 = arith.addf %36, %41 : vector<16x128xf32>
    %c0_48 = arith.constant 0 : index
    %c1_49 = arith.constant 1 : index
    %c8_50 = arith.constant 8 : index
    %c0_51 = arith.constant 0 : index
    %43 = vector.load %arg1[%c0_48, %c1_49, %c8_50, %c0_51] : memref<1x3x24x64xbf16, #tpu.memory_space<vmem>>, vector<1x1x16x64xbf16>
    %44 = vector.shape_cast %43 : vector<1x1x16x64xbf16> to vector<16x64xbf16>
    %c7 = arith.constant 7 : index
    %c0_52 = arith.constant 0 : index
    %c0_53 = arith.constant 0 : index
    %45 = vector.load %arg2[%c7, %c0_52, %c0_53] : memref<9x64x128xbf16, #tpu.memory_space<vmem>>, vector<1x64x128xbf16>
    %46 = vector.shape_cast %45 : vector<1x64x128xbf16> to vector<64x128xbf16>
    %cst_54 = arith.constant dense<0.000000e+00> : vector<16x128xf32>
    %47 = tpu.matmul %44, %46, %cst_54 {dimension_numbers = #tpu.dot_dimension_numbers<[1], [0], [0], [1], [0, 0, 1, 1], [], []>} : vector<16x64xbf16>, vector<64x128xbf16>, vector<16x128xf32> -> vector<16x128xf32>
    %48 = arith.addf %42, %47 : vector<16x128xf32>
    %c0_55 = arith.constant 0 : index
    %c2_56 = arith.constant 2 : index
    %c8_57 = arith.constant 8 : index
    %c0_58 = arith.constant 0 : index
    %49 = vector.load %arg1[%c0_55, %c2_56, %c8_57, %c0_58] : memref<1x3x24x64xbf16, #tpu.memory_space<vmem>>, vector<1x1x16x64xbf16>
    %50 = vector.shape_cast %49 : vector<1x1x16x64xbf16> to vector<16x64xbf16>
    %c8_59 = arith.constant 8 : index
    %c0_60 = arith.constant 0 : index
    %c0_61 = arith.constant 0 : index
    %51 = vector.load %arg2[%c8_59, %c0_60, %c0_61] : memref<9x64x128xbf16, #tpu.memory_space<vmem>>, vector<1x64x128xbf16>
    %52 = vector.shape_cast %51 : vector<1x64x128xbf16> to vector<64x128xbf16>
    %cst_62 = arith.constant dense<0.000000e+00> : vector<16x128xf32>
    %53 = tpu.matmul %50, %52, %cst_62 {dimension_numbers = #tpu.dot_dimension_numbers<[1], [0], [0], [1], [0, 0, 1, 1], [], []>} : vector<16x64xbf16>, vector<64x128xbf16>, vector<16x128xf32> -> vector<16x128xf32>
    %54 = arith.addf %48, %53 : vector<16x128xf32>
    %c0_63 = arith.constant 0 : index
    %c0_64 = arith.constant 0 : index
    %55 = vector.load %arg3[%c0_63, %c0_64] : memref<1x128xf32, #tpu.memory_space<vmem>>, vector<1x128xf32>
    %56 = vector.broadcast %55 : vector<1x128xf32> to vector<16x128xf32>
    %57 = arith.addf %54, %56 : vector<16x128xf32>
    %cst_65 = arith.constant 0.000000e+00 : f32
    %58 = vector.broadcast %cst_65 : f32 to vector<16x128xf32>
    %59 = arith.maximumf %57, %58 : vector<16x128xf32>
    %cst_66 = arith.constant dense<0.000000e+00> : vector<128xf32>
    %60 = vector.multi_reduction <add>, %59, %cst_66 [0] : vector<16x128xf32> to vector<128xf32>
    %61 = vector.shape_cast %60 : vector<128xf32> to vector<1x128xf32>
    %cst_67 = arith.constant 1.600000e+01 : f32
    %62 = vector.broadcast %cst_67 : f32 to vector<1x128xf32>
    %63 = arith.divf %61, %62 : vector<1x128xf32>
    %c0_68 = arith.constant 0 : index
    %c0_69 = arith.constant 0 : index
    %64 = vector.load %arg4[%c0_68, %c0_69] : memref<128x64xf32, #tpu.memory_space<vmem>>, vector<128x64xf32>
    %cst_70 = arith.constant dense<0.000000e+00> : vector<1x64xf32>
    %65 = tpu.matmul %63, %64, %cst_70 {dimension_numbers = #tpu.dot_dimension_numbers<[1], [0], [0], [1], [0, 0, 1, 1], [], []>} : vector<1x128xf32>, vector<128x64xf32>, vector<1x64xf32> -> vector<1x64xf32>
    %c0_71 = arith.constant 0 : index
    %c0_72 = arith.constant 0 : index
    %66 = vector.load %arg5[%c0_71, %c0_72] : memref<1x64xf32, #tpu.memory_space<vmem>>, vector<1x64xf32>
    %67 = arith.addf %65, %66 : vector<1x64xf32>
    %68 = arith.mulf %67, %67 : vector<1x64xf32>
    %cst_73 = arith.constant dense<0.000000e+00> : vector<1xf32>
    %69 = vector.multi_reduction <add>, %68, %cst_73 [1] : vector<1x64xf32> to vector<1xf32>
    %70 = vector.shape_cast %69 : vector<1xf32> to vector<1x1xf32>
    %cst_74 = arith.constant 1.000000e-24 : f32
    %71 = vector.broadcast %cst_74 : f32 to vector<1x1xf32>
    %72 = arith.maximumf %70, %71 : vector<1x1xf32>
    %73 = math.rsqrt %72 : vector<1x1xf32>
    %74 = vector.broadcast %73 : vector<1x1xf32> to vector<1x64xf32>
    %75 = arith.mulf %67, %74 : vector<1x64xf32>
    %c0_75 = arith.constant 0 : index
    %c0_76 = arith.constant 0 : index
    %c0_77 = arith.constant 0 : index
    %76 = vector.load %arg6[%c0_75, %c0_76, %c0_77] : memref<1x1x64xf32, #tpu.memory_space<vmem>>, vector<1x1x64xf32>
    %77 = vector.shape_cast %76 : vector<1x1x64xf32> to vector<1x64xf32>
    %78 = vector.shape_cast %75 : vector<1x64xf32> to vector<1x1x64xf32>
    tpu.vector_store %arg6[%c0_75, %c0_76, %c0_77], %78 {strides = array<i32>} : memref<1x1x64xf32, #tpu.memory_space<vmem>>, vector<1x1x64xf32>,
    return
  }
  func.func @transform_0(%arg0: i32) -> (i32, i32, i32, i32) {
    %c0_i32 = arith.constant 0 : i32
    %c0_i32_0 = arith.constant 0 : i32
    %c0_i32_1 = arith.constant 0 : i32
    %c0_i32_2 = arith.constant 0 : i32
    return %arg0, %c0_i32, %c0_i32_0, %c0_i32_1 : i32, i32, i32, i32
  }
  func.func @transform_1(%arg0: i32) -> (i32, i32, i32) {
    %c0_i32 = arith.constant 0 : i32
    %c0_i32_0 = arith.constant 0 : i32
    %c0_i32_1 = arith.constant 0 : i32
    %c0_i32_2 = arith.constant 0 : i32
    return %c0_i32, %c0_i32_0, %c0_i32_1 : i32, i32, i32
  }
  func.func @transform_2(%arg0: i32) -> (i32, i32) {
    %c0_i32 = arith.constant 0 : i32
    %c0_i32_0 = arith.constant 0 : i32
    %c0_i32_1 = arith.constant 0 : i32
    return %c0_i32, %c0_i32_0 : i32, i32
  }
  func.func @transform_3(%arg0: i32) -> (i32, i32) {
    %c0_i32 = arith.constant 0 : i32
    %c0_i32_0 = arith.constant 0 : i32
    %c0_i32_1 = arith.constant 0 : i32
    return %c0_i32, %c0_i32_0 : i32, i32
  }
  func.func @transform_4(%arg0: i32) -> (i32, i32) {
    %c0_i32 = arith.constant 0 : i32
    %c0_i32_0 = arith.constant 0 : i32
    %c0_i32_1 = arith.constant 0 : i32
    return %c0_i32, %c0_i32_0 : i32, i32
  }
  func.func @transform_5(%arg0: i32) -> (i32, i32, i32) {
    %c0_i32 = arith.constant 0 : i32
    %c0_i32_0 = arith.constant 0 : i32
    %c0_i32_1 = arith.constant 0 : i32
    return %arg0, %c0_i32, %c0_i32_0 : i32, i32, i32
  }
}

</mosaic_0001>

<bundles_post_ra>
// kernel: embedding_net_forward.3
= control target key start
LH: loop header
LB: loop body
LE: loop exit
PB: predicated region body
PF: predicated region fallthrough
CT: control target
= control target key end

     0   :  { %s2887_s12 = smov 0   ;;  %s3766_s0 = inlined_call_operand.vmem [shape: bf16[2,8,72,3], index: 0, kind: input, shape index: {}]   ;;  %s3767_s1 = inlined_call_operand.vmem [shape: bf16[9,3,32], index: 1, kind: input, shape index: {}]   ;;  %s3768_s2 = inlined_call_operand.vmem [shape: f32[1,32], index: 2, kind: input, shape index: {}]   ;;  %s3769_s3 = inlined_call_operand.vmem [shape: bf16[2,64,32], index: 3, kind: output, shape index: {}]  }
   0x1 LB: > { %s2252_s13 = sadd.s32 4294967295, %s2864_s12   ;;  %p2256_p0 = scmp.ge.s32.totalorder %s2864_s12, 1  ;;  %s2864_s12 = sphi %s2887_s12, %s13_s12  }
   0x2   : > { %p137_p1 = scmp.lt.s32.totalorder %s2864_s12, 3 }
   0x4   : > { %p138_p2 = pnand %p2256_p0, %p137_p1 }
   0x6   : > { %141 = sbr.rel (%p138_p2) target bundleno = 735 (0x2df), region = 32 }
   0xb   : > { %v2268_v0 = vld [vmem:[%s3767_s1 + $0x2] sm:$0x3]  ;;  %vm226_vm0 = vcmask 1040384   ;;  %vm227_vm1 = vcmask 1041408   ;;  %p161_p3 = scmp.lt.s32.totalorder %s2252_s13, 1  ;;  %v2866_v1 = vmov 65535  }
   0xc   : > { %v228_v2 = vsel %vm226_vm0, 4294967295, %v2866_v1  ;;  %v181_v3 = vld [vmem:[%s3767_s1] sm:$0x3]  ;;  %v2317_v4 = vld [vmem:[%s3767_s1 + $0x4] sm:$0x3]  ;;  %vm213_vm2 = vcmask 23552  }
   0xd   : > { %v229_v5 = vsel %vm227_vm1, %v228_v2, 0  ;;  %v2346_v6 = vld [vmem:[%s3767_s1 + $0x6] sm:$0x3]  ;;  %s3783_s13 = smov (!%p161_p3, %s2252_s13), 1  ;;  %v2425_v7 = vld [vmem:[%s3767_s1 + $0xc] sm:$0x3] }
   0xe   : > { %v2912_v8 = vand.u32 %v2268_v0, %v229_v5  ;;  %v2914_v9 = vand.u32 %v229_v5, %v181_v3  ;;  %v2916_v10 = vand.u32 %v2317_v4, %v229_v5  ;;  %v2918_v11 = vand.u32 %v2346_v6, %v229_v5  ;;  %v2375_v12 = vld [vmem:[%s3767_s1 + $0x8] sm:$0x3]  ;;  %v2454_v13 = vld [vmem:[%s3767_s1 + $0xe] sm:$0x3]  ;;  %v2404_v14 = vld [vmem:[%s3767_s1 + $0xa] sm:$0x3] }
   0xf   : > { %s2847_s30 = smul.u32 288, %s3783_s13  ;;  %v2930_v15 = vand.u32 %v2425_v7, %v229_v5  ;;  %v2932_v16 = vand.u32 %v2375_v12, %v229_v5  ;;  %v2934_v17 = vand.u32 %v2454_v13, %v229_v5  ;;  %v2936_v18 = vand.u32 %v2404_v14, %v229_v5  ;;  %v2483_v31 = vld [vmem:[%s3767_s1 + $0x10] sm:$0x3]  ;;  %s2782_s11 = sshll.u32 %s3783_s13, 5 }
  0x10   : > { %240 = vmatpush.bf16.msra.mxu0 %v2912_v8  ;;  %304 = vmatpush.bf16.msra.mxu1 %v2914_v9  ;;  %v3008_v32 = vand.u32 %v2483_v31, %v229_v5  ;;  %s3711_s16 = scalar_lea.vmem %s3769_s3, %s2782_s11  ;;  %vm2188_vm3 = vcmask 257024  }
  0x11   : > { %379 = vmatpush.bf16.msra.mxu2 %v2916_v10  ;;  %462 = vmatpush.bf16.msra.mxu3 %v2918_v11  ;;  %s2945_s6 = scalar_lea.vmem %s3766_s0, %s2847_s30 }
  0x12   : > { %v2948_v19 = vld [vmem:[%s2945_s6 + $0x48] sm:$0xff]  ;;  %v2783_v20 = vld [vmem:[%s2945_s6] sm:$0xff]  ;;  %v2957_v22 = vld [vmem:[%s2945_s6 + $0x90] sm:$0xff] }
  0x13   : > { %v2952_v21 = vld [vmem:[%s2945_s6 + $0x24] sm:$0xff]  ;;  %2285 = vmatmul.msk.bf16.vlgmr.msra.gmra.mxu0 %vm213_vm2, %v2948_v19  ;;  %2305 = vmatmul.msk.bf16.vlgmr.msra.gmra.mxu1 %vm213_vm2, %v2783_v20  ;;  %v2972_v23 = vld [vmem:[%s2945_s6 + $0x50] sm:$0xff]  ;;  %v2979_v26 = vld [vmem:[%s2945_s6 + $0x98] sm:$0xff] }
  0x14   : > { %545 = vmatpush.bf16.msrb.mxu0 %v2932_v16  ;;  %628 = vmatpush.bf16.msrb.mxu1 %v2936_v18  ;;  %v2784_v24 = vld [vmem:[%s2945_s6 + $0x8] sm:$0xff]  ;;  %v2989_v27 = vld [vmem:[%s2945_s6 + $0x58] sm:$0xff]  ;;  %v2785_v28 = vld [vmem:[%s2945_s6 + $0x10] sm:$0xff] }
  0x15   : > { %710 = vmatpush.bf16.msrb.mxu2 %v2930_v15  ;;  %792 = vmatpush.bf16.msrb.mxu3 %v2934_v17  ;;  %v2976_v25 = vld [vmem:[%s2945_s6 + $0x2c] sm:$0xff]  ;;  %v2993_v29 = vld [vmem:[%s2945_s6 + $0x34] sm:$0xff]  ;;  %v2996_v30 = vld [vmem:[%s2945_s6 + $0xa0] sm:$0xff] }
  0x16   : > { %2334 = vmatmul.msk.bf16.vlgmr.msra.gmra.mxu2 %vm213_vm2, %v2952_v21  ;;  %2363 = vmatmul.msk.bf16.vlgmr.msra.gmra.mxu3 %vm213_vm2, %v2957_v22  ;;  %v3012_v33 = vld [vmem:[%s2945_s6 + $0x60] sm:$0xff]  ;;  %v2786_v34 = vld [vmem:[%s2945_s6 + $0x18] sm:$0xff]  ;;  %v3019_v36 = vld [vmem:[%s2945_s6 + $0xa8] sm:$0xff] }
  0x17   : > { %v3016_v35 = vld [vmem:[%s2945_s6 + $0x3c] sm:$0xff]  ;;  %v3032_v38 = vld [vmem:[%s2945_s6 + $0xb4] sm:$0xff]  ;;  %v3035_v39 = vld [vmem:[%s2945_s6 + $0x4] sm:$0xff] }
  0x18   : > { %911 = vmatpush.bf16.msra.mxu1 %v2912_v8  ;;  %874 = vmatpush.bf16.msra.mxu0 %v3008_v32  ;;  %v3029_v37 = vld [vmem:[%s2945_s6 + $0xd8] sm:$0xff]  ;;  %v3038_v40 = vld [vmem:[%s2945_s6 + $0x4c] sm:$0xff]  ;;  %v3053_v41 = vld [vmem:[%s2945_s6 + $0xe0] sm:$0xff] }
  0x19   : > { %940 = vmatpush.bf16.msra.mxu2 %v2914_v9  ;;  %1010 = vmatpush.bf16.msra.mxu3 %v2916_v10  ;;  %v3056_v42 = vld [vmem:[%s2945_s6 + $0xbc] sm:$0xff]  ;;  %v3059_v43 = vld [vmem:[%s2945_s6 + $0xc] sm:$0xff]  ;;  %v3062_v44 = vld [vmem:[%s2945_s6 + $0x54] sm:$0xff] }
  0x1a   : > { %v3073_v45 = vld [vmem:[%s2945_s6 + $0xe8] sm:$0xff]  ;;  %v3079_v47 = vld [vmem:[%s2945_s6 + $0x14] sm:$0xff]  ;;  %v3082_v48 = vld [vmem:[%s2945_s6 + $0x5c] sm:$0xff] }
  0x1b   : > { %v3076_v46 = vld [vmem:[%s2945_s6 + $0xc4] sm:$0xff]  ;;  %v3093_v49 = vld [vmem:[%s2945_s6 + $0xf0] sm:$0xff]  ;;  %v3099_v51 = vld [vmem:[%s2945_s6 + $0x1c] sm:$0xff] }
  0x1c   : > { %v3096_v50 = vld [vmem:[%s2945_s6 + $0xcc] sm:$0xff]  ;;  %v3102_v52 = vld [vmem:[%s2945_s6 + $0x64] sm:$0xff]  ;;  %v2820_v7 = vld [vmem:[%s2945_s6 + $0x74] sm:$0xff] }
  0x1d   : > { %v3113_v53 = vld [vmem:[%s2945_s6 + $0x28] sm:$0xff]  ;;  %v3130_v3 = vld [vmem:[%s2945_s6 + $0x30] sm:$0xff] }
  0x1e   : > { %v2819_v56 = vld [vmem:[%s2945_s6 + $0x6c] sm:$0xff] }
  0x23   : > { %2286 = vmatmul.msk.bf16.gmra.mxu0 %vm213_vm2, %v2972_v23  ;;  %2306 = vmatmul.msk.bf16.gmra.mxu1 %vm213_vm2, %v2784_v24 }
  0x26   : > { %2335 = vmatmul.msk.bf16.gmra.mxu2 %vm213_vm2, %v2976_v25  ;;  %2364 = vmatmul.msk.bf16.gmra.mxu3 %vm213_vm2, %v2979_v26 }
  0x33   : > { %2287 = vmatmul.msk.bf16.gmra.mxu0 %vm213_vm2, %v2989_v27  ;;  %2307 = vmatmul.msk.bf16.gmra.mxu1 %vm213_vm2, %v2785_v28 }
  0x36   : > { %2336 = vmatmul.msk.bf16.gmra.mxu2 %vm213_vm2, %v2993_v29  ;;  %2365 = vmatmul.msk.bf16.gmra.mxu3 %vm213_vm2, %v2996_v30 }
  0x43   : > { %2288 = vmatmul.msk.bf16.gmra.mxu0 %vm213_vm2, %v3012_v33  ;;  %2308 = vmatmul.msk.bf16.gmra.mxu1 %vm213_vm2, %v2786_v34 }
  0x46   : > { %2337 = vmatmul.msk.bf16.gmra.mxu2 %vm213_vm2, %v3016_v35  ;;  %2366 = vmatmul.msk.bf16.gmra.mxu3 %vm213_vm2, %v3019_v36 }
  0x53   : > { %2392 = vmatmul.msk.bf16.vlgmr.msrb.gmra.mxu0 %vm213_vm2, %v3029_v37  ;;  %2421 = vmatmul.msk.bf16.vlgmr.msrb.gmra.mxu1 %vm213_vm2, %v3032_v38 }
  0x54   : > { %1047 = vmatpush.bf16.msrb.mxu0 %v2918_v11  ;;  %1084 = vmatpush.bf16.msrb.mxu1 %v2932_v16 }
  0x56   : > { %2442 = vmatmul.msk.bf16.vlgmr.msrb.gmra.mxu2 %vm213_vm2, %v3035_v39  ;;  %2471 = vmatmul.msk.bf16.vlgmr.msrb.gmra.mxu3 %vm213_vm2, %v3038_v40 }
  0x57   : > { %1162 = vmatpush.bf16.msrb.mxu2 %v2936_v18  ;;  %1199 = vmatpush.bf16.msrb.mxu3 %v2930_v15 }
  0x63   : > { %2393 = vmatmul.msk.bf16.gmra.mxu0 %vm213_vm2, %v3053_v41  ;;  %2422 = vmatmul.msk.bf16.gmra.mxu1 %vm213_vm2, %v3056_v42 }
  0x66   : > { %2443 = vmatmul.msk.bf16.gmra.mxu2 %vm213_vm2, %v3059_v43  ;;  %2472 = vmatmul.msk.bf16.gmra.mxu3 %vm213_vm2, %v3062_v44 }
  0x73   : > { %2394 = vmatmul.msk.bf16.gmra.mxu0 %vm213_vm2, %v3073_v45  ;;  %2423 = vmatmul.msk.bf16.gmra.mxu1 %vm213_vm2, %v3076_v46 }
  0x76   : > { %2444 = vmatmul.msk.bf16.gmra.mxu2 %vm213_vm2, %v3079_v47  ;;  %2473 = vmatmul.msk.bf16.gmra.mxu3 %vm213_vm2, %v3082_v48 }
  0x83   : > { %2395 = vmatmul.msk.bf16.gmra.mxu0 %vm213_vm2, %v3093_v49  ;;  %2424 = vmatmul.msk.bf16.gmra.mxu1 %vm213_vm2, %v3096_v50 }
  0x86   : > { %2445 = vmatmul.msk.bf16.gmra.mxu2 %vm213_vm2, %v3099_v51  ;;  %2474 = vmatmul.msk.bf16.gmra.mxu3 %vm213_vm2, %v3102_v52 }
  0x90   : > { %v242_v54 = vpop.f32.mrf.mxu0  ;;  %v306_v55 = vpop.f32.mrf.mxu1 }
  0x91   : > { %v307_v57 = vadd.f32 %v306_v55, %v242_v54  ;;  %v3145_v55 = vld [vmem:[%s2945_s6 + $0x38] sm:$0xff] }
  0x93   : > { %2500 = vmatmul.msk.bf16.vlgmr.msra.gmra.mxu0 %vm213_vm2, %v3113_v53  ;;  %2504 = vmatmul.msk.bf16.vlgmr.msra.gmra.mxu1 %vm213_vm2, %v2952_v21 }
  0x94   : > { %1236 = vmatpush.bf16.msra.mxu0 %v2934_v17  ;;  %1313 = vmatpush.bf16.msra.mxu1 %v3008_v32 }
  0x96   : > { %2508 = vmatmul.msk.bf16.vlgmr.msra.gmra.mxu2 %vm213_vm2, %v2948_v19  ;;  %2536 = vmatmul.msk.bf16.vlgmr.msra.gmra.mxu3 %vm213_vm2, %v2819_v56 }
  0x97   : > { %1358 = vmatpush.bf16.msra.mxu2 %v2912_v8  ;;  %1387 = vmatpush.bf16.msra.mxu3 %v2914_v9 }
  0x98   : > { %v244_v61 = vpop.f32.mrf.mxu0  ;;  %v308_v62 = vpop.f32.mrf.mxu1 }
  0x99   : > { %v381_v58 = vpop.f32.mrf.mxu2  ;;  %v464_v59 = vpop.f32.mrf.mxu3  ;;  %v309_v63 = vadd.f32 %v308_v62, %v244_v61 }
  0x9a   : > { %v401_v60 = vadd.f32 %v381_v58, %v307_v57  ;;  %v2821_v58 = vld [vmem:[%s2945_s6 + $0x7c] sm:$0xff] }
  0x9c   : > { %v3127_v0 = vadd.f32 %v464_v59, %v401_v60 }
  0xa0   : > { %v247_v5 = vpop.f32.mrf.mxu0  ;;  %v311_v6 = vpop.f32.mrf.mxu1 }
  0xa1   : > { %v383_v1 = vpop.f32.mrf.mxu2  ;;  %v466_v2 = vpop.f32.mrf.mxu3  ;;  %v312_v12 = vadd.f32 %v311_v6, %v247_v5 }
  0xa2   : > { %v402_v4 = vadd.f32 %v383_v1, %v309_v63 }
  0xa3   : > { %2501 = vmatmul.msk.bf16.gmra.mxu0 %vm213_vm2, %v3130_v3  ;;  %2505 = vmatmul.msk.bf16.gmra.mxu1 %vm213_vm2, %v2976_v25 }
  0xa4   : > { %v3133_v13 = vadd.f32 %v466_v2, %v402_v4 }
  0xa6   : > { %2509 = vmatmul.msk.bf16.gmra.mxu2 %vm213_vm2, %v2972_v23  ;;  %2537 = vmatmul.msk.bf16.gmra.mxu3 %vm213_vm2, %v2820_v7  ;;  %v3160_v7 = vld [vmem:[%s2945_s6 + $0x40] sm:$0xff] }
  0xa8   : > { %v249_v21 = vpop.f32.mrf.mxu0  ;;  %v313_v24 = vpop.f32.mrf.mxu1 }
  0xa9   : > { %v386_v14 = vpop.f32.mrf.mxu2  ;;  %v469_v19 = vpop.f32.mrf.mxu3  ;;  %v314_v28 = vadd.f32 %v313_v24, %v249_v21 }
  0xaa   : > { %v403_v20 = vadd.f32 %v386_v14, %v312_v12 }
  0xac   : > { %v3142_v31 = vadd.f32 %v469_v19, %v403_v20  ;;  %v2822_v19 = vld [vmem:[%s2945_s6 + $0x84] sm:$0xff] }
  0xb0   : > { %v252_v25 = vpop.f32.mrf.mxu0  ;;  %v316_v57 = vpop.f32.mrf.mxu1 }
  0xb1   : > { %v388_v34 = vpop.f32.mrf.mxu2  ;;  %v471_v54 = vpop.f32.mrf.mxu3  ;;  %v317_v23 = vadd.f32 %v316_v57, %v252_v25 }
  0xb2   : > { %v404_v56 = vadd.f32 %v388_v34, %v314_v28 }
  0xb3   : > { %2502 = vmatmul.msk.bf16.gmra.mxu0 %vm213_vm2, %v3145_v55  ;;  %2506 = vmatmul.msk.bf16.gmra.mxu1 %vm213_vm2, %v2993_v29 }
  0xb4   : > { %v3148_v59 = vadd.f32 %v471_v54, %v404_v56 }
  0xb6   : > { %2510 = vmatmul.msk.bf16.gmra.mxu2 %vm213_vm2, %v2989_v27  ;;  %2538 = vmatmul.msk.bf16.gmra.mxu3 %vm213_vm2, %v2821_v58 }
  0xb8   : > { %v254_v63 = vpop.f32.mrf.mxu0  ;;  %v318_v1 = vpop.f32.mrf.mxu1 }
  0xb9   : > { %v391_v60 = vpop.f32.mrf.mxu2  ;;  %v474_v61 = vpop.f32.mrf.mxu3  ;;  %v319_v2 = vadd.f32 %v318_v1, %v254_v63 }
  0xba   : > { %v405_v62 = vadd.f32 %v391_v60, %v317_v23 }
  0xbc   : > { %v3157_v4 = vadd.f32 %v474_v61, %v405_v62  ;;  %v3175_v62 = vld [vmem:[%s2945_s6 + $0xfc] sm:$0xff] }
  0xc0   : > { %v257_v29 = vpop.f32.mrf.mxu0  ;;  %v321_v14 = vpop.f32.mrf.mxu1 }
  0xc1   : > { %v393_v5 = vpop.f32.mrf.mxu2  ;;  %v476_v6 = vpop.f32.mrf.mxu3  ;;  %v322_v20 = vadd.f32 %v321_v14, %v257_v29 }
  0xc2   : > { %v406_v12 = vadd.f32 %v393_v5, %v319_v2 }
  0xc3   : > { %2503 = vmatmul.msk.bf16.gmra.mxu0 %vm213_vm2, %v3160_v7  ;;  %2507 = vmatmul.msk.bf16.gmra.mxu1 %vm213_vm2, %v3016_v35 }
  0xc4   : > { %v3163_v27 = vadd.f32 %v476_v6, %v406_v12 }
  0xc6   : > { %2511 = vmatmul.msk.bf16.gmra.mxu2 %vm213_vm2, %v3012_v33  ;;  %2539 = vmatmul.msk.bf16.gmra.mxu3 %vm213_vm2, %v2822_v19 }
  0xc8   : > { %v259_v34 = vpop.f32.mrf.mxu0  ;;  %v323_v54 = vpop.f32.mrf.mxu1 }
  0xc9   : > { %v396_v21 = vpop.f32.mrf.mxu2  ;;  %v479_v24 = vpop.f32.mrf.mxu3  ;;  %v324_v56 = vadd.f32 %v323_v54, %v259_v34  ;;  %v3196_v34 = vld [vmem:[%s2945_s6 + $0x104] sm:$0xff] }
  0xca   : > { %v407_v28 = vadd.f32 %v396_v21, %v322_v20 }
  0xcc   : > { %v3172_v25 = vadd.f32 %v479_v24, %v407_v28 }
  0xd0   : > { %v547_v60 = vpop.f32.mrf.mxu0  ;;  %v630_v61 = vpop.f32.mrf.mxu1 }
  0xd1   : > { %v398_v57 = vpop.f32.mrf.mxu2  ;;  %v481_v58 = vpop.f32.mrf.mxu3  ;;  %v567_v35 = vadd.f32 %v547_v60, %v3127_v0 }
  0xd2   : > { %v408_v23 = vadd.f32 %v398_v57, %v324_v56 }
  0xd3   : > { %v650_v63 = vadd.f32 %v630_v61, %v567_v35  ;;  %2540 = vmatmul.msk.bf16.vlgmr.msrb.gmra.mxu0 %vm213_vm2, %v3029_v37  ;;  %2544 = vmatmul.msk.bf16.vlgmr.msrb.gmra.mxu1 %vm213_vm2, %v3032_v38 }
  0xd4   : > { %v3178_v33 = vadd.f32 %v481_v58, %v408_v23  ;;  %1416 = vmatpush.bf16.msrb.mxu0 %v2916_v10  ;;  %1453 = vmatpush.bf16.msrb.mxu1 %v2918_v11 }
  0xd6   : > { %2572 = vmatmul.msk.bf16.vlgmr.msrb.gmra.mxu2 %vm213_vm2, %v3175_v62  ;;  %2576 = vmatmul.msk.bf16.vlgmr.msrb.gmra.mxu3 %vm213_vm2, %v3038_v40 }
  0xd7   : > { %1490 = vmatpush.bf16.msrb.mxu2 %v2932_v16  ;;  %1527 = vmatpush.bf16.msrb.mxu3 %v2936_v18 }
  0xd8   : > { %v549_v5 = vpop.f32.mrf.mxu0  ;;  %v632_v6 = vpop.f32.mrf.mxu1 }
  0xd9   : > { %v712_v0 = vpop.f32.mrf.mxu2  ;;  %v794_v1 = vpop.f32.mrf.mxu3  ;;  %v568_v12 = vadd.f32 %v549_v5, %v3133_v13 }
  0xda   : > { %v732_v2 = vadd.f32 %v712_v0, %v650_v63 }
  0xdb   : > { %v651_v14 = vadd.f32 %v632_v6, %v568_v12  ;;  %v3213_v12 = vld [vmem:[%s2945_s6 + $0x10c] sm:$0xff] }
  0xdc   : > { %v3193_v29 = vadd.f32 %v794_v1, %v732_v2 }
  0xe0   : > { %v552_v24 = vpop.f32.mrf.mxu0  ;;  %v635_v28 = vpop.f32.mrf.mxu1 }
  0xe1   : > { %v714_v19 = vpop.f32.mrf.mxu2  ;;  %v796_v20 = vpop.f32.mrf.mxu3  ;;  %v569_v54 = vadd.f32 %v552_v24, %v3142_v31 }
  0xe2   : > { %v733_v21 = vadd.f32 %v714_v19, %v651_v14 }
  0xe3   : > { %v652_v57 = vadd.f32 %v635_v28, %v569_v54  ;;  %2541 = vmatmul.msk.bf16.gmra.mxu0 %vm213_vm2, %v3053_v41  ;;  %2545 = vmatmul.msk.bf16.gmra.mxu1 %vm213_vm2, %v3056_v42 }
  0xe4   : > { %v3199_v56 = vadd.f32 %v796_v20, %v733_v21 }
  0xe6   : > { %2573 = vmatmul.msk.bf16.gmra.mxu2 %vm213_vm2, %v3196_v34  ;;  %2577 = vmatmul.msk.bf16.gmra.mxu3 %vm213_vm2, %v3062_v44 }
  0xe8   : > { %v554_v31 = vpop.f32.mrf.mxu0  ;;  %v637_v60 = vpop.f32.mrf.mxu1 }
  0xe9   : > { %v717_v13 = vpop.f32.mrf.mxu2  ;;  %v799_v58 = vpop.f32.mrf.mxu3  ;;  %v570_v61 = vadd.f32 %v554_v31, %v3148_v59 }
  0xea   : > { %v734_v23 = vadd.f32 %v717_v13, %v652_v57 }
  0xeb   : > { %v653_v63 = vadd.f32 %v637_v60, %v570_v61 }
  0xec   : > { %v3210_v35 = vadd.f32 %v799_v58, %v734_v23 }
  0xf0   : > { %v557_v5 = vpop.f32.mrf.mxu0  ;;  %v640_v6 = vpop.f32.mrf.mxu1 }
  0xf1   : > { %v719_v0 = vpop.f32.mrf.mxu2  ;;  %v801_v1 = vpop.f32.mrf.mxu3  ;;  %v571_v14 = vadd.f32 %v557_v5, %v3157_v4 }
  0xf2   : > { %v735_v2 = vadd.f32 %v719_v0, %v653_v63  ;;  %v3230_v63 = vld [vmem:[%s2945_s6 + $0x114] sm:$0xff] }
  0xf3   : > { %v654_v20 = vadd.f32 %v640_v6, %v571_v14  ;;  %2542 = vmatmul.msk.bf16.gmra.mxu0 %vm213_vm2, %v3073_v45  ;;  %2546 = vmatmul.msk.bf16.gmra.mxu1 %vm213_vm2, %v3076_v46 }
  0xf4   : > { %v3216_v19 = vadd.f32 %v801_v1, %v735_v2 }
  0xf6   : > { %2574 = vmatmul.msk.bf16.gmra.mxu2 %vm213_vm2, %v3213_v12  ;;  %2578 = vmatmul.msk.bf16.gmra.mxu3 %vm213_vm2, %v3082_v48 }
  0xf8   : > { %v559_v4 = vpop.f32.mrf.mxu0  ;;  %v642_v28 = vpop.f32.mrf.mxu1 }
  0xf9   : > { %v722_v59 = vpop.f32.mrf.mxu2  ;;  %v804_v21 = vpop.f32.mrf.mxu3  ;;  %v572_v54 = vadd.f32 %v559_v4, %v3163_v27 }
  0xfa   : > { %v736_v24 = vadd.f32 %v722_v59, %v654_v20 }
  0xfb   : > { %v655_v13 = vadd.f32 %v642_v28, %v572_v54  ;;  %v3247_v28 = vld [vmem:[%s2945_s6 + $0x70] sm:$0xff] }
  0xfc   : > { %v3227_v57 = vadd.f32 %v804_v21, %v736_v24 }
 0x100   : > { %v562_v60 = vpop.f32.mrf.mxu0  ;;  %v645_v61 = vpop.f32.mrf.mxu1 }
 0x101   : > { %v724_v58 = vpop.f32.mrf.mxu2  ;;  %v806_v23 = vpop.f32.mrf.mxu3  ;;  %v573_v0 = vadd.f32 %v562_v60, %v3172_v25 }
 0x102   : > { %v737_v31 = vadd.f32 %v724_v58, %v655_v13 }
 0x103   : > { %v656_v2 = vadd.f32 %v645_v61, %v573_v0  ;;  %2543 = vmatmul.msk.bf16.gmra.mxu0 %vm213_vm2, %v3093_v49  ;;  %2547 = vmatmul.msk.bf16.gmra.mxu1 %vm213_vm2, %v3096_v50 }
 0x104   : > { %v3233_v1 = vadd.f32 %v806_v23, %v737_v31 }
 0x106   : > { %2575 = vmatmul.msk.bf16.gmra.mxu2 %vm213_vm2, %v3230_v63  ;;  %2579 = vmatmul.msk.bf16.gmra.mxu3 %vm213_vm2, %v3102_v52 }
 0x108   : > { %v564_v25 = vpop.f32.mrf.mxu0  ;;  %v647_v14 = vpop.f32.mrf.mxu1 }
 0x109   : > { %v727_v27 = vpop.f32.mrf.mxu2  ;;  %v809_v5 = vpop.f32.mrf.mxu3  ;;  %v574_v20 = vadd.f32 %v564_v25, %v3178_v33 }
 0x10a   : > { %v738_v6 = vadd.f32 %v727_v27, %v656_v2 }
 0x10b   : > { %v657_v21 = vadd.f32 %v647_v14, %v574_v20 }
 0x10c   : > { %v3244_v59 = vadd.f32 %v809_v5, %v738_v6  ;;  %v3272_v6 = vld [vmem:[%s2945_s6 + $0x78] sm:$0xff] }
 0x110   : > { %v876_v13 = vpop.f32.mrf.mxu0  ;;  %v913_v58 = vpop.f32.mrf.mxu1 }
 0x111   : > { %v729_v24 = vpop.f32.mrf.mxu2  ;;  %v811_v4 = vpop.f32.mrf.mxu3  ;;  %v3250_v23 = vadd.f32 %v876_v13, %v3193_v29 }
 0x112   : > { %v739_v54 = vadd.f32 %v729_v24, %v657_v21 }
 0x113   : > { %2580 = vmatmul.msk.bf16.vlgmr.msra.gmra.mxu0 %vm213_vm2, %v3113_v53  ;;  %2608 = vmatmul.msk.bf16.vlgmr.msra.gmra.mxu1 %vm213_vm2, %v3247_v28 }
 0x114   : > { %v3252_v31 = vadd.f32 %v811_v4, %v739_v54  ;;  %1604 = vmatpush.bf16.msra.mxu0 %v2930_v15  ;;  %1681 = vmatpush.bf16.msra.mxu1 %v2934_v17 }
 0x116   : > { %2612 = vmatmul.msk.bf16.vlgmr.msra.gmra.mxu2 %vm213_vm2, %v3029_v37  ;;  %2616 = vmatmul.msk.bf16.vlgmr.msra.gmra.mxu3 %vm213_vm2, %v2957_v22 }
 0x117   : > { %1758 = vmatpush.bf16.msra.mxu2 %v3008_v32  ;;  %1803 = vmatpush.bf16.msra.mxu3 %v2912_v8 }
 0x118   : > { %v878_v61 = vpop.f32.mrf.mxu0  ;;  %v915_v0 = vpop.f32.mrf.mxu1 }
 0x119   : > { %v942_v33 = vpop.f32.mrf.mxu2  ;;  %v1012_v29 = vpop.f32.mrf.mxu3  ;;  %v3267_v2 = vadd.f32 %v878_v61, %v3199_v56 }
 0x11a   : > { %v943_v60 = vadd.f32 %v942_v33, %v913_v58 }
 0x11c   : > { %v3269_v27 = vadd.f32 %v1012_v29, %v943_v60  ;;  %v3293_v60 = vld [vmem:[%s2945_s6 + $0x80] sm:$0xff] }
 0x11d   : > { %3772 = vst [vmem:[#allocation2_spill] sm:$0xff] %v3293_v60 }
 0x120   : > { %v881_v14 = vpop.f32.mrf.mxu0  ;;  %v918_v20 = vpop.f32.mrf.mxu1 }
 0x121   : > { %v944_v5 = vpop.f32.mrf.mxu2  ;;  %v1014_v22 = vpop.f32.mrf.mxu3  ;;  %v3275_v8 = vadd.f32 %v881_v14, %v3210_v35 }
 0x122   : > { %v945_v25 = vadd.f32 %v944_v5, %v915_v0 }
 0x123   : > { %2581 = vmatmul.msk.bf16.gmra.mxu0 %vm213_vm2, %v3130_v3  ;;  %2609 = vmatmul.msk.bf16.gmra.mxu1 %vm213_vm2, %v3272_v6 }
 0x124   : > { %v3277_v21 = vadd.f32 %v1014_v22, %v945_v25 }
 0x126   : > { %2613 = vmatmul.msk.bf16.gmra.mxu2 %vm213_vm2, %v3053_v41  ;;  %2617 = vmatmul.msk.bf16.gmra.mxu3 %vm213_vm2, %v2979_v26 }
 0x128   : > { %v883_v54 = vpop.f32.mrf.mxu0  ;;  %v920_v35 = vpop.f32.mrf.mxu1 }
 0x129   : > { %v947_v56 = vpop.f32.mrf.mxu2  ;;  %v1017_v24 = vpop.f32.mrf.mxu3  ;;  %v3288_v13 = vadd.f32 %v883_v54, %v3216_v19 }
 0x12a   : > { %v948_v4 = vadd.f32 %v947_v56, %v918_v20 }
 0x12c   : > { %v3290_v58 = vadd.f32 %v1017_v24, %v948_v4 }
 0x130   : > { %v886_v0 = vpop.f32.mrf.mxu0  ;;  %v923_v5 = vpop.f32.mrf.mxu1 }
 0x131   : > { %v949_v33 = vpop.f32.mrf.mxu2  ;;  %v1019_v29 = vpop.f32.mrf.mxu3  ;;  %v3296_v26 = vadd.f32 %v886_v0, %v3227_v57 }
 0x132   : > { %v950_v61 = vadd.f32 %v949_v33, %v920_v35  ;;  %v3314_v35 = vld [vmem:[%s2945_s6 + $0x88] sm:$0xff] }
 0x133   : > { %2582 = vmatmul.msk.bf16.gmra.mxu0 %vm213_vm2, %v3145_v55  ;;  %2610 = vmatmul.msk.bf16.gmra.mxu1 %vm213_vm2, %v3293_v60  ;;  %3773 = vst [vmem:[#allocation3_spill] sm:$0xff] %v3314_v35 }
 0x134   : > { %v3298_v22 = vadd.f32 %v1019_v29, %v950_v61 }
 0x136   : > { %2614 = vmatmul.msk.bf16.gmra.mxu2 %vm213_vm2, %v3073_v45  ;;  %2618 = vmatmul.msk.bf16.gmra.mxu3 %vm213_vm2, %v2996_v30 }
 0x138   : > { %v888_v20 = vpop.f32.mrf.mxu0  ;;  %v925_v57 = vpop.f32.mrf.mxu1 }
 0x139   : > { %v952_v19 = vpop.f32.mrf.mxu2  ;;  %v1022_v25 = vpop.f32.mrf.mxu3  ;;  %v3309_v56 = vadd.f32 %v888_v20, %v3233_v1 }
 0x13a   : > { %v953_v14 = vadd.f32 %v952_v19, %v923_v5 }
 0x13c   : > { %v3311_v24 = vadd.f32 %v1022_v25, %v953_v14 }
 0x140   : > { %v891_v29 = vpop.f32.mrf.mxu0  ;;  %v928_v61 = vpop.f32.mrf.mxu1 }
 0x141   : > { %v954_v4 = vpop.f32.mrf.mxu2  ;;  %v1024_v54 = vpop.f32.mrf.mxu3  ;;  %v3317_v0 = vadd.f32 %v891_v29, %v3244_v59 }
 0x142   : > { %v955_v33 = vadd.f32 %v954_v4, %v925_v57 }
 0x143   : > { %2583 = vmatmul.msk.bf16.gmra.mxu0 %vm213_vm2, %v3160_v7  ;;  %2611 = vmatmul.msk.bf16.gmra.mxu1 %vm213_vm2, %v3314_v35 }
 0x144   : > { %v3319_v30 = vadd.f32 %v1024_v54, %v955_v33 }
 0x146   : > { %2615 = vmatmul.msk.bf16.gmra.mxu2 %vm213_vm2, %v3093_v49  ;;  %2619 = vmatmul.msk.bf16.gmra.mxu3 %vm213_vm2, %v3019_v36 }
 0x148   : > { %v893_v25 = vpop.f32.mrf.mxu0  ;;  %v930_v59 = vpop.f32.mrf.mxu1 }
 0x149   : > { %v957_v1 = vpop.f32.mrf.mxu2  ;;  %v1027_v5 = vpop.f32.mrf.mxu3  ;;  %v3330_v14 = vadd.f32 %v893_v25, %v3252_v31 }
 0x14a   : > { %v958_v19 = vadd.f32 %v957_v1, %v928_v61 }
 0x14c   : > { %v3332_v20 = vadd.f32 %v1027_v5, %v958_v19 }
 0x150   : > { %v1049_v33 = vpop.f32.mrf.mxu0  ;;  %v1086_v29 = vpop.f32.mrf.mxu1 }
 0x151   : > { %v959_v57 = vpop.f32.mrf.mxu2  ;;  %v1029_v4 = vpop.f32.mrf.mxu3  ;;  %v1069_v35 = vadd.f32 %v1049_v33, %v3269_v27 }
 0x152   : > { %v960_v54 = vadd.f32 %v959_v57, %v930_v59 }
 0x153   : > { %v1106_v36 = vadd.f32 %v1086_v29, %v1069_v35  ;;  %2620 = vmatmul.msk.bf16.vlgmr.msrb.gmra.mxu0 %vm213_vm2, %v3032_v38  ;;  %2624 = vmatmul.msk.bf16.vlgmr.msrb.gmra.mxu1 %vm213_vm2, %v3035_v39 }
 0x154   : > { %v3335_v60 = vadd.f32 %v1029_v4, %v960_v54  ;;  %1832 = vmatpush.bf16.msrb.mxu0 %v2914_v9  ;;  %1861 = vmatpush.bf16.msrb.mxu1 %v2916_v10 }
 0x156   : > { %2628 = vmatmul.msk.bf16.vlgmr.msrb.gmra.mxu2 %vm213_vm2, %v3038_v40  ;;  %2632 = vmatmul.msk.bf16.vlgmr.msrb.gmra.mxu3 %vm213_vm2, %v3113_v53 }
 0x157   : > { %1898 = vmatpush.bf16.msrb.mxu2 %v2918_v11  ;;  %1935 = vmatpush.bf16.msrb.mxu3 %v2932_v16 }
 0x158   : > { %v1051_v61 = vpop.f32.mrf.mxu0  ;;  %v1088_v1 = vpop.f32.mrf.mxu1 }
 0x159   : > { %v1164_v31 = vpop.f32.mrf.mxu2  ;;  %v1201_v27 = vpop.f32.mrf.mxu3  ;;  %v1070_v39 = vadd.f32 %v1051_v61, %v3277_v21 }
 0x15a   : > { %v1184_v35 = vadd.f32 %v1164_v31, %v1106_v36 }
 0x15b   : > { %v1107_v19 = vadd.f32 %v1088_v1, %v1070_v39 }
 0x15c   : > { %v3350_v5 = vadd.f32 %v1201_v27, %v1184_v35 }
 0x160   : > { %v1054_v11 = vpop.f32.mrf.mxu0  ;;  %v1091_v4 = vpop.f32.mrf.mxu1 }
 0x161   : > { %v1166_v25 = vpop.f32.mrf.mxu2  ;;  %v1203_v59 = vpop.f32.mrf.mxu3  ;;  %v1071_v9 = vadd.f32 %v1054_v11, %v3290_v58 }
 0x162   : > { %v1185_v57 = vadd.f32 %v1166_v25, %v1107_v19 }
 0x163   : > { %v1108_v10 = vadd.f32 %v1091_v4, %v1071_v9  ;;  %2621 = vmatmul.msk.bf16.gmra.mxu0 %vm213_vm2, %v3056_v42  ;;  %2625 = vmatmul.msk.bf16.gmra.mxu1 %vm213_vm2, %v3059_v43 }
 0x164   : > { %v3353_v16 = vadd.f32 %v1203_v59, %v1185_v57 }
 0x166   : > { %2629 = vmatmul.msk.bf16.gmra.mxu2 %vm213_vm2, %v3062_v44  ;;  %2633 = vmatmul.msk.bf16.gmra.mxu3 %vm213_vm2, %v3130_v3 }
 0x168   : > { %v1056_v29 = vpop.f32.mrf.mxu0  ;;  %v1093_v58 = vpop.f32.mrf.mxu1 }
 0x169   : > { %v1169_v21 = vpop.f32.mrf.mxu2  ;;  %v1206_v54 = vpop.f32.mrf.mxu3  ;;  %v1072_v36 = vadd.f32 %v1056_v29, %v3298_v22 }
 0x16a   : > { %v1186_v33 = vadd.f32 %v1169_v21, %v1108_v10 }
 0x16b   : > { %v1109_v27 = vadd.f32 %v1093_v58, %v1072_v36 }
 0x16c   : > { %v3364_v31 = vadd.f32 %v1206_v54, %v1186_v33 }
 0x170   : > { %v1059_v43 = vpop.f32.mrf.mxu0  ;;  %v1096_v39 = vpop.f32.mrf.mxu1 }
 0x171   : > { %v1171_v35 = vpop.f32.mrf.mxu2  ;;  %v1208_v61 = vpop.f32.mrf.mxu3  ;;  %v1073_v19 = vadd.f32 %v1059_v43, %v3311_v24 }
 0x172   : > { %v1187_v1 = vadd.f32 %v1171_v35, %v1109_v27 }
 0x173   : > { %v1110_v59 = vadd.f32 %v1096_v39, %v1073_v19  ;;  %2622 = vmatmul.msk.bf16.gmra.mxu0 %vm213_vm2, %v3076_v46  ;;  %2626 = vmatmul.msk.bf16.gmra.mxu1 %vm213_vm2, %v3079_v47 }
 0x174   : > { %v3367_v25 = vadd.f32 %v1208_v61, %v1187_v1 }
 0x176   : > { %2630 = vmatmul.msk.bf16.gmra.mxu2 %vm213_vm2, %v3082_v48  ;;  %2634 = vmatmul.msk.bf16.gmra.mxu3 %vm213_vm2, %v3145_v55 }
 0x178   : > { %v1061_v4 = vpop.f32.mrf.mxu0  ;;  %v1098_v24 = vpop.f32.mrf.mxu1 }
 0x179   : > { %v1174_v22 = vpop.f32.mrf.mxu2  ;;  %v1211_v57 = vpop.f32.mrf.mxu3  ;;  %v1074_v9 = vadd.f32 %v1061_v4, %v3319_v30 }
 0x17a   : > { %v1188_v11 = vadd.f32 %v1174_v22, %v1110_v59 }
 0x17b   : > { %v1111_v21 = vadd.f32 %v1098_v24, %v1074_v9 }
 0x17c   : > { %v3378_v10 = vadd.f32 %v1211_v57, %v1188_v11  ;;  %v3396_v11 = vld [vmem:[%s2945_s6 + $0xdc] sm:$0xff] }
 0x180   : > { %v1064_v47 = vpop.f32.mrf.mxu0  ;;  %v1101_v58 = vpop.f32.mrf.mxu1 }
 0x181   : > { %v1176_v54 = vpop.f32.mrf.mxu2  ;;  %v1213_v33 = vpop.f32.mrf.mxu3  ;;  %v1075_v36 = vadd.f32 %v1064_v47, %v3332_v20 }
 0x182   : > { %v1189_v29 = vadd.f32 %v1176_v54, %v1111_v21  ;;  %v3399_v21 = vld [vmem:[%s2945_s6 + $0xb8] sm:$0xff] }
 0x183   : > { %v1112_v35 = vadd.f32 %v1101_v58, %v1075_v36  ;;  %2623 = vmatmul.msk.bf16.gmra.mxu0 %vm213_vm2, %v3096_v50  ;;  %2627 = vmatmul.msk.bf16.gmra.mxu1 %vm213_vm2, %v3099_v51  ;;  %v2831_v51 = vld [vmem:[%s2945_s6 + $0x94] sm:$0xff] }
 0x184   : > { %v3381_v27 = vadd.f32 %v1213_v33, %v1189_v29 }
 0x186   : > { %2631 = vmatmul.msk.bf16.gmra.mxu2 %vm213_vm2, %v3102_v52  ;;  %2635 = vmatmul.msk.bf16.gmra.mxu3 %vm213_vm2, %v3160_v7 }
 0x188   : > { %v1066_v1 = vpop.f32.mrf.mxu0  ;;  %v1103_v43 = vpop.f32.mrf.mxu1 }
 0x189   : > { %v1179_v30 = vpop.f32.mrf.mxu2  ;;  %v1216_v20 = vpop.f32.mrf.mxu3  ;;  %v1076_v39 = vadd.f32 %v1066_v1, %v3335_v60 }
 0x18a   : > { %v1190_v61 = vadd.f32 %v1179_v30, %v1112_v35 }
 0x18b   : > { %v1113_v59 = vadd.f32 %v1103_v43, %v1076_v39  ;;  %v3433_v39 = vld [vmem:[%s2945_s6 + $0xc0] sm:$0xff] }
 0x18c   : > { %v3392_v19 = vadd.f32 %v1216_v20, %v1190_v61  ;;  %v2832_v61 = vld [vmem:[%s2945_s6 + $0x9c] sm:$0xff] }
 0x190   : > { %v1238_v24 = vpop.f32.mrf.mxu0  ;;  %v1315_v9 = vpop.f32.mrf.mxu1 }
 0x191   : > { %v1181_v22 = vpop.f32.mrf.mxu2  ;;  %v1218_v57 = vpop.f32.mrf.mxu3  ;;  %v1258_v54 = vadd.f32 %v1238_v24, %v3350_v5 }
 0x192   : > { %v1191_v4 = vadd.f32 %v1181_v22, %v1113_v59 }
 0x193   : > { %v3404_v29 = vadd.f32 %v1315_v9, %v1258_v54  ;;  %2660 = vmatmul.msk.bf16.vlgmr.msra.gmra.mxu0 %vm213_vm2, %v2831_v51  ;;  %2688 = vmatmul.msk.bf16.vlgmr.msra.gmra.mxu1 %vm213_vm2, %v3396_v11 }
 0x194   : > { %v3402_v33 = vadd.f32 %v1218_v57, %v1191_v4  ;;  %1972 = vmatpush.bf16.msra.mxu0 %v2936_v18  ;;  %2009 = vmatpush.bf16.msra.mxu1 %v2930_v15 }
 0x195   : > { %v1343_v60 = vmax.f32 %v3250_v23, %v3404_v29 }
 0x196   : > { %2716 = vmatmul.msk.bf16.vlgmr.msra.gmra.mxu2 %vm213_vm2, %v3399_v21  ;;  %2720 = vmatmul.msk.bf16.vlgmr.msra.gmra.mxu3 %vm213_vm2, %v3032_v38 }
 0x197   : > { %2046 = vmatpush.bf16.msra.mxu2 %v2934_v17  ;;  %2123 = vmatpush.bf16.msra.mxu3 %v3008_v32  ;;  %v3428_v32 = vld [vmem:[%s2945_s6 + $0xe4] sm:$0xff] }
 0x198   : > { %v1240_v36 = vpop.f32.mrf.mxu0  ;;  %v1317_v38 = vpop.f32.mrf.mxu1 }
 0x199   : > { %v1360_v5 = vpop.f32.mrf.mxu2  ;;  %v1389_v47 = vpop.f32.mrf.mxu3  ;;  %v1259_v35 = vadd.f32 %v1240_v36, %v3353_v16 }
 0x19a   : > { %v3419_v58 = vadd.f32 %v1389_v47, %v1360_v5 }
 0x19b   : > { %v3422_v30 = vadd.f32 %v1317_v38, %v1259_v35  ;;  %v3456_v38 = vld [vmem:[%s2945_s6 + $0xec] sm:$0xff] }
 0x1a0   : > { %v1243_v1 = vpop.f32.mrf.mxu0  ;;  %v1320_v43 = vpop.f32.mrf.mxu1 }
 0x1a1   : > { %v1362_v20 = vpop.f32.mrf.mxu2  ;;  %v1391_v18 = vpop.f32.mrf.mxu3  ;;  %v1260_v59 = vadd.f32 %v1243_v1, %v3364_v31 }
 0x1a2   : > { %v3430_v15 = vadd.f32 %v1391_v18, %v1362_v20 }
 0x1a3   : > { %v3436_v22 = vadd.f32 %v1320_v43, %v1260_v59  ;;  %2661 = vmatmul.msk.bf16.gmra.mxu0 %vm213_vm2, %v2832_v61  ;;  %2689 = vmatmul.msk.bf16.gmra.mxu1 %vm213_vm2, %v3428_v32  ;;  %v3461_v61 = vld [vmem:[%s2945_s6 + $0xc8] sm:$0xff] }
 0x1a6   : > { %2717 = vmatmul.msk.bf16.gmra.mxu2 %vm213_vm2, %v3433_v39  ;;  %2721 = vmatmul.msk.bf16.gmra.mxu3 %vm213_vm2, %v3056_v42  ;;  %v2833_v42 = vld [vmem:[%s2945_s6 + $0xa4] sm:$0xff] }
 0x1a8   : > { %v1245_v4 = vpop.f32.mrf.mxu0  ;;  %v1322_v24 = vpop.f32.mrf.mxu1 }
 0x1a9   : > { %v1365_v31 = vpop.f32.mrf.mxu2  ;;  %v1394_v57 = vpop.f32.mrf.mxu3  ;;  %v1261_v9 = vadd.f32 %v1245_v4, %v3367_v25 }
 0x1aa   : > { %v3447_v51 = vadd.f32 %v1394_v57, %v1365_v31 }
 0x1ab   : > { %v3450_v54 = vadd.f32 %v1322_v24, %v1261_v9 }
 0x1b0   : > { %v1248_v20 = vpop.f32.mrf.mxu0  ;;  %v1325_v18 = vpop.f32.mrf.mxu1 }
 0x1b1   : > { %v1367_v47 = vpop.f32.mrf.mxu2  ;;  %v1396_v36 = vpop.f32.mrf.mxu3  ;;  %v1262_v1 = vadd.f32 %v1248_v20, %v3378_v10  ;;  %v3484_v20 = vld [vmem:[%s2945_s6 + $0xf4] sm:$0xff] }
 0x1b2   : > { %v3458_v35 = vadd.f32 %v1396_v36, %v1367_v47 }
 0x1b3   : > { %v3464_v43 = vadd.f32 %v1325_v18, %v1262_v1  ;;  %2662 = vmatmul.msk.bf16.gmra.mxu0 %vm213_vm2, %v2833_v42  ;;  %2690 = vmatmul.msk.bf16.gmra.mxu1 %vm213_vm2, %v3456_v38 }
 0x1b6   : > { %2718 = vmatmul.msk.bf16.gmra.mxu2 %vm213_vm2, %v3461_v61  ;;  %2722 = vmatmul.msk.bf16.gmra.mxu3 %vm213_vm2, %v3076_v46  ;;  %v2834_v46 = vld [vmem:[%s2945_s6 + $0xac] sm:$0xff] }
 0x1b8   : > { %v1250_v57 = vpop.f32.mrf.mxu0  ;;  %v1327_v4 = vpop.f32.mrf.mxu1 }
 0x1b9   : > { %v1370_v10 = vpop.f32.mrf.mxu2  ;;  %v1399_v59 = vpop.f32.mrf.mxu3  ;;  %v1263_v24 = vadd.f32 %v1250_v57, %v3381_v27 }
 0x1ba   : > { %v3475_v31 = vadd.f32 %v1399_v59, %v1370_v10  ;;  %v3489_v10 = vld [vmem:[%s2945_s6 + $0xd0] sm:$0xff] }
 0x1bb   : > { %v3478_v9 = vadd.f32 %v1327_v4, %v1263_v24 }
 0x1c0   : > { %v1253_v1 = vpop.f32.mrf.mxu0  ;;  %v1330_v25 = vpop.f32.mrf.mxu1 }
 0x1c1   : > { %v1372_v36 = vpop.f32.mrf.mxu2  ;;  %v1401_v42 = vpop.f32.mrf.mxu3  ;;  %v1264_v59 = vadd.f32 %v1253_v1, %v3392_v19 }
 0x1c2   : > { %v3486_v18 = vadd.f32 %v1401_v42, %v1372_v36 }
 0x1c3   : > { %v3492_v5 = vadd.f32 %v1330_v25, %v1264_v59  ;;  %2663 = vmatmul.msk.bf16.gmra.mxu0 %vm213_vm2, %v2834_v46  ;;  %2691 = vmatmul.msk.bf16.gmra.mxu1 %vm213_vm2, %v3484_v20 }
 0x1c6   : > { %2719 = vmatmul.msk.bf16.gmra.mxu2 %vm213_vm2, %v3489_v10  ;;  %2723 = vmatmul.msk.bf16.gmra.mxu3 %vm213_vm2, %v3096_v50 }
 0x1c8   : > { %v1255_v19 = vpop.f32.mrf.mxu0  ;;  %v1332_v25 = vpop.f32.mrf.mxu1 }
 0x1c9   : > { %v1375_v57 = vpop.f32.mrf.mxu2  ;;  %v1404_v4 = vpop.f32.mrf.mxu3  ;;  %v1265_v36 = vadd.f32 %v1255_v19, %v3402_v33 }
 0x1ca   : > { %v3503_v24 = vadd.f32 %v1404_v4, %v1375_v57 }
 0x1cb   : > { %v3506_v42 = vadd.f32 %v1332_v25, %v1265_v36 }
 0x1cd   : > { %v1350_v46 = vmax.f32 %v3330_v14, %v3506_v42 }
 0x1d0   : > { %v1418_v50 = vpop.f32.mrf.mxu0  ;;  %v1455_v16 = vpop.f32.mrf.mxu1 }
 0x1d1   : > { %v1377_v1 = vpop.f32.mrf.mxu2  ;;  %v1406_v59 = vpop.f32.mrf.mxu3  ;;  %v1438_v27 = vadd.f32 %v1418_v50, %v3419_v58 }
 0x1d2   : > { %v3510_v47 = vadd.f32 %v1406_v59, %v1377_v1 }
 0x1d3   : > { %v1475_v17 = vadd.f32 %v1455_v16, %v1438_v27  ;;  %2724 = vmatmul.msk.bf16.vlgmr.msrb.gmra.mxu0 %vm213_vm2, %v3029_v37  ;;  %2728 = vmatmul.msk.bf16.vlgmr.msrb.gmra.mxu1 %vm213_vm2, %v3175_v62 }
 0x1d6   : > { %2732 = vmatmul.msk.bf16.vlgmr.msrb.gmra.mxu2 %vm213_vm2, %v3038_v40  ;;  %2736 = vmatmul.msk.bf16.vlgmr.msrb.gmra.mxu3 %vm213_vm2, %v3113_v53 }
 0x1d8   : > { %v1420_v19 = vpop.f32.mrf.mxu0  ;;  %v1457_v25 = vpop.f32.mrf.mxu1 }
 0x1d9   : > { %v1492_v33 = vpop.f32.mrf.mxu2  ;;  %v1529_v57 = vpop.f32.mrf.mxu3  ;;  %v1439_v58 = vadd.f32 %v1420_v19, %v3430_v15 }
 0x1da   : > { %v1512_v4 = vadd.f32 %v1492_v33, %v1475_v17 }
 0x1db   : > { %v1476_v27 = vadd.f32 %v1457_v25, %v1439_v58 }
 0x1dc   : > { %v3522_v16 = vadd.f32 %v1529_v57, %v1512_v4 }
 0x1e0   : > { %v1423_v62 = vpop.f32.mrf.mxu0  ;;  %v1460_v59 = vpop.f32.mrf.mxu1 }
 0x1e1   : > { %v1494_v37 = vpop.f32.mrf.mxu2  ;;  %v1531_v36 = vpop.f32.mrf.mxu3  ;;  %v1440_v40 = vadd.f32 %v1423_v62, %v3447_v51 }
 0x1e2   : > { %v1513_v1 = vadd.f32 %v1494_v37, %v1476_v27 }
 0x1e3   : > { %v1477_v53 = vadd.f32 %v1460_v59, %v1440_v40  ;;  %2725 = vmatmul.msk.bf16.gmra.mxu0 %vm213_vm2, %v3053_v41  ;;  %2729 = vmatmul.msk.bf16.gmra.mxu1 %vm213_vm2, %v3196_v34 }
 0x1e4   : > { %v3525_v50 = vadd.f32 %v1531_v36, %v1513_v1 }
 0x1e6   : > { %2733 = vmatmul.msk.bf16.gmra.mxu2 %vm213_vm2, %v3062_v44  ;;  %2737 = vmatmul.msk.bf16.gmra.mxu3 %vm213_vm2, %v3130_v3 }
 0x1e8   : > { %v1425_v57 = vpop.f32.mrf.mxu0  ;;  %v1462_v51 = vpop.f32.mrf.mxu1 }
 0x1e9   : > { %v1497_v17 = vpop.f32.mrf.mxu2  ;;  %v1534_v15 = vpop.f32.mrf.mxu3  ;;  %v1441_v4 = vadd.f32 %v1425_v57, %v3458_v35 }
 0x1ea   : > { %v1514_v33 = vadd.f32 %v1497_v17, %v1477_v53 }
 0x1eb   : > { %v1478_v25 = vadd.f32 %v1462_v51, %v1441_v4 }
 0x1ec   : > { %v3536_v19 = vadd.f32 %v1534_v15, %v1514_v33 }
 0x1f0   : > { %v1428_v34 = vpop.f32.mrf.mxu0  ;;  %v1465_v37 = vpop.f32.mrf.mxu1 }
 0x1f1   : > { %v1499_v41 = vpop.f32.mrf.mxu2  ;;  %v1536_v58 = vpop.f32.mrf.mxu3  ;;  %v1442_v44 = vadd.f32 %v1428_v34, %v3475_v31 }
 0x1f2   : > { %v1515_v27 = vadd.f32 %v1499_v41, %v1478_v25 }
 0x1f3   : > { %v1479_v3 = vadd.f32 %v1465_v37, %v1442_v44  ;;  %2726 = vmatmul.msk.bf16.gmra.mxu0 %vm213_vm2, %v3073_v45  ;;  %2730 = vmatmul.msk.bf16.gmra.mxu1 %vm213_vm2, %v3213_v12 }
 0x1f4   : > { %v3539_v36 = vadd.f32 %v1536_v58, %v1515_v27 }
 0x1f6   : > { %2734 = vmatmul.msk.bf16.gmra.mxu2 %vm213_vm2, %v3082_v48  ;;  %2738 = vmatmul.msk.bf16.gmra.mxu3 %vm213_vm2, %v3145_v55 }
 0x1f8   : > { %v1430_v59 = vpop.f32.mrf.mxu0  ;;  %v1467_v31 = vpop.f32.mrf.mxu1 }
 0x1f9   : > { %v1502_v35 = vpop.f32.mrf.mxu2  ;;  %v1539_v1 = vpop.f32.mrf.mxu3  ;;  %v1443_v40 = vadd.f32 %v1430_v59, %v3486_v18 }
 0x1fa   : > { %v1516_v62 = vadd.f32 %v1502_v35, %v1479_v3  ;;  %v2843_v35 = vld [vmem:[%s2945_s6 + $0x100] sm:$0xff] }
 0x1fb   : > { %v1480_v17 = vadd.f32 %v1467_v31, %v1443_v40 }
 0x1fc   : > { %v3550_v53 = vadd.f32 %v1539_v1, %v1516_v62 }
 0x200   : > { %v1433_v12 = vpop.f32.mrf.mxu0  ;;  %v1470_v57 = vpop.f32.mrf.mxu1 }
 0x201   : > { %v1504_v45 = vpop.f32.mrf.mxu2  ;;  %v1541_v15 = vpop.f32.mrf.mxu3  ;;  %v1444_v48 = vadd.f32 %v1433_v12, %v3503_v24  ;;  %v2844_v12 = vld [vmem:[%s2945_s6 + $0x108] sm:$0xff] }
 0x202   : > { %v1517_v33 = vadd.f32 %v1504_v45, %v1480_v17 }
 0x203   : > { %v1481_v55 = vadd.f32 %v1470_v57, %v1444_v48  ;;  %2727 = vmatmul.msk.bf16.gmra.mxu0 %vm213_vm2, %v3093_v49  ;;  %2731 = vmatmul.msk.bf16.gmra.mxu1 %vm213_vm2, %v3230_v63  ;;  %v3774_v48 = vmax.f32 %v3267_v2, %v3422_v30 }
 0x204   : > { %v3553_v51 = vadd.f32 %v1541_v15, %v1517_v33 }
 0x206   : > { %2735 = vmatmul.msk.bf16.gmra.mxu2 %vm213_vm2, %v3102_v52  ;;  %2739 = vmatmul.msk.bf16.gmra.mxu3 %vm213_vm2, %v3160_v7 }
 0x208   : > { %v1435_v24 = vpop.f32.mrf.mxu0  ;;  %v1472_v41 = vpop.f32.mrf.mxu1 }
 0x209   : > { %v1507_v18 = vpop.f32.mrf.mxu2  ;;  %v1544_v4 = vpop.f32.mrf.mxu3  ;;  %v1445_v58 = vadd.f32 %v1435_v24, %v3510_v47 }
 0x20a   : > { %v1518_v25 = vadd.f32 %v1507_v18, %v1481_v55 }
 0x20b   : > { %v1482_v49 = vadd.f32 %v1472_v41, %v1445_v58  ;;  %v2845_v58 = vld [vmem:[%s2945_s6 + $0x110] sm:$0xff] }
 0x20c   : > { %v3564_v27 = vadd.f32 %v1544_v4, %v1518_v25 }
 0x210   : > { %v1606_v44 = vpop.f32.mrf.mxu0  ;;  %v1683_v3 = vpop.f32.mrf.mxu1 }
 0x211   : > { %v1509_v34 = vpop.f32.mrf.mxu2  ;;  %v1546_v37 = vpop.f32.mrf.mxu3  ;;  %v1626_v52 = vadd.f32 %v1606_v44, %v3522_v16 }
 0x212   : > { %v1519_v63 = vadd.f32 %v1509_v34, %v1482_v49  ;;  %v3776_v34 = vmax.f32 %v3288_v13, %v3450_v54 }
 0x213   : > { %v1703_v7 = vadd.f32 %v1683_v3, %v1626_v52  ;;  %2740 = vmatmul.msk.bf16.vlgmr.msra.gmra.mxu0 %vm213_vm2, %v3247_v28  ;;  %2744 = vmatmul.msk.bf16.vlgmr.msra.gmra.mxu1 %vm213_vm2, %v3396_v11  ;;  %v3778_v3 = vmax.f32 %v3296_v26, %v3464_v43 }
 0x214   : > { %v3568_v1 = vadd.f32 %v1546_v37, %v1519_v63  ;;  %v3777_v63 = vld [vmem:[#allocation2_spill] sm:$0xff] }
 0x216   : > { %2748 = vmatmul.msk.bf16.vlgmr.msra.gmra.mxu2 %vm213_vm2, %v3399_v21  ;;  %2776 = vmatmul.msk.bf16.vlgmr.msra.gmra.mxu3 %vm213_vm2, %v2843_v35 }
 0x218   : > { %v1608_v16 = vpop.f32.mrf.mxu0  ;;  %v1685_v31 = vpop.f32.mrf.mxu1 }
 0x219   : > { %v1760_v47 = vpop.f32.mrf.mxu2  ;;  %v3577_v62 = vpop.f32.mrf.mxu3  ;;  %v1627_v40 = vadd.f32 %v1608_v16, %v3525_v50  ;;  %v2846_v16 = vld [vmem:[%s2945_s6 + $0x118] sm:$0xff] }
 0x21a   : > { %v1780_v59 = vadd.f32 %v1760_v47, %v1703_v7 }
 0x21b   : > { %v1704_v11 = vadd.f32 %v1685_v31, %v1627_v40  ;;  %v3779_v40 = vmax.f32 %v3309_v56, %v3478_v9 }
 0x21c   : > { %v3583_v28 = vmax.f32 %v1343_v60, %v1780_v59 }
 0x220   : > { %v1611_v15 = vpop.f32.mrf.mxu0  ;;  %v1688_v33 = vpop.f32.mrf.mxu1 }
 0x221   : > { %v1762_v17 = vpop.f32.mrf.mxu2  ;;  %v3585_v45 = vpop.f32.mrf.mxu3  ;;  %v1628_v57 = vadd.f32 %v1611_v15, %v3536_v19  ;;  %v3781_v15 = vmax.f32 %v3317_v0, %v3492_v5 }
 0x222   : > { %v1781_v21 = vadd.f32 %v1762_v17, %v1704_v11  ;;  %v3780_v17 = vld [vmem:[#allocation3_spill] sm:$0xff] }
 0x223   : > { %v1705_v50 = vadd.f32 %v1688_v33, %v1628_v57  ;;  %2741 = vmatmul.msk.bf16.gmra.mxu0 %vm213_vm2, %v3272_v6  ;;  %2745 = vmatmul.msk.bf16.gmra.mxu1 %vm213_vm2, %v3428_v32  ;;  %v3775_v6 = vmax.f32 %v3275_v8, %v3436_v22 }
 0x224   : > { %v3592_v55 = vmax.f32 %v3774_v48, %v1781_v21 }
 0x226   : > { %2749 = vmatmul.msk.bf16.gmra.mxu2 %vm213_vm2, %v3433_v39  ;;  %2777 = vmatmul.msk.bf16.gmra.mxu3 %vm213_vm2, %v2844_v12 }
 0x228   : > { %v1613_v2 = vpop.f32.mrf.mxu0  ;;  %v1690_v30 = vpop.f32.mrf.mxu1 }
 0x229   : > { %v1765_v23 = vpop.f32.mrf.mxu2  ;;  %v3601_v29 = vpop.f32.mrf.mxu3  ;;  %v1629_v19 = vadd.f32 %v1613_v2, %v3539_v36 }
 0x22a   : > { %v1782_v60 = vadd.f32 %v1765_v23, %v1705_v50 }
 0x22b   : > { %v1706_v32 = vadd.f32 %v1690_v30, %v1629_v19 }
 0x22c   : > { %v3607_v18 = vmax.f32 %v3775_v6, %v1782_v60 }
 0x230   : > { %v1616_v24 = vpop.f32.mrf.mxu0  ;;  %v1693_v41 = vpop.f32.mrf.mxu1 }
 0x231   : > { %v1767_v4 = vpop.f32.mrf.mxu2  ;;  %v3609_v25 = vpop.f32.mrf.mxu3  ;;  %v1630_v49 = vadd.f32 %v1616_v24, %v3550_v53 }
 0x232   : > { %v1783_v39 = vadd.f32 %v1767_v4, %v1706_v32 }
 0x233   : > { %v1707_v36 = vadd.f32 %v1693_v41, %v1630_v49  ;;  %2742 = vmatmul.msk.bf16.gmra.mxu0 %vm213_vm2, %v3777_v63  ;;  %2746 = vmatmul.msk.bf16.gmra.mxu1 %vm213_vm2, %v3456_v38 }
 0x234   : > { %v3616_v37 = vmax.f32 %v3776_v34, %v1783_v39 }
 0x236   : > { %2750 = vmatmul.msk.bf16.gmra.mxu2 %vm213_vm2, %v3461_v61  ;;  %2778 = vmatmul.msk.bf16.gmra.mxu3 %vm213_vm2, %v2845_v58 }
 0x238   : > { %v1618_v13 = vpop.f32.mrf.mxu0  ;;  %v1695_v54 = vpop.f32.mrf.mxu1 }
 0x239   : > { %v1770_v8 = vpop.f32.mrf.mxu2  ;;  %v3625_v22 = vpop.f32.mrf.mxu3  ;;  %v1631_v44 = vadd.f32 %v1618_v13, %v3553_v51 }
 0x23a   : > { %v1784_v53 = vadd.f32 %v1770_v8, %v1707_v36 }
 0x23b   : > { %v1708_v38 = vadd.f32 %v1695_v54, %v1631_v44 }
 0x23c   : > { %v3631_v35 = vmax.f32 %v3778_v3, %v1784_v53 }
 0x240   : > { %v1621_v47 = vpop.f32.mrf.mxu0  ;;  %v1698_v59 = vpop.f32.mrf.mxu1 }
 0x241   : > { %v1772_v52 = vpop.f32.mrf.mxu2  ;;  %v3633_v7 = vpop.f32.mrf.mxu3  ;;  %v1632_v31 = vadd.f32 %v1621_v47, %v3564_v27 }
 0x242   : > { %v1785_v61 = vadd.f32 %v1772_v52, %v1708_v38 }
 0x243   : > { %v1709_v51 = vadd.f32 %v1698_v59, %v1632_v31  ;;  %2743 = vmatmul.msk.bf16.gmra.mxu0 %vm213_vm2, %v3780_v17  ;;  %2747 = vmatmul.msk.bf16.gmra.mxu1 %vm213_vm2, %v3484_v20 }
 0x244   : > { %v3640_v11 = vmax.f32 %v3779_v40, %v1785_v61 }
 0x246   : > { %2751 = vmatmul.msk.bf16.gmra.mxu2 %vm213_vm2, %v3489_v10  ;;  %2779 = vmatmul.msk.bf16.gmra.mxu3 %vm213_vm2, %v2846_v16 }
 0x248   : > { %v1623_v21 = vpop.f32.mrf.mxu0  ;;  %v1700_v56 = vpop.f32.mrf.mxu1 }
 0x249   : > { %v1775_v26 = vpop.f32.mrf.mxu2  ;;  %v3649_v43 = vpop.f32.mrf.mxu3  ;;  %v1633_v9 = vadd.f32 %v1623_v21, %v3568_v1 }
 0x24a   : > { %v1786_v27 = vadd.f32 %v1775_v26, %v1709_v51 }
 0x24b   : > { %v1710_v12 = vadd.f32 %v1700_v56, %v1633_v9 }
 0x24c   : > { %v3655_v33 = vmax.f32 %v3781_v15, %v1786_v27 }
 0x250   : > { %v1834_v48 = vpop.f32.mrf.mxu0  ;;  %v1863_v50 = vpop.f32.mrf.mxu1 }
 0x251   : > { %v1777_v20 = vpop.f32.mrf.mxu2  ;;  %v3657_v57 = vpop.f32.mrf.mxu3  ;;  %v1835_v54 = vadd.f32 %v1834_v48, %v3577_v62 }
 0x252   : > { %v1787_v10 = vadd.f32 %v1777_v20, %v1710_v12 }
 0x253   : > { %v1883_v61 = vadd.f32 %v1863_v50, %v1835_v54 }
 0x254   : > { %v3662_v23 = vmax.f32 %v1350_v46, %v1787_v10 }
 0x258   : > { %v1836_v1 = vpop.f32.mrf.mxu0  ;;  %v1865_v30 = vpop.f32.mrf.mxu1 }
 0x259   : > { %v1900_v60 = vpop.f32.mrf.mxu2  ;;  %v1937_v2 = vpop.f32.mrf.mxu3  ;;  %v1837_v59 = vadd.f32 %v1836_v1, %v3585_v45 }
 0x25a   : > { %v1920_v47 = vadd.f32 %v1900_v60, %v1883_v61  ;;  %v3702_v60 = vld [vmem:[%s3768_s2] ss:$0 sm:$0xff] }
 0x25b   : > { %v1884_v62 = vadd.f32 %v1865_v30, %v1837_v59 }
 0x25c   : > { %v1957_v40 = vadd.f32 %v1937_v2, %v1920_v47 }
 0x260   : > { %v1839_v5 = vpop.f32.mrf.mxu0  ;;  %v1868_v6 = vpop.f32.mrf.mxu1 }
 0x261   : > { %v1902_v19 = vpop.f32.mrf.mxu2  ;;  %v1939_v0 = vpop.f32.mrf.mxu3  ;;  %v1840_v21 = vadd.f32 %v1839_v5, %v3601_v29 }
 0x262   : > { %v1921_v27 = vadd.f32 %v1902_v19, %v1884_v62 }
 0x263   : > { %v1885_v48 = vadd.f32 %v1868_v6, %v1840_v21 }
 0x264   : > { %v1958_v12 = vadd.f32 %v1939_v0, %v1921_v27 }
 0x268   : > { %v1841_v39 = vpop.f32.mrf.mxu0  ;;  %v1870_v24 = vpop.f32.mrf.mxu1 }
 0x269   : > { %v1905_v32 = vpop.f32.mrf.mxu2  ;;  %v1942_v4 = vpop.f32.mrf.mxu3  ;;  %v1842_v29 = vadd.f32 %v1841_v39, %v3609_v25 }
 0x26a   : > { %v1922_v1 = vadd.f32 %v1905_v32, %v1885_v48 }
 0x26c   : > { %v1959_v61 = vadd.f32 %v1942_v4, %v1922_v1 }
 0x270   : > { %v1844_v49 = vpop.f32.mrf.mxu0  ;;  %v3666_v34 = vpop.f32.mrf.mxu1 }
 0x271   : > { %v1907_v41 = vpop.f32.mrf.mxu2  ;;  %v3664_v58 = vpop.f32.mrf.mxu3 }
 0x278   : > { %v3672_v46 = vpop.f32.mrf.mxu0  ;;  %v3674_v36 = vpop.f32.mrf.mxu1 }
 0x279   : > { %v3668_v14 = vpop.f32.mrf.mxu2  ;;  %v3670_v42 = vpop.f32.mrf.mxu3 }
 0x280   : > { %v3680_v53 = vpop.f32.mrf.mxu0  ;;  %v3682_v13 = vpop.f32.mrf.mxu1 }
 0x281   : > { %v3676_v63 = vpop.f32.mrf.mxu2  ;;  %v3678_v8 = vpop.f32.mrf.mxu3 }
 0x288   : > { %v3689_v38 = vpop.f32.mrf.mxu0  ;;  %v3691_v52 = vpop.f32.mrf.mxu1 }
 0x289   : > { %v3685_v44 = vpop.f32.mrf.mxu2  ;;  %v3687_v3 = vpop.f32.mrf.mxu3 }
 0x290   : > { %v1974_v51 = vpop.f32.mrf.mxu0  ;;  %v2011_v17 = vpop.f32.mrf.mxu1 }
 0x291   : > { %v3694_v16 = vpop.f32.mrf.mxu2  ;;  %v3696_v31 = vpop.f32.mrf.mxu3  ;;  %v1994_v26 = vadd.f32 %v1974_v51, %v1957_v40 }
 0x293   : > { %v2031_v56 = vadd.f32 %v2011_v17, %v1994_v26  ;;  %v1845_v17 = vadd.f32 %v1844_v49, %v3625_v22  ;;  %v1847_v49 = vadd.f32 %v3672_v46, %v3633_v7  ;;  %v1850_v46 = vadd.f32 %v3680_v53, %v3649_v43 }
 0x294   : > { %v1852_v53 = vadd.f32 %v3689_v38, %v3657_v57 }
 0x298   : > { %v1976_v10 = vpop.f32.mrf.mxu0  ;;  %v2013_v45 = vpop.f32.mrf.mxu1 }
 0x299   : > { %v2048_v9 = vpop.f32.mrf.mxu2  ;;  %v2125_v15 = vpop.f32.mrf.mxu3  ;;  %v1995_v2 = vadd.f32 %v1976_v10, %v1958_v12 }
 0x29a   : > { %v2068_v20 = vadd.f32 %v2048_v9, %v2031_v56 }
 0x29b   : > { %v2032_v0 = vadd.f32 %v2013_v45, %v1995_v2 }
 0x29c   : > { %v2145_v50 = vadd.f32 %v2125_v15, %v2068_v20 }
 0x29e   : > { %v2153_v30 = vmax.f32 %v3583_v28, %v2145_v50  ;;  %v1886_v28 = vadd.f32 %v1870_v24, %v1842_v29 }
 0x2a0   : > { %v2164_v19 = vadd.f32 %v3702_v60, %v2153_v30  ;;  %v1979_v59 = vpop.f32.mrf.mxu0  ;;  %v2016_v40 = vpop.f32.mrf.mxu1  ;;  %v1923_v51 = vadd.f32 %v1907_v41, %v1886_v28  ;;  %v1887_v41 = vadd.f32 %v3666_v34, %v1845_v17 }
 0x2a1   : > { %v2050_v5 = vpop.f32.mrf.mxu2  ;;  %v2127_v54 = vpop.f32.mrf.mxu3  ;;  %v1996_v39 = vadd.f32 %v1979_v59, %v1959_v61 }
 0x2a2   : > { %v2172_v6 = vmax.f32 %v2164_v19, 0.0  ;;  %v2069_v47 = vadd.f32 %v2050_v5, %v2032_v0  ;;  %v1960_v56 = vadd.f32 %v3664_v58, %v1923_v51 }
 0x2a3   : > { %v2033_v26 = vadd.f32 %v2016_v40, %v1996_v39 }
 0x2a4   : > { %v2180_v25 = vpack.c.bf16 %v2172_v6, %v2172_v6  ;;  %v2146_v32 = vadd.f32 %v2127_v54, %v2069_v47 }
 0x2a6   : > { %2189 = vst.msk [vmem:[%s3711_s16] sm:$0xf] %vm2188_vm3, %v2180_v25  ;;  %v2154_v4 = vmax.f32 %v3592_v55, %v2146_v32  ;;  %v1924_v55 = vadd.f32 %v3668_v14, %v1887_v41  ;;  %v1888_v14 = vadd.f32 %v3674_v36, %v1847_v49 }
 0x2a8   : > { %v2165_v62 = vadd.f32 %v3702_v60, %v2154_v4  ;;  %v1981_v15 = vpop.f32.mrf.mxu0  ;;  %v2018_v12 = vpop.f32.mrf.mxu1  ;;  %v1961_v34 = vadd.f32 %v3670_v42, %v1924_v55  ;;  %v1925_v54 = vadd.f32 %v3676_v63, %v1888_v14  ;;  %v1889_v63 = vadd.f32 %v3682_v13, %v1850_v46 }
 0x2a9   : > { %v2053_v27 = vpop.f32.mrf.mxu2  ;;  %v2130_v21 = vpop.f32.mrf.mxu3  ;;  %v1997_v45 = vadd.f32 %v1981_v15, %v1960_v56 }
 0x2aa   : > { %v2173_v9 = vmax.f32 %v2165_v62, 0.0  ;;  %v2070_v24 = vadd.f32 %v2053_v27, %v2033_v26  ;;  %v1962_v36 = vadd.f32 %v3678_v8, %v1925_v54  ;;  %v1926_v51 = vadd.f32 %v3685_v44, %v1889_v63 }
 0x2ab   : > { %v2034_v48 = vadd.f32 %v2018_v12, %v1997_v45  ;;  %v1890_v44 = vadd.f32 %v3691_v52, %v1852_v53 }
 0x2ac   : > { %v2181_v20 = vpack.c.bf16 %v2173_v9, %v2173_v9  ;;  %v2147_v10 = vadd.f32 %v2130_v21, %v2070_v24  ;;  %v1963_v13 = vadd.f32 %v3687_v3, %v1926_v51 }
 0x2ad   : > { %v1927_v15 = vadd.f32 %v3694_v16, %v1890_v44 }
 0x2ae   : > { %2190 = vst.msk [vmem:[%s3711_s16 + $0x4] sm:$0xf] %vm2188_vm3, %v2181_v20  ;;  %v2155_v22 = vmax.f32 %v3607_v18, %v2147_v10 }
 0x2af   : > { %v1964_v20 = vadd.f32 %v3696_v31, %v1927_v15 }
 0x2b0   : > { %v2166_v58 = vadd.f32 %v3702_v60, %v2155_v22  ;;  %v1984_v29 = vpop.f32.mrf.mxu0  ;;  %v2021_v19 = vpop.f32.mrf.mxu1 }
 0x2b1   : > { %v2055_v50 = vpop.f32.mrf.mxu2  ;;  %v2132_v2 = vpop.f32.mrf.mxu3  ;;  %v1998_v18 = vadd.f32 %v1984_v29, %v1961_v34 }
 0x2b2   : > { %v2174_v1 = vmax.f32 %v2166_v58, 0.0  ;;  %v2071_v30 = vadd.f32 %v2055_v50, %v2034_v48 }
 0x2b3   : > { %v2035_v61 = vadd.f32 %v2021_v19, %v1998_v18 }
 0x2b4   : > { %v2182_v0 = vpack.c.bf16 %v2174_v1, %v2174_v1  ;;  %v2148_v5 = vadd.f32 %v2132_v2, %v2071_v30 }
 0x2b6   : > { %2191 = vst.msk [vmem:[%s3711_s16 + $0x8] sm:$0xf] %vm2188_vm3, %v2182_v0  ;;  %v2156_v7 = vmax.f32 %v3616_v37, %v2148_v5 }
 0x2b8   : > { %v2167_v42 = vadd.f32 %v3702_v60, %v2156_v7  ;;  %v1986_v28 = vpop.f32.mrf.mxu0  ;;  %v2023_v25 = vpop.f32.mrf.mxu1 }
 0x2b9   : > { %v2058_v6 = vpop.f32.mrf.mxu2  ;;  %v2135_v47 = vpop.f32.mrf.mxu3  ;;  %v1999_v37 = vadd.f32 %v1986_v28, %v1962_v36 }
 0x2ba   : > { %v2175_v59 = vmax.f32 %v2167_v42, 0.0  ;;  %v2072_v40 = vadd.f32 %v2058_v6, %v2035_v61 }
 0x2bb   : > { %v2036_v4 = vadd.f32 %v2023_v25, %v1999_v37 }
 0x2bc   : > { %v2183_v32 = vpack.c.bf16 %v2175_v59, %v2175_v59  ;;  %v2149_v39 = vadd.f32 %v2135_v47, %v2072_v40 }
 0x2be   : > { %2192 = vst.msk [vmem:[%s3711_s16 + $0xc] sm:$0xf] %vm2188_vm3, %v2183_v32  ;;  %v2157_v43 = vmax.f32 %v3631_v35, %v2149_v39 }
 0x2c0   : > { %v2168_v8 = vadd.f32 %v3702_v60, %v2157_v43  ;;  %v1989_v21 = vpop.f32.mrf.mxu0  ;;  %v2026_v35 = vpop.f32.mrf.mxu1 }
 0x2c1   : > { %v2060_v17 = vpop.f32.mrf.mxu2  ;;  %v2137_v62 = vpop.f32.mrf.mxu3  ;;  %v2000_v24 = vadd.f32 %v1989_v21, %v1963_v13 }
 0x2c2   : > { %v2176_v26 = vmax.f32 %v2168_v8, 0.0  ;;  %v2073_v27 = vadd.f32 %v2060_v17, %v2036_v4 }
 0x2c3   : > { %v2037_v12 = vadd.f32 %v2026_v35, %v2000_v24 }
 0x2c4   : > { %v2184_v56 = vpack.c.bf16 %v2176_v26, %v2176_v26  ;;  %v2150_v9 = vadd.f32 %v2137_v62, %v2073_v27 }
 0x2c6   : > { %2193 = vst.msk [vmem:[%s3711_s16 + $0x10] sm:$0xf] %vm2188_vm3, %v2184_v56  ;;  %v2158_v57 = vmax.f32 %v3640_v11, %v2150_v9 }
 0x2c8   : > { %v2169_v38 = vadd.f32 %v3702_v60, %v2158_v57  ;;  %v1991_v45 = vpop.f32.mrf.mxu0  ;;  %v2028_v11 = vpop.f32.mrf.mxu1 }
 0x2c9   : > { %v2063_v3 = vpop.f32.mrf.mxu2  ;;  %v2140_v41 = vpop.f32.mrf.mxu3  ;;  %v2001_v49 = vadd.f32 %v1991_v45, %v1964_v20 }
 0x2ca   : > { %v2177_v10 = vmax.f32 %v2169_v38, 0.0  ;;  %v2074_v52 = vadd.f32 %v2063_v3, %v2037_v12 }
 0x2cb   : > { %v2038_v48 = vadd.f32 %v2028_v11, %v2001_v49 }
 0x2cc   : > { %v2185_v55 = vpack.c.bf16 %v2177_v10, %v2177_v10  ;;  %v2151_v22 = vadd.f32 %v2140_v41, %v2074_v52 }
 0x2ce   : > { %2194 = vst.msk [vmem:[%s3711_s16 + $0x14] sm:$0xf] %vm2188_vm3, %v2185_v55  ;;  %v2159_v16 = vmax.f32 %v3655_v33, %v2151_v22 }
 0x2d0   : > { %v2170_v58 = vadd.f32 %v3702_v60, %v2159_v16 }
 0x2d1   : > { %v2065_v50 = vpop.f32.mrf.mxu2  ;;  %v2142_v31 = vpop.f32.mrf.mxu3 }
 0x2d2   : > { %v2178_v2 = vmax.f32 %v2170_v58, 0.0  ;;  %v2075_v34 = vadd.f32 %v2065_v50, %v2038_v48 }
 0x2d4   : > { %v2186_v1 = vpack.c.bf16 %v2178_v2, %v2178_v2  ;;  %v2152_v30 = vadd.f32 %v2142_v31, %v2075_v34 }
 0x2d6   : > { %2195 = vst.msk [vmem:[%s3711_s16 + $0x18] sm:$0xf] %vm2188_vm3, %v2186_v1  ;;  %v2160_v29 = vmax.f32 %v3662_v23, %v2152_v30 }
 0x2d8   : > { %v2171_v19 = vadd.f32 %v3702_v60, %v2160_v29 }
 0x2da   : > { %v2179_v14 = vmax.f32 %v2171_v19, 0.0 }
 0x2dc   : > { %v2187_v0 = vpack.c.bf16 %v2179_v14, %v2179_v14 }
 0x2de   : > { %2196 = vst.msk [vmem:[%s3711_s16 + $0x1c] sm:$0xf] %vm2188_vm3, %v2187_v0 }
 0x2df PF: > { %s13_s12 = sadd.s32 1, %s2864_s12  }
 0x2e0   : > { %p10_p4 = scmp.ge.s32.totalorder %s13_s12, 4  }
 0x2e2   :  { %12 = sbr.rel (!%p10_p4) target bundleno = 1 (0x1), region = 77 }

// kernel: embedding_net_forward.4
= control target key start
LH: loop header
LB: loop body
LE: loop exit
PB: predicated region body
PF: predicated region fallthrough
CT: control target
= control target key end

     0   :  { %s1505_s12 = smov 0   ;;  %s1835_s0 = inlined_call_operand.vmem [shape: bf16[2,8,20,32], index: 0, kind: input, shape index: {}]   ;;  %s1836_s1 = inlined_call_operand.vmem [shape: bf16[9,32,64], index: 1, kind: input, shape index: {}]   ;;  %s1837_s2 = inlined_call_operand.vmem [shape: f32[1,64], index: 2, kind: input, shape index: {}]   ;;  %s1838_s3 = inlined_call_operand.vmem [shape: bf16[2,16,64], index: 3, kind: output, shape index: {}]  }
   0x1 LB: > { %s1183_s13 = sadd.s32 4294967295, %s1483_s12   ;;  %p1187_p0 = scmp.ge.s32.totalorder %s1483_s12, 1  ;;  %s1483_s12 = sphi %s1505_s12, %s13_s12  }
   0x2   : > { %p137_p1 = scmp.lt.s32.totalorder %s1483_s12, 3 }
   0x4   : > { %p138_p2 = pnand %p1187_p0, %p137_p1 }
   0x5   : > { %p161_p3 = scmp.lt.s32.totalorder (!%p138_p2), %s1183_s13, 1 }
   0x6   : > { %141 = sbr.rel (%p138_p2) target bundleno = 301 (0x12d), region = 32 }
   0xb   : > { %v1516_v0 = vld [vmem:[%s1836_s1 + $0x18] sm:$0xff]  ;;  %v1521_v1 = vld [vmem:[%s1836_s1 + $0x8] sm:$0xff]  ;;  %v1538_v4 = vld [vmem:[%s1836_s1 + $0x10] sm:$0xff]  ;;  %s1840_s13 = smov (!%p161_p3, %s1183_s13), 1  ;;  %vm204_vm0 = vcmask 261120   ;;  %vm448_vm1 = vcmask 1045504  }
   0xc   : > { %v1526_v2 = vld [vmem:[%s1836_s1 + $0x28] sm:$0xff]  ;;  %v1531_v3 = vld [vmem:[%s1836_s1 + $0x38] sm:$0xff]  ;;  %214 = vmatpush.bf16.msra.mxu0 %v1516_v0  ;;  %248 = vmatpush.bf16.msra.mxu1 %v1521_v1  ;;  %v1543_v5 = vld [vmem:[%s1836_s1] sm:$0xff]  ;;  %s1467_s30 = smul.u32 96, %s1840_s13  ;;  %s1432_s4 = sshll.u32 %s1840_s13, 3  ;;  %vm1125_vm2 = vcmask 519168  }
   0xd   : > { %290 = vmatpush.bf16.msra.mxu2 %v1526_v2  ;;  %334 = vmatpush.bf16.msra.mxu3 %v1531_v3  ;;  %v1552_v6 = vld [vmem:[%s1836_s1 + $0x20] sm:$0xff]  ;;  %v1557_v7 = vld [vmem:[%s1836_s1 + $0x30] sm:$0xff]  ;;  %v1563_v8 = vld [vmem:[%s1836_s1 + $0x68] sm:$0xff]  ;;  %s170_s7 = scalar_lea.vmem %s1838_s3, %s1432_s4 }
   0xe   : > { %v1568_v9 = vld [vmem:[%s1836_s1 + $0x48] sm:$0xff]  ;;  %s1575_s10 = scalar_lea.vmem %s1835_s0, %s1467_s30  ;;  %v1580_v10 = vld [vmem:[%s1836_s1 + $0x78] sm:$0xff]  ;;  %v1604_v16 = vld [vmem:[%s1836_s1 + $0x60] sm:$0xff] }
   0xf   : > { %v1585_v11 = vld [vmem:[%s1836_s1 + $0x58] sm:$0xff]  ;;  %v1433_v13 = vld [vmem:[%s1575_s10] sm:$0xff]  ;;  %v1594_v14 = vld [vmem:[%s1575_s10 + $0xc] sm:$0xff] }
  0x10   : > { %215 = vmatpush.bf16.msra.mxu0 %v1538_v4  ;;  %249 = vmatpush.bf16.msra.mxu1 %v1543_v5  ;;  %v1590_v12 = vld [vmem:[%s1575_s10 + $0x18] sm:$0xff]  ;;  %v1597_v15 = vld [vmem:[%s1575_s10 + $0x30] sm:$0xff]  ;;  %v1609_v17 = vld [vmem:[%s1836_s1 + $0x40] sm:$0xff] }
  0x11   : > { %291 = vmatpush.bf16.msra.mxu2 %v1552_v6  ;;  %335 = vmatpush.bf16.msra.mxu3 %v1557_v7  ;;  %v434_v18 = vld [vmem:[%s1575_s10 + $0x8] sm:$0x3]  ;;  %v1627_v20 = vld [vmem:[%s1836_s1 + $0x70] sm:$0xff]  ;;  %v1318_v21 = vld [vmem:[%s1575_s10 + $0x20] sm:$0x3] }
  0x12   : > { %v1618_v19 = vld [vmem:[%s1836_s1 + $0x88] sm:$0xff]  ;;  %v1635_v22 = vld [vmem:[%s1836_s1 + $0x50] sm:$0xff]  ;;  %v1305_v23 = vld [vmem:[%s1575_s10] sm:$0xc]  ;;  %v445_v25 = vunpack.c.l.b16 %v434_v18  ;;  %v496_v26 = vunpack.c.l.b16 %v1318_v21 }
  0x13   : > { %1209 = vmatmul.msk.bf16.vlgmr.msra.gmra.mxu0 %vm204_vm0, %v1590_v12  ;;  %1222 = vmatmul.msk.bf16.vlgmr.msra.gmra.mxu1 %vm204_vm0, %v1433_v13  ;;  %v1451_v24 = vld [vmem:[%s1575_s10] sm:$0xf0]  ;;  %v1325_v27 = vld [vmem:[%s1575_s10 + $0x18] sm:$0xc]  ;;  %v1454_v28 = vld [vmem:[%s1575_s10 + $0x18] sm:$0xf0] }
  0x14   : > { %378 = vmatpush.bf16.msrb.mxu0 %v1568_v9  ;;  %1241 = vmatmul.msk.bf16.vlgmr.msra.gmra.mxu2 %vm204_vm0, %v1594_v14  ;;  %v1648_v29 = vld [vmem:[%s1836_s1 + $0x80] sm:$0xff]  ;;  %v1306_v30 = vor.u32 %v1451_v24, %v1305_v23  ;;  %v447_v31 = vpack.c.b16 %v445_v25, %v445_v25  ;;  %v1326_v32 = vor.u32 %v1454_v28, %v1325_v27  ;;  %v1659_v38 = vld [vmem:[%s1575_s10 + $0x48] sm:$0xff]  ;;  %v1338_v42 = vld [vmem:[%s1575_s10 + $0x14] sm:$0x3] }
  0x15   : > { %473 = vmatpush.bf16.msrb.mxu2 %v1563_v8  ;;  %1260 = vmatmul.msk.bf16.vlgmr.msra.gmra.mxu3 %vm204_vm0, %v1597_v15  ;;  %v498_v33 = vpack.c.b16 %v496_v26, %v496_v26  ;;  %v1662_v39 = vld [vmem:[%s1575_s10 + $0x3c] sm:$0xff]  ;;  %v546_v43 = vunpack.c.l.b16 %v1338_v42  ;;  %v1345_v44 = vld [vmem:[%s1575_s10 + $0xc] sm:$0xc]  ;;  %v1457_v45 = vld [vmem:[%s1575_s10 + $0xc] sm:$0xf0] }
  0x16   : > { %523 = vmatpush.bf16.msrb.mxu3 %v1580_v10  ;;  %422 = vmatpush.bf16.msrb.mxu1 %v1585_v11  ;;  %v449_v34 = vrot.slane %v1306_v30, 2  ;;  %v450_v35 = vrot.slane %v447_v31, 2  ;;  %v499_v36 = vrot.slane %v1326_v32, 2  ;;  %v1346_v46 = vor.u32 %v1457_v45, %v1345_v44  ;;  %v1460_v51 = vld [vmem:[%s1575_s10 + $0x24] sm:$0xff]  ;;  %v1709_v52 = vld [vmem:[%s1575_s10 + $0x54] sm:$0xff] }
  0x17   : > { %v500_v37 = vrot.slane %v498_v33, 2  ;;  %v548_v47 = vpack.c.b16 %v546_v43, %v546_v43  ;;  %v1378_v53 = vld [vmem:[%s1575_s10 + $0x2c] sm:$0x3]  ;;  %v1381_v55 = vld [vmem:[%s1575_s10 + $0x24] sm:$0xc] }
  0x18   : > { %379 = vmatpush.bf16.msrb.mxu0 %v1609_v17  ;;  %v1665_v40 = vsel %vm448_vm1, %v449_v34, %v450_v35  ;;  %v549_v48 = vrot.slane %v1346_v46, 2  ;;  %v737_v54 = vunpack.c.l.b16 %v1378_v53  ;;  %v1462_v56 = vld [vmem:[%s1575_s10 + $0x24] sm:$0xf0]  ;;  %v1392_v62 = vld [vmem:[%s1575_s10 + $0x38] sm:$0x3] }
  0x19   : > { %474 = vmatpush.bf16.msrb.mxu2 %v1604_v16  ;;  %v1668_v41 = vsel %vm448_vm1, %v499_v36, %v500_v37  ;;  %v550_v49 = vrot.slane %v548_v47, 2  ;;  %v1382_v57 = vor.u32 %v1462_v56, %v1381_v55  ;;  %v1400_v63 = vld [vmem:[%s1575_s10 + $0x50] sm:$0x3]  ;;  %v1464_v18 = vld [vmem:[%s1575_s10 + $0x48] sm:$0xf0] }
  0x1a   : > { %524 = vmatpush.bf16.msrb.mxu3 %v1627_v20  ;;  %423 = vmatpush.bf16.msrb.mxu1 %v1635_v22  ;;  %v739_v58 = vpack.c.b16 %v737_v54, %v737_v54  ;;  %v897_v13 = vunpack.c.l.b16 %v1400_v63  ;;  %v1411_v23 = vld [vmem:[%s1575_s10 + $0x3c] sm:$0xc]  ;;  %v1465_v24 = vld [vmem:[%s1575_s10 + $0x3c] sm:$0xf0] }
  0x1b   : > { %v1690_v50 = vsel %vm448_vm1, %v549_v48, %v550_v49  ;;  %v740_v59 = vrot.slane %v1382_v57, 2  ;;  %v1412_v30 = vor.u32 %v1465_v24, %v1411_v23 }
  0x1c   : > { %573 = vmatpush.bf16.msra.mxu0 %v1618_v19  ;;  %v741_v60 = vrot.slane %v739_v58, 2  ;;  %v899_v28 = vpack.c.b16 %v897_v13, %v897_v13 }
  0x1d   : > { %603 = vmatpush.bf16.msra.mxu2 %v1521_v1  ;;  %v933_v33 = vrot.slane %v1412_v30, 2 }
  0x1e   : > { %628 = vmatpush.bf16.msra.mxu3 %v1526_v2  ;;  %589 = vmatpush.bf16.msra.mxu1 %v1516_v0  ;;  %v1731_v61 = vsel %vm448_vm1, %v740_v59, %v741_v60 }
  0x20   : > { %574 = vmatpush.bf16.msra.mxu0 %v1648_v29 }
  0x21   : > { %604 = vmatpush.bf16.msra.mxu2 %v1543_v5 }
  0x22   : > { %629 = vmatpush.bf16.msra.mxu3 %v1552_v6  ;;  %590 = vmatpush.bf16.msra.mxu1 %v1538_v4 }
  0x23   : > { %1279 = vmatmul.msk.bf16.vlgmr.msrb.gmra.mxu0 %vm204_vm0, %v1659_v38  ;;  %1298 = vmatmul.msk.bf16.vlgmr.msrb.gmra.mxu1 %vm204_vm0, %v1662_v39 }
  0x24   : > { %1315 = vmatmul.msk.bf16.vlgmr.msrb.gmra.mxu2 %vm204_vm0, %v1665_v40  ;;  %644 = vmatpush.bf16.msrb.mxu0 %v1531_v3 }
  0x25   : > { %1335 = vmatmul.msk.bf16.vlgmr.msrb.gmra.mxu3 %vm204_vm0, %v1668_v41  ;;  %687 = vmatpush.bf16.msrb.mxu2 %v1585_v11 }
  0x26   : > { %703 = vmatpush.bf16.msrb.mxu3 %v1563_v8  ;;  %660 = vmatpush.bf16.msrb.mxu1 %v1568_v9 }
  0x28   : > { %645 = vmatpush.bf16.msrb.mxu0 %v1557_v7 }
  0x29   : > { %688 = vmatpush.bf16.msrb.mxu2 %v1635_v22 }
  0x2a   : > { %704 = vmatpush.bf16.msrb.mxu3 %v1604_v16  ;;  %661 = vmatpush.bf16.msrb.mxu1 %v1609_v17 }
  0x33   : > { %1355 = vmatmul.msk.bf16.vlgmr.msra.gmra.mxu0 %vm204_vm0, %v1690_v50  ;;  %1356 = vmatmul.msk.bf16.vlgmr.msra.gmra.mxu1 %vm204_vm0, %v1594_v14  ;;  %v1463_v14 = vld [vmem:[%s1575_s10 + $0x30] sm:$0xf0] }
  0x34   : > { %1357 = vmatmul.msk.bf16.vlgmr.msra.gmra.mxu2 %vm204_vm0, %v1590_v12  ;;  %719 = vmatpush.bf16.msra.mxu0 %v1580_v10  ;;  %v1408_v12 = vld [vmem:[%s1575_s10 + $0x44] sm:$0x3] }
  0x35   : > { %1364 = vmatmul.msk.bf16.vlgmr.msra.gmra.mxu3 %vm204_vm0, %v1460_v51  ;;  %770 = vmatpush.bf16.msra.mxu2 %v1516_v0  ;;  %v930_v21 = vunpack.c.l.b16 %v1408_v12 }
  0x36   : > { %784 = vmatpush.bf16.msra.mxu3 %v1521_v1  ;;  %752 = vmatpush.bf16.msra.mxu1 %v1618_v19 }
  0x37   : > { %v932_v31 = vpack.c.b16 %v930_v21, %v930_v21 }
  0x38   : > { %720 = vmatpush.bf16.msra.mxu0 %v1627_v20 }
  0x39   : > { %771 = vmatpush.bf16.msra.mxu2 %v1538_v4 }
  0x3a   : > { %785 = vmatpush.bf16.msra.mxu3 %v1543_v5  ;;  %753 = vmatpush.bf16.msra.mxu1 %v1648_v29 }
  0x43   : > { %1365 = vmatmul.msk.bf16.vlgmr.msrb.gmra.mxu0 %vm204_vm0, %v1659_v38  ;;  %1366 = vmatmul.msk.bf16.vlgmr.msrb.gmra.mxu1 %vm204_vm0, %v1662_v39 }
  0x44   : > { %1373 = vmatmul.msk.bf16.vlgmr.msrb.gmra.mxu2 %vm204_vm0, %v1709_v52  ;;  %798 = vmatpush.bf16.msrb.mxu0 %v1526_v2 }
  0x45   : > { %1374 = vmatmul.msk.bf16.vlgmr.msrb.gmra.mxu3 %vm204_vm0, %v1668_v41  ;;  %830 = vmatpush.bf16.msrb.mxu2 %v1568_v9 }
  0x46   : > { %846 = vmatpush.bf16.msrb.mxu3 %v1585_v11  ;;  %814 = vmatpush.bf16.msrb.mxu1 %v1531_v3 }
  0x48   : > { %799 = vmatpush.bf16.msrb.mxu0 %v1552_v6 }
  0x49   : > { %831 = vmatpush.bf16.msrb.mxu2 %v1609_v17 }
  0x4a   : > { %847 = vmatpush.bf16.msrb.mxu3 %v1635_v22  ;;  %815 = vmatpush.bf16.msrb.mxu1 %v1557_v7 }
  0x53   : > { %1375 = vmatmul.msk.bf16.vlgmr.msra.gmra.mxu0 %vm204_vm0, %v1690_v50  ;;  %1383 = vmatmul.msk.bf16.vlgmr.msra.gmra.mxu1 %vm204_vm0, %v1731_v61 }
  0x54   : > { %1384 = vmatmul.msk.bf16.vlgmr.msra.gmra.mxu2 %vm204_vm0, %v1659_v38  ;;  %879 = vmatpush.bf16.msra.mxu0 %v1563_v8 }
  0x55   : > { %1385 = vmatmul.msk.bf16.vlgmr.msra.gmra.mxu3 %vm204_vm0, %v1597_v15  ;;  %945 = vmatpush.bf16.msra.mxu2 %v1618_v19  ;;  %v1403_v15 = vld [vmem:[%s1575_s10 + $0x48] sm:$0xc] }
  0x56   : > { %963 = vmatpush.bf16.msra.mxu3 %v1516_v0  ;;  %912 = vmatpush.bf16.msra.mxu1 %v1580_v10  ;;  %v1395_v0 = vld [vmem:[%s1575_s10 + $0x30] sm:$0xc]  ;;  %v1404_v27 = vor.u32 %v1464_v18, %v1403_v15 }
  0x57   : > { %v1396_v25 = vor.u32 %v1463_v14, %v1395_v0 }
  0x58   : > { %880 = vmatpush.bf16.msra.mxu0 %v1604_v16  ;;  %v900_v32 = vrot.slane %v1404_v27, 2 }
  0x59   : > { %946 = vmatpush.bf16.msra.mxu2 %v1648_v29 }
  0x5a   : > { %964 = vmatpush.bf16.msra.mxu3 %v1538_v4  ;;  %913 = vmatpush.bf16.msra.mxu1 %v1627_v20  ;;  %v864_v4 = vunpack.c.l.b16 %v1392_v62 }
  0x5c   : > { %v866_v26 = vpack.c.b16 %v864_v4, %v864_v4 }
  0x63   : > { %1386 = vmatmul.msk.bf16.vlgmr.msrb.gmra.mxu0 %vm204_vm0, %v1662_v39  ;;  %1387 = vmatmul.msk.bf16.vlgmr.msrb.gmra.mxu1 %vm204_vm0, %v1665_v40 }
  0x64   : > { %1388 = vmatmul.msk.bf16.vlgmr.msrb.gmra.mxu2 %vm204_vm0, %v1668_v41  ;;  %977 = vmatpush.bf16.msrb.mxu0 %v1521_v1  ;;  %v867_v1 = vrot.slane %v1396_v25, 2 }
  0x65   : > { %1389 = vmatmul.msk.bf16.vlgmr.msrb.gmra.mxu3 %vm204_vm0, %v1690_v50  ;;  %1007 = vmatpush.bf16.msrb.mxu2 %v1531_v3  ;;  %v868_v3 = vrot.slane %v866_v26, 2 }
  0x66   : > { %1023 = vmatpush.bf16.msrb.mxu3 %v1568_v9  ;;  %991 = vmatpush.bf16.msrb.mxu1 %v1526_v2  ;;  %v901_v9 = vrot.slane %v899_v28, 2  ;;  %v934_v2 = vrot.slane %v932_v31, 2 }
  0x67   : > { %v869_v34 = vsel %vm448_vm1, %v867_v1, %v868_v3 }
  0x68   : > { %978 = vmatpush.bf16.msrb.mxu0 %v1543_v5  ;;  %v902_v35 = vsel %vm448_vm1, %v900_v32, %v901_v9  ;;  %v935_v36 = vsel %vm448_vm1, %v933_v33, %v934_v2  ;;  %v1424_v5 = vld [vmem:[%s1575_s10 + $0x5c] sm:$0x3] }
  0x69   : > { %1008 = vmatpush.bf16.msrb.mxu2 %v1557_v7  ;;  %v1427_v7 = vld [vmem:[%s1575_s10 + $0x54] sm:$0xc] }
  0x6a   : > { %1024 = vmatpush.bf16.msrb.mxu3 %v1609_v17  ;;  %992 = vmatpush.bf16.msrb.mxu1 %v1552_v6  ;;  %v1089_v6 = vunpack.c.l.b16 %v1424_v5 }
  0x73   : > { %1397 = vmatmul.msk.bf16.vlgmr.msra.gmra.mxu0 %vm204_vm0, %v869_v34  ;;  %1405 = vmatmul.msk.bf16.vlgmr.msra.gmra.mxu1 %vm204_vm0, %v902_v35 }
  0x74   : > { %1413 = vmatmul.msk.bf16.vlgmr.msra.gmra.mxu2 %vm204_vm0, %v935_v36  ;;  %1039 = vmatpush.bf16.msra.mxu0 %v1585_v11  ;;  %v1091_v11 = vpack.c.b16 %v1089_v6, %v1089_v6 }
  0x75   : > { %1414 = vmatmul.msk.bf16.vlgmr.msra.gmra.mxu3 %vm204_vm0, %v1662_v39  ;;  %1071 = vmatpush.bf16.msra.mxu2 %v1580_v10 }
  0x76   : > { %1104 = vmatpush.bf16.msra.mxu3 %v1618_v19  ;;  %1055 = vmatpush.bf16.msra.mxu1 %v1563_v8  ;;  %v1466_v8 = vld [vmem:[%s1575_s10 + $0x54] sm:$0xf0] }
  0x77   : > { %v1428_v10 = vor.u32 %v1466_v8, %v1427_v7 }
  0x78   : > { %1040 = vmatpush.bf16.msra.mxu0 %v1635_v22 }
  0x79   : > { %1072 = vmatpush.bf16.msra.mxu2 %v1627_v20  ;;  %v1092_v17 = vrot.slane %v1428_v10, 2 }
  0x7a   : > { %1105 = vmatpush.bf16.msra.mxu3 %v1648_v29  ;;  %1056 = vmatpush.bf16.msra.mxu1 %v1604_v16  ;;  %v1093_v16 = vrot.slane %v1091_v11, 2 }
  0x7c   : > { %v1094_v29 = vsel %vm448_vm1, %v1092_v17, %v1093_v16 }
  0x83   : > { %1415 = vmatmul.msk.bf16.vlgmr.msrb.gmra.mxu0 %vm204_vm0, %v1659_v38  ;;  %1416 = vmatmul.msk.bf16.vlgmr.msrb.gmra.mxu1 %vm204_vm0, %v1709_v52 }
  0x84   : > { %1417 = vmatmul.msk.bf16.vlgmr.msrb.gmra.mxu2 %vm204_vm0, %v1668_v41 }
  0x85   : > { %1418 = vmatmul.msk.bf16.vlgmr.msrb.gmra.mxu3 %vm204_vm0, %v1690_v50 }
  0x90   : > { %v217_v19 = vpop.f32.mrf.mxu0  ;;  %v251_v20 = vpop.f32.mrf.mxu1 }
  0x91   : > { %v252_v22 = vadd.f32 %v251_v20, %v217_v19 }
  0x93   : > { %1419 = vmatmul.msk.bf16.vlgmr.msra.gmra.mxu0 %vm204_vm0, %v1731_v61  ;;  %1420 = vmatmul.msk.bf16.vlgmr.msra.gmra.mxu1 %vm204_vm0, %v902_v35 }
  0x94   : > { %1421 = vmatmul.msk.bf16.vlgmr.msra.gmra.mxu2 %vm204_vm0, %v935_v36 }
  0x95   : > { %1429 = vmatmul.msk.bf16.vlgmr.msra.gmra.mxu3 %vm204_vm0, %v1094_v29 }
  0x97   : > { %v293_v37 = vpop.f32.mrf.mxu2 }
  0x98   : > { %v337_v38 = vpop.f32.mrf.mxu3  ;;  %v298_v39 = vadd.f32 %v293_v37, %v252_v22  ;;  %v219_v40 = vpop.f32.mrf.mxu0 }
  0x99   : > { %v253_v41 = vpop.f32.mrf.mxu1 }
  0x9a   : > { %v254_v42 = vadd.f32 %v253_v41, %v219_v40  ;;  %v342_v43 = vadd.f32 %v337_v38, %v298_v39 }
  0x9f   : > { %v295_v44 = vpop.f32.mrf.mxu2 }
  0xa0   : > { %v339_v45 = vpop.f32.mrf.mxu3  ;;  %v299_v46 = vadd.f32 %v295_v44, %v254_v42  ;;  %v381_v47 = vpop.f32.mrf.mxu0 }
  0xa1   : > { %v425_v48 = vpop.f32.mrf.mxu1  ;;  %v386_v49 = vadd.f32 %v381_v47, %v342_v43 }
  0xa2   : > { %v343_v50 = vadd.f32 %v339_v45, %v299_v46 }
  0xa3   : > { %v430_v51 = vadd.f32 %v425_v48, %v386_v49 }
  0xa7   : > { %v476_v52 = vpop.f32.mrf.mxu2 }
  0xa8   : > { %v526_v53 = vpop.f32.mrf.mxu3  ;;  %v481_v54 = vadd.f32 %v476_v52, %v430_v51  ;;  %v383_v55 = vpop.f32.mrf.mxu0 }
  0xa9   : > { %v427_v56 = vpop.f32.mrf.mxu1  ;;  %v387_v57 = vadd.f32 %v383_v55, %v343_v50 }
  0xaa   : > { %v531_v58 = vadd.f32 %v526_v53, %v481_v54 }
  0xab   : > { %v431_v59 = vadd.f32 %v427_v56, %v387_v57 }
  0xaf   : > { %v478_v60 = vpop.f32.mrf.mxu2 }
  0xb0   : > { %v528_v61 = vpop.f32.mrf.mxu3  ;;  %v482_v62 = vadd.f32 %v478_v60, %v431_v59  ;;  %v576_v63 = vpop.f32.mrf.mxu0 }
  0xb1   : > { %v592_v12 = vpop.f32.mrf.mxu1  ;;  %v1807_v0 = vadd.f32 %v576_v63, %v531_v58 }
  0xb2   : > { %v532_v4 = vadd.f32 %v528_v61, %v482_v62 }
  0xb7   : > { %v606_v13 = vpop.f32.mrf.mxu2 }
  0xb8   : > { %v631_v14 = vpop.f32.mrf.mxu3  ;;  %v607_v15 = vadd.f32 %v606_v13, %v592_v12  ;;  %v578_v18 = vpop.f32.mrf.mxu0 }
  0xb9   : > { %v594_v21 = vpop.f32.mrf.mxu1  ;;  %v1809_v23 = vadd.f32 %v578_v18, %v532_v4 }
  0xba   : > { %v636_v24 = vadd.f32 %v631_v14, %v607_v15 }
  0xbf   : > { %v608_v25 = vpop.f32.mrf.mxu2 }
  0xc0   : > { %v633_v26 = vpop.f32.mrf.mxu3  ;;  %v609_v27 = vadd.f32 %v608_v25, %v594_v21  ;;  %v647_v28 = vpop.f32.mrf.mxu0 }
  0xc1   : > { %v663_v30 = vpop.f32.mrf.mxu1  ;;  %v652_v31 = vadd.f32 %v647_v28, %v636_v24 }
  0xc2   : > { %v637_v1 = vadd.f32 %v633_v26, %v609_v27 }
  0xc3   : > { %v668_v3 = vadd.f32 %v663_v30, %v652_v31 }
  0xc7   : > { %v690_v32 = vpop.f32.mrf.mxu2 }
  0xc8   : > { %v706_v9 = vpop.f32.mrf.mxu3  ;;  %v695_v33 = vadd.f32 %v690_v32, %v668_v3  ;;  %v649_v2 = vpop.f32.mrf.mxu0 }
  0xc9   : > { %v665_v34 = vpop.f32.mrf.mxu1  ;;  %v653_v35 = vadd.f32 %v649_v2, %v637_v1 }
  0xca   : > { %v711_v36 = vadd.f32 %v706_v9, %v695_v33 }
  0xcb   : > { %v669_v5 = vadd.f32 %v665_v34, %v653_v35 }
  0xcf   : > { %v692_v6 = vpop.f32.mrf.mxu2 }
  0xd0   : > { %v708_v7 = vpop.f32.mrf.mxu3  ;;  %v696_v8 = vadd.f32 %v692_v6, %v669_v5  ;;  %v722_v10 = vpop.f32.mrf.mxu0 }
  0xd1   : > { %v755_v11 = vpop.f32.mrf.mxu1  ;;  %v727_v17 = vadd.f32 %v722_v10, %v711_v36 }
  0xd2   : > { %v712_v16 = vadd.f32 %v708_v7, %v696_v8 }
  0xd3   : > { %v1811_v19 = vadd.f32 %v755_v11, %v727_v17 }
  0xd5   : > { %v762_v20 = vmax.f32 %v1807_v0, %v1811_v19 }
  0xd7   : > { %v773_v22 = vpop.f32.mrf.mxu2 }
  0xd8   : > { %v787_v29 = vpop.f32.mrf.mxu3  ;;  %v724_v37 = vpop.f32.mrf.mxu0 }
  0xd9   : > { %v757_v38 = vpop.f32.mrf.mxu1  ;;  %v728_v39 = vadd.f32 %v724_v37, %v712_v16  ;;  %v788_v62 = vadd.f32 %v787_v29, %v773_v22 }
  0xdb   : > { %v1815_v40 = vadd.f32 %v757_v38, %v728_v39 }
  0xdd   : > { %v763_v41 = vmax.f32 %v1809_v23, %v1815_v40 }
  0xdf   : > { %v775_v42 = vpop.f32.mrf.mxu2 }
  0xe0   : > { %v789_v43 = vpop.f32.mrf.mxu3  ;;  %v801_v44 = vpop.f32.mrf.mxu0 }
  0xe1   : > { %v817_v45 = vpop.f32.mrf.mxu1  ;;  %v806_v63 = vadd.f32 %v801_v44, %v788_v62  ;;  %v790_v21 = vadd.f32 %v789_v43, %v775_v42  ;;  %v1476_v42 = vld [vmem:[%s1837_s2] ss:$0 sm:$0xff] }
  0xe3   : > { %v822_v14 = vadd.f32 %v817_v45, %v806_v63 }
  0xe7   : > { %v833_v46 = vpop.f32.mrf.mxu2 }
  0xe8   : > { %v849_v47 = vpop.f32.mrf.mxu3  ;;  %v803_v48 = vpop.f32.mrf.mxu0  ;;  %v838_v24 = vadd.f32 %v833_v46, %v822_v14 }
  0xe9   : > { %v819_v49 = vpop.f32.mrf.mxu1  ;;  %v807_v26 = vadd.f32 %v803_v48, %v790_v21 }
  0xea   : > { %v854_v28 = vadd.f32 %v849_v47, %v838_v24 }
  0xeb   : > { %v823_v3 = vadd.f32 %v819_v49, %v807_v26 }
  0xef   : > { %v835_v50 = vpop.f32.mrf.mxu2 }
  0xf0   : > { %v851_v51 = vpop.f32.mrf.mxu3  ;;  %v882_v52 = vpop.f32.mrf.mxu0  ;;  %v839_v2 = vadd.f32 %v835_v50, %v823_v3 }
  0xf1   : > { %v915_v53 = vpop.f32.mrf.mxu1  ;;  %v887_v32 = vadd.f32 %v882_v52, %v854_v28 }
  0xf2   : > { %v855_v7 = vadd.f32 %v851_v51, %v839_v2 }
  0xf3   : > { %v920_v5 = vadd.f32 %v915_v53, %v887_v32 }
  0xf7   : > { %v948_v54 = vpop.f32.mrf.mxu2 }
  0xf8   : > { %v966_v55 = vpop.f32.mrf.mxu3  ;;  %v884_v56 = vpop.f32.mrf.mxu0  ;;  %v953_v8 = vadd.f32 %v948_v54, %v920_v5 }
  0xf9   : > { %v917_v57 = vpop.f32.mrf.mxu1  ;;  %v888_v16 = vadd.f32 %v884_v56, %v855_v7 }
  0xfa   : > { %v955_v38 = vmax.f32 %v762_v20, %v953_v8 }
  0xfb   : > { %v921_v44 = vadd.f32 %v917_v57, %v888_v16 }
  0xff   : > { %v950_v58 = vpop.f32.mrf.mxu2 }
 0x100   : > { %v968_v59 = vpop.f32.mrf.mxu3  ;;  %v980_v60 = vpop.f32.mrf.mxu0  ;;  %v954_v47 = vadd.f32 %v950_v58, %v921_v44 }
 0x101   : > { %v994_v61 = vpop.f32.mrf.mxu1  ;;  %v981_v12 = vadd.f32 %v980_v60, %v966_v55 }
 0x102   : > { %v956_v19 = vmax.f32 %v763_v41, %v954_v47 }
 0x103   : > { %v999_v25 = vadd.f32 %v994_v61, %v981_v12 }
 0x107   : > { %v1010_v4 = vpop.f32.mrf.mxu2 }
 0x108   : > { %v1026_v13 = vpop.f32.mrf.mxu3  ;;  %v982_v15 = vpop.f32.mrf.mxu0  ;;  %v1015_v27 = vadd.f32 %v1010_v4, %v999_v25 }
 0x109   : > { %v996_v18 = vpop.f32.mrf.mxu1  ;;  %v983_v30 = vadd.f32 %v982_v15, %v968_v59 }
 0x10a   : > { %v1031_v9 = vadd.f32 %v1026_v13, %v1015_v27 }
 0x10b   : > { %v1000_v34 = vadd.f32 %v996_v18, %v983_v30 }
 0x10f   : > { %v1012_v31 = vpop.f32.mrf.mxu2 }
 0x110   : > { %v1028_v1 = vpop.f32.mrf.mxu3  ;;  %v1042_v33 = vpop.f32.mrf.mxu0  ;;  %v1016_v6 = vadd.f32 %v1012_v31, %v1000_v34 }
 0x111   : > { %v1047_v35 = vadd.f32 %v1042_v33, %v1031_v9  ;;  %v1058_v36 = vpop.f32.mrf.mxu1 }
 0x112   : > { %v1032_v22 = vadd.f32 %v1028_v1, %v1016_v6 }
 0x113   : > { %v1063_v10 = vadd.f32 %v1058_v36, %v1047_v35 }
 0x117   : > { %v1074_v11 = vpop.f32.mrf.mxu2 }
 0x118   : > { %v1107_v17 = vpop.f32.mrf.mxu3  ;;  %v1079_v29 = vadd.f32 %v1074_v11, %v1063_v10  ;;  %v1044_v37 = vpop.f32.mrf.mxu0 }
 0x119   : > { %v1048_v43 = vadd.f32 %v1044_v37, %v1032_v22  ;;  %v1060_v46 = vpop.f32.mrf.mxu1 }
 0x11a   : > { %v1112_v39 = vadd.f32 %v1107_v17, %v1079_v29 }
 0x11b   : > { %v1064_v49 = vadd.f32 %v1060_v46, %v1048_v43 }
 0x11c   : > { %v1114_v45 = vmax.f32 %v955_v38, %v1112_v39 }
 0x11e   : > { %v1119_v48 = vadd.f32 %v1476_v42, %v1114_v45 }
 0x11f   : > { %v1076_v50 = vpop.f32.mrf.mxu2 }
 0x120   : > { %v1121_v51 = vmax.f32 %v1119_v48, 0.0  ;;  %v1080_v52 = vadd.f32 %v1076_v50, %v1064_v49  ;;  %v1109_v0 = vpop.f32.mrf.mxu3 }
 0x122   : > { %v1123_v20 = vpack.c.bf16 %v1121_v51, %v1121_v51  ;;  %v1113_v53 = vadd.f32 %v1109_v0, %v1080_v52 }
 0x124   : > { %1126 = vst.msk [vmem:[%s170_s7] sm:$0xf] %vm1125_vm2, %v1123_v20  ;;  %v1115_v54 = vmax.f32 %v956_v19, %v1113_v53 }
 0x126   : > { %v1120_v55 = vadd.f32 %v1476_v42, %v1115_v54 }
 0x128   : > { %v1122_v56 = vmax.f32 %v1120_v55, 0.0 }
 0x12a   : > { %v1124_v57 = vpack.c.bf16 %v1122_v56, %v1122_v56 }
 0x12c   : > { %1127 = vst.msk [vmem:[%s170_s7 + $0x4] sm:$0xf] %vm1125_vm2, %v1124_v57 }
 0x12d PF: > { %s13_s12 = sadd.s32 1, %s1483_s12  }
 0x12e   : > { %p10_p4 = scmp.ge.s32.totalorder %s13_s12, 4  }
 0x130   :  { %12 = sbr.rel (!%p10_p4) target bundleno = 1 (0x1), region = 77 }

// kernel: embedding_net_forward.5
= control target key start
LH: loop header
LB: loop body
LE: loop exit
PB: predicated region body
PF: predicated region fallthrough
CT: control target
= control target key end

     0   :  { %10 = vsyncpa [#allocation3], 0  ;;  %s1638_s0 = inlined_call_operand.vmem [shape: bf16[2,3,24,64], index: 0, kind: input, shape index: {}]   ;;  %s1639_s1 = inlined_call_operand.vmem [shape: bf16[9,64,128], index: 1, kind: input, shape index: {}]   ;;  %s1640_s2 = inlined_call_operand.vmem [shape: f32[1,128], index: 2, kind: input, shape index: {}]   ;;  %s1641_s3 = inlined_call_operand.vmem [shape: f32[128,64], index: 3, kind: input, shape index: {}]   ;;  %s1642_s4 = inlined_call_operand.vmem [shape: f32[1,64], index: 4, kind: input, shape index: {}]   ;;  %s1643_s5 = inlined_call_operand.hbm [shape: f32[2,1,64], index: 5, kind: output, shape index: {}]  }
   0x1   :  { %12 = vsyncpa [#allocation3 + $0x1], 0  ;;  %s1354_s18 = smov 0   ;;  %s1356_s19 = smov 0  }
   0x2   :  { %s1358_s20 = smov 0   ;;  %s1360_s21 = smov 0  }
   0x3 LB: > { %s1375_s22 = sadd.s32 4294967295, %s1321_s21   ;;  %s911_s23 = sadd.s32 4294967294, %s1321_s21   ;;  %s1321_s21 = sphi %s1360_s21, %s1649_s21   ;;  %s1317_s20 = sphi %s1358_s20, %s1648_s20   ;;  %s1313_s19 = sphi %s1356_s19, %s1647_s19   ;;  %s1309_s18 = sphi %s1354_s18, %s1646_s18  }
   0x4   : > { %s1379_s24 = sadd.s32 1, %s1321_s21   ;;  %s135_s25 = sadd.s32 1, %s1317_s20 }
   0x5   : > { %s132_s26 = ssub.s32 %s1321_s21, %s1379_s24  ;;  %p145_p0 = scmp.ne.s32.totalorder %s1317_s20, %s1313_s19 }
   0x6   : > { %p133_p1 = scmp.eq.s32.totalorder %s132_s26, 0  ;;  %p146_p2 = scmp.eq.s32.totalorder %s1375_s22, 1 }
   0x7   : > { %p151_p3 = scmp.ne.s32.totalorder %s1313_s19, %s1309_s18  ;;  %p152_p4 = scmp.eq.s32.totalorder %s911_s23, 1 }
   0x8   : > { %s1390_s27 = scalar_select %p133_p1, %s1317_s20, %s135_s25  }
   0x9   : > { %p1392_p5 = por %p146_p2, %p145_p0  ;;  %p1396_p6 = por %p152_p4, %p151_p3 }
   0xa   : > { %p914_p7 = scmp.ge.s32.totalorder %s1321_s21, 1  ;;  %p190_p8 = scmp.lt.s32.totalorder %s1321_s21, 3 }
   0xc   : > { %p191_p9 = pnand %p914_p7, %p190_p8 }
   0xd   : > { %p217_p10 = scmp.lt.s32.totalorder (!%p191_p9), %s1375_s22, 1  ;;  %s215_s8 = sand.u32 (!%p191_p9), 1, %s1313_s19  }
   0xe   : > { %194 = sbr.rel (%p191_p9) target bundleno = 505 (0x1f9), region = 40  ;;  %s852_s12 = scalar_lea.hbm (!%p191_p9), %s1643_s5, %s1375_s22 }
   0xf   : > { %s216_s13 = scalar_lea.vmem (!%p191_p9), [#allocation2], %s215_s8  ;;  %s844_s16 = scalar_lea.sflag (!%p191_p9), [#allocation3], %s215_s8 }
  0x10   : > { %s854_s14 = sshll.u32 (!%p191_p9), %s216_s13, 4  ;;  %s1264_s25 = scalar_lea.hbm (!%p191_p9), %s1643_s5, 2  ;;  %s855_s14 = int_to_ptr.vmem [resolvable:$true] %s854_s14 }
  0x13   : > { %v1163_v0 = vld [vmem:[%s1639_s1 + $0x18] sm:$0xff]  ;;  %v1162_v2 = vld [vmem:[%s1639_s1 + $0x10] sm:$0xff]  ;;  %s218_s15 = scalar_select %p217_p10, %s1375_s22, 1  ;;  %v1161_v6 = vld [vmem:[%s1639_s1 + $0x8] sm:$0xff]  ;;  %vm274_vm0 = vcmask 523264   ;;  %vm418_vm1 = vcmask 1045504  }
  0x14   : > { %v1168_v1 = vld [vmem:[%s1639_s1 + $0x38] sm:$0xff]  ;;  %328 = vmatpush.bf16.msra.mxu2 %v1163_v0  ;;  %v1167_v3 = vld [vmem:[%s1639_s1 + $0x30] sm:$0xff]  ;;  %v1166_v7 = vld [vmem:[%s1639_s1 + $0x28] sm:$0xff]  ;;  %vm826_vm3 = vcmask 516096  }
  0x15   : > { %282 = vmatpush.bf16.msra.mxu0 %v1168_v1  ;;  %v1177_v4 = vld [vmem:[%s1639_s1 + $0x78] sm:$0xff]  ;;  %v1176_v5 = vld [vmem:[%s1639_s1 + $0x70] sm:$0xff]  ;;  %s1198_s23 = smul.u32 36, %s218_s15  ;;  %v1175_v10 = vld [vmem:[%s1639_s1 + $0x68] sm:$0xff]  ;;  %s856_s15 = sshll.u32 %s852_s12, 4  ;;  %s857_s15 = int_to_ptr.hbm [resolvable:$true] %s856_s15 }
  0x16   : > { %453 = vmatpush.bf16.msra.mxu3 %v1177_v4  ;;  %v1185_v8 = vld [vmem:[%s1639_s1 + $0xb8] sm:$0xff]  ;;  %v1160_v15 = vld [vmem:[%s1639_s1] sm:$0xff]  ;;  %v1184_v17 = vld [vmem:[%s1639_s1 + $0xb0] sm:$0xff] }
  0x17   : > { %s1431_s9 = scalar_lea.vmem %s1638_s0, %s1198_s23  ;;  %585 = vmatpush.bf16.msra.mxu1 %v1185_v8  ;;  %v1165_v16 = vld [vmem:[%s1639_s1 + $0x20] sm:$0xff]  ;;  %v1173_v18 = vld [vmem:[%s1639_s1 + $0x58] sm:$0xff]  ;;  %v1183_v23 = vld [vmem:[%s1639_s1 + $0xa8] sm:$0xff] }
  0x18   : > { %329 = vmatpush.bf16.msra.mxu2 %v1162_v2  ;;  %v1294_v9 = vld [vmem:[%s1431_s9] sm:$0xc]  ;;  %v1441_v11 = vld [vmem:[%s1431_s9 + $0x4] sm:$0xff]   ;;  %v1181_v19 = vld [vmem:[%s1639_s1 + $0x98] sm:$0xff] }
  0x19   : > { %283 = vmatpush.bf16.msra.mxu0 %v1167_v3  ;;  %v1304_v12 = vld [vmem:[%s1431_s9] sm:$0xf0]   ;;  %v400_v13 = vld [vmem:[%s1431_s9 + $0x8] sm:$0x3]  ;;  %v1164_v25 = vld [vmem:[%s1431_s9 + $0xc] sm:$0xff] }
  0x1a   : > { %454 = vmatpush.bf16.msra.mxu3 %v1176_v5  ;;  %v415_v14 = vunpack.c.l.b16 %v400_v13  ;;  %v1295_v20 = vor.u32 %v1304_v12, %v1294_v9  ;;  %v1174_v22 = vld [vmem:[%s1639_s1 + $0x60] sm:$0xff]  ;;  %v1172_v26 = vld [vmem:[%s1639_s1 + $0x50] sm:$0xff]  ;;  %v1193_v30 = vld [vmem:[%s1639_s1 + $0xf8] sm:$0xff] }
  0x1b   : > { %586 = vmatpush.bf16.msra.mxu1 %v1184_v17  ;;  %v1159_v24 = vld [vmem:[%s1431_s9] sm:$0xff]  ;;  %v1180_v27 = vld [vmem:[%s1639_s1 + $0x90] sm:$0xff]  ;;  %v1302_v31 = vld [vmem:[%s1431_s9 + $0xc] sm:$0xc] }
  0x1c   : > { %330 = vmatpush.bf16.msra.mxu2 %v1161_v6  ;;  %v417_v21 = vpack.c.b16 %v415_v14, %v415_v14  ;;  %v419_v28 = vrot.slane %v1295_v20, 2  ;;  %v1298_v32 = vld [vmem:[%s1431_s9 + $0x18] sm:$0xc]  ;;  %v1480_v33 = vld [vmem:[%s1431_s9 + $0x1c] sm:$0xff]   ;;  %v1025_v35 = vld [vmem:[%s1431_s9 + $0x10] sm:$0xff]  }
  0x1d   : > { %284 = vmatpush.bf16.msra.mxu0 %v1166_v7  ;;  %v1305_v34 = vld [vmem:[%s1431_s9 + $0x18] sm:$0xf0]   ;;  %v1306_v36 = vld [vmem:[%s1431_s9 + $0xc] sm:$0xf0]   ;;  %v1026_v37 = vld [vmem:[%s1431_s9 + $0x14] sm:$0x3] }
  0x1e   : > { %455 = vmatpush.bf16.msra.mxu3 %v1175_v10  ;;  %v420_v29 = vrot.slane %v417_v21, 2  ;;  %v1054_v38 = vld [vmem:[%s1431_s9 + $0x20] sm:$0x3]  ;;  %v1299_v42 = vor.u32 %v1305_v34, %v1298_v32  ;;  %v1192_v43 = vld [vmem:[%s1639_s1 + $0xf0] sm:$0xff]  ;;  %v482_v44 = vunpack.c.l.b16 %v1026_v37  ;;  %v1171_v46 = vld [vmem:[%s1639_s1 + $0x48] sm:$0xff]  ;;  %v1303_v50 = vor.u32 %v1306_v36, %v1302_v31 }
  0x1f   : > { %587 = vmatpush.bf16.msra.mxu1 %v1183_v23  ;;  %v1182_v39 = vld [vmem:[%s1639_s1 + $0xa0] sm:$0xff]  ;;  %v548_v40 = vunpack.c.l.b16 %v1054_v38  ;;  %v1179_v47 = vld [vmem:[%s1639_s1 + $0x88] sm:$0xff]  ;;  %v1189_v56 = vld [vmem:[%s1639_s1 + $0xd8] sm:$0xff] }
  0x20   : > { %331 = vmatpush.bf16.msra.mxu2 %v1160_v15  ;;  %v421_v41 = vsel %vm418_vm1, %v419_v28, %v420_v29  ;;  %v551_v48 = vrot.slane %v1299_v42, 2  ;;  %v484_v51 = vpack.c.b16 %v482_v44, %v482_v44  ;;  %v1191_v52 = vld [vmem:[%s1639_s1 + $0xe8] sm:$0xff]  ;;  %v1170_v54 = vld [vmem:[%s1639_s1 + $0x40] sm:$0xff]  ;;  %v1197_v57 = vld [vmem:[%s1639_s1 + $0x118] sm:$0xff]  ;;  %v485_v58 = vrot.slane %v1303_v50, 2 }
  0x21   : > { %285 = vmatpush.bf16.msra.mxu0 %v1165_v16  ;;  %v550_v45 = vpack.c.b16 %v548_v40, %v548_v40  ;;  %v1178_v55 = vld [vmem:[%s1639_s1 + $0x80] sm:$0xff]  ;;  %v1188_v61 = vld [vmem:[%s1639_s1 + $0xd0] sm:$0xff]  ;;  %v1169_v63 = vld [vmem:[%s1431_s9 + $0x18] sm:$0xff]  ;;  %s1258_s9 = sshra.s32 %s857_s15, 4  ;;  %s1259_s9 = int_to_ptr.hbm [resolvable:$true] %s1258_s9 }
  0x22   : > { %456 = vmatpush.bf16.msra.mxu3 %v1174_v22  ;;  %v486_v59 = vrot.slane %v484_v51, 2  ;;  %v1190_v60 = vld [vmem:[%s1639_s1 + $0xe0] sm:$0xff]  ;;  %v1196_v62 = vld [vmem:[%s1639_s1 + $0x110] sm:$0xff]  ;;  %v1187_v1 = vld [vmem:[%s1639_s1 + $0xc8] sm:$0xff]  ;;  %s1260_s17 = scalar_lea.hbm %s1259_s9, 1  ;;  %p1265_p0 = scmp.lt.s32.totalorder %s1259_s9, %s1643_s5 }
  0x23   : > { %967 = vmatmul.msk.bf16.vlgmr.msra.gmra.mxu2 %vm274_vm0, %v1159_v24  ;;  %588 = vmatpush.bf16.msra.mxu1 %v1182_v39  ;;  %v552_v49 = vrot.slane %v550_v45, 2  ;;  %v1195_v2 = vld [vmem:[%s1639_s1 + $0x108] sm:$0xff]  ;;  %v1186_v3 = vld [vmem:[%s1639_s1 + $0xc0] sm:$0xff]  ;;  %v803_v7 = vld [vmem:[%s1641_s3 + $0x78] sm:$0xff]  ;;  %p1261_p11 = scmp.ne.s32.totalorder %s1259_s9, %s1260_s17  ;;  %p1266_p1 = scmp.lt.s32.totalorder %s1264_s25, %s1260_s17 }
  0x24   : > { %386 = vmatpush.bf16.msrb.mxu2 %v1173_v18  ;;  %946 = vmatmul.msk.bf16.vlgmr.msra.gmra.mxu0 %vm274_vm0, %v1164_v25  ;;  %v487_v0 = vsel %vm418_vm1, %v485_v58, %v486_v59  ;;  %v1194_v4 = vld [vmem:[%s1639_s1 + $0x100] sm:$0xff]  ;;  %v802_v9 = vld [vmem:[%s1641_s3 + $0x70] sm:$0xff]  ;;  %v801_v10 = vld [vmem:[%s1641_s3 + $0x68] sm:$0xff] }
  0x25   : > { %519 = vmatpush.bf16.msrb.mxu0 %v1181_v19  ;;  %1023 = vmatmul.msk.bf16.vlgmr.msra.gmra.mxu3 %vm274_vm0, %v421_v41  ;;  %v553_v53 = vsel %vm418_vm1, %v551_v48, %v552_v49  ;;  %v800_v12 = vld [vmem:[%s1641_s3 + $0x60] sm:$0xff]  ;;  %v799_v13 = vld [vmem:[%s1641_s3 + $0x58] sm:$0xff]  ;;  %v798_v15 = vld [vmem:[%s1641_s3 + $0x50] sm:$0xff]  ;;  %p1262_p12 = pnand %p1261_p11, %p1392_p5  ;;  %p1267_p2 = por %p1266_p1, %p1265_p0 }
  0x26   : > { %697 = vmatpush.bf16.msrb.mxu3 %v1193_v30  ;;  %1079 = vmatmul.msk.bf16.vlgmr.msra.gmra.mxu1 %vm274_vm0, %v553_v53  ;;  %v797_v17 = vld [vmem:[%s1641_s3 + $0x48] sm:$0xff]  ;;  %v796_v20 = vld [vmem:[%s1641_s3 + $0x40] sm:$0xff]  ;;  %v795_v22 = vld [vmem:[%s1641_s3 + $0x38] sm:$0xff] }
  0x27   : > { %805 = vmatpush.msrb.mxu1 %v803_v7  ;;  %v794_v23 = vld [vmem:[%s1641_s3 + $0x30] sm:$0xff]  ;;  %v793_v24 = vld [vmem:[%s1641_s3 + $0x28] sm:$0xff]  ;;  %v791_v31 = vld [vmem:[%s1641_s3 + $0x18] sm:$0xff]  ;;  %p1263_p13 = pneg %p1262_p12 }
  0x28   : > { %387 = vmatpush.bf16.msrb.mxu2 %v1172_v26  ;;  %v789_v36 = vld [vmem:[%s1641_s3 + $0x8] sm:$0xff]  ;;  %v788_v39 = vld [vmem:[%s1641_s3] sm:$0xff] }
  0x29   : > { %520 = vmatpush.bf16.msrb.mxu0 %v1180_v27  ;;  %806 = vmatpush.msrb.mxu1 %v802_v9  ;;  %v792_v27 = vld [vmem:[%s1641_s3 + $0x20] sm:$0xff]  ;;  %p1268_p3 = pnand %p1267_p2, %p1263_p13 }
  0x2a   : > { %698 = vmatpush.bf16.msrb.mxu3 %v1192_v43  ;;  %v1239_v51 = vld [vmem:[%s1640_s2] ss:$0 sm:$0xff] }
  0x2b   : > { %807 = vmatpush.msrb.mxu1 %v801_v10 }
  0x2c   : > { %388 = vmatpush.bf16.msrb.mxu2 %v1171_v46 }
  0x2d   : > { %521 = vmatpush.bf16.msrb.mxu0 %v1179_v47  ;;  %808 = vmatpush.msrb.mxu1 %v800_v12  ;;  %v1323_v47 = vmov 16.0  }
  0x2e   : > { %699 = vmatpush.bf16.msrb.mxu3 %v1191_v52  ;;  %1240 = vrcp.f32 %v1323_v47 }
  0x2f   : > { %809 = vmatpush.msrb.mxu1 %v799_v13 }
  0x30   : > { %389 = vmatpush.bf16.msrb.mxu2 %v1170_v54 }
  0x31   : > { %522 = vmatpush.bf16.msrb.mxu0 %v1178_v55  ;;  %810 = vmatpush.msrb.mxu1 %v798_v15 }
  0x32   : > { %700 = vmatpush.bf16.msrb.mxu3 %v1190_v60 }
  0x33   : > { %998 = vmatmul.msk.bf16.vlgmr.msrb.gmra.mxu2 %vm274_vm0, %v1169_v63  ;;  %811 = vmatpush.msrb.mxu1 %v797_v17 }
  0x34   : > { %641 = vmatpush.bf16.msra.mxu2 %v1189_v56  ;;  %1051 = vmatmul.msk.bf16.vlgmr.msrb.gmra.mxu0 %vm274_vm0, %v487_v0  ;;  %v1241_v54 = vpop.eup %1240 }
  0x35   : > { %753 = vmatpush.bf16.msra.mxu0 %v1197_v57  ;;  %1130 = vmatmul.msk.bf16.vlgmr.msrb.gmra.mxu3 %vm274_vm0, %v1025_v35  ;;  %v790_v35 = vld [vmem:[%s1641_s3 + $0x10] sm:$0xff]  ;;  %v781_v59 = vmul.f32 16.0, %v1241_v54  ;;  %vm785_vm2 = vweird.f32 %v1241_v54 }
  0x36   : > { %812 = vmatpush.msrb.mxu1 %v796_v20 }
  0x37   : > { %v782_v63 = vsub.f32 1.0, %v781_v59 }
  0x38   : > { %642 = vmatpush.bf16.msra.mxu2 %v1188_v61  ;;  %813 = vmatpush.msrb.mxu1 %v795_v22 }
  0x39   : > { %754 = vmatpush.bf16.msra.mxu0 %v1196_v62 }
  0x3a   : > { %814 = vmatpush.msrb.mxu1 %v794_v23 }
  0x3c   : > { %643 = vmatpush.bf16.msra.mxu2 %v1187_v1  ;;  %815 = vmatpush.msrb.mxu1 %v793_v24 }
  0x3d   : > { %755 = vmatpush.bf16.msra.mxu0 %v1195_v2  ;;  %v783_v2 = vmul.f32 %v1241_v54, %v782_v63 }
  0x3e   : > { %816 = vmatpush.msrb.mxu1 %v792_v27 }
  0x40   : > { %644 = vmatpush.bf16.msra.mxu2 %v1186_v3  ;;  %817 = vmatpush.msrb.mxu1 %v791_v31 }
  0x41   : > { %756 = vmatpush.bf16.msra.mxu0 %v1194_v4 }
  0x42   : > { %818 = vmatpush.msrb.mxu1 %v790_v35 }
  0x43   : > { %1104 = vmatmul.msk.bf16.vlgmr.msra.gmra.mxu2 %vm274_vm0, %v1441_v11 }
  0x44   : > { %1156 = vmatmul.msk.bf16.vlgmr.msra.gmra.mxu0 %vm274_vm0, %v1480_v33  ;;  %819 = vmatpush.msrb.mxu1 %v789_v36 }
  0x46   : > { %820 = vmatpush.msrb.mxu1 %v788_v39 }
  0xa1   : > { %v287_v5 = vpop.f32.mrf.mxu0 }
  0xa3   : > { %v590_v32 = vpop.f32.mrf.mxu1 }
  0xa6   : > { %v333_v6 = vpop.f32.mrf.mxu2 }
  0xa7   : > { %v334_v19 = vadd.f32 %v333_v6, %v287_v5  ;;  %v784_v5 = vadd.f32 %v1241_v54, %v783_v2 }
  0xa8   : > { %v458_v14 = vpop.f32.mrf.mxu3 }
  0xa9   : > { %v289_v8 = vpop.f32.mrf.mxu0 }
  0xab   : > { %v592_v45 = vpop.f32.mrf.mxu1 }
  0xae   : > { %v335_v11 = vpop.f32.mrf.mxu2 }
  0xaf   : > { %v336_v30 = vadd.f32 %v335_v11, %v289_v8  ;;  %v786_v8 = vsel %vm785_vm2, %v1241_v54, %v784_v5  ;;  %v804_v11 = vld [vmem:[%s1642_s4] sm:$0x1] }
  0xb0   : > { %v460_v25 = vpop.f32.mrf.mxu3 }
  0xb1   : > { %v524_v16 = vpop.f32.mrf.mxu0 }
  0xb6   : > { %v391_v18 = vpop.f32.mrf.mxu2 }
  0xb7   : > { %v396_v21 = vadd.f32 %v391_v18, %v334_v19 }
  0xb8   : > { %v702_v40 = vpop.f32.mrf.mxu3 }
  0xb9   : > { %v463_v26 = vadd.f32 %v458_v14, %v396_v21  ;;  %v526_v28 = vpop.f32.mrf.mxu0 }
  0xbb   : > { %v529_v33 = vadd.f32 %v524_v16, %v463_v26 }
  0xbd   : > { %v595_v37 = vadd.f32 %v590_v32, %v529_v33 }
  0xbe   : > { %v393_v29 = vpop.f32.mrf.mxu2 }
  0xbf   : > { %v397_v34 = vadd.f32 %v393_v29, %v336_v30 }
  0xc0   : > { %v704_v53 = vpop.f32.mrf.mxu3 }
  0xc1   : > { %v464_v38 = vadd.f32 %v460_v25, %v397_v34  ;;  %v758_v43 = vpop.f32.mrf.mxu0 }
  0xc3   : > { %v530_v44 = vadd.f32 %v526_v28, %v464_v38 }
  0xc5   : > { %v596_v48 = vadd.f32 %v592_v45, %v530_v44 }
  0xc6   : > { %v646_v41 = vpop.f32.mrf.mxu2 }
  0xc7   : > { %v651_v42 = vadd.f32 %v646_v41, %v595_v37 }
  0xc9   : > { %v707_v46 = vadd.f32 %v702_v40, %v651_v42  ;;  %v760_v56 = vpop.f32.mrf.mxu0 }
  0xcb   : > { %v763_v50 = vadd.f32 %v758_v43, %v707_v46 }
  0xcd   : > { %v769_v57 = vadd.f32 %v1239_v51, %v763_v50 }
  0xce   : > { %v648_v49 = vpop.f32.mrf.mxu2 }
  0xcf   : > { %v652_v52 = vadd.f32 %v648_v49, %v596_v48  ;;  %v771_v61 = vmax.f32 %v769_v57, 0.0 }
  0xd1   : > { %v708_v55 = vadd.f32 %v704_v53, %v652_v52 }
  0xd3   : > { %v764_v58 = vadd.f32 %v760_v56, %v708_v55 }
  0xd5   : > { %v770_v60 = vadd.f32 %v1239_v51, %v764_v58 }
  0xd7   : > { %v772_v62 = vmax.f32 %v770_v60, 0.0 }
  0xd9   : > { %v773_v0 = vadd.f32 %v772_v62, %v771_v61 }
  0xdb   : > { %v774_v1 = vrot.slane %v773_v0, 4 }
  0xdd   : > { %v775_v3 = vadd.f32 %v774_v1, %v773_v0 }
  0xdf   : > { %v776_v4 = vrot.slane %v775_v3, 2 }
  0xe1   : > { %v777_v6 = vadd.f32 %v776_v4, %v775_v3 }
  0xe3   : > { %v778_v7 = vrot.slane %v777_v6, 1 }
  0xe5   : > { %v779_v9 = vadd.f32 %v778_v7, %v777_v6 }
  0xe7   : > { %v787_v10 = vmul.f32 %v786_v8, %v779_v9 }
  0xe9   : > { %821 = vmatmul.f32.vlgmr.msrb.gmra.mxu1 %v787_v10 }
 0x166   : > { %v822_v12 = vpop.f32.mrf.mxu1 }
 0x167   : > { %v823_v13 = vadd.f32 %v822_v12, %v804_v11 }
 0x169   : > { %v825_v14 = vmul.f32 %v823_v13, %v823_v13 }
 0x16b   : > { %v827_v15 = vsel %vm826_vm3, %v825_v14, 0.0 }
 0x16c   : > { %828 = vadd.xlane.f32.xlu0 %v827_v15 }
 0x1df   : > { %v829_v16 = vpop.xlane.xlu0 %828 }
 0x1e0   : > { %v830_v17 = vmax.f32 %v829_v16, 1e-24 }
 0x1e2   : > { %1242 = vrsqrt.f32 %v830_v17  ;;  %vm837_vm5 = vweird.f32 %v830_v17 }
 0x1e8   : > { %v1243_v18 = vpop.eup %1242 }
 0x1e9   : > { %v832_v19 = vmul.f32 %v1243_v18, %v830_v17  ;;  %vm838_vm4 = vweird.f32 %v1243_v18 }
 0x1ea   : > { %vm839_vm6 = vmor %vm837_vm5, %vm838_vm4 }
 0x1eb   : > { %v833_v20 = vmul.f32 %v1243_v18, %v832_v19 }
 0x1ed   : > { %v834_v21 = vmul.f32 0.5, %v833_v20 }
 0x1ef   : > { %v835_v22 = vsub.f32 1.5, %v834_v21 }
 0x1f1   : > { %v836_v23 = vmul.f32 %v1243_v18, %v835_v22 }
 0x1f3   : > { %v840_v24 = vsel %vm839_vm6, %v1243_v18, %v836_v23 }
 0x1f4   : > { %v841_v25 = vmul.f32 %v840_v24, %v823_v13 }
 0x1f6   : > { %842 = vst.msk [vmem:[%s216_s13] sm:$0x1] %vm826_vm3, %v841_v25 }
 0x1f7   : > { %1271 = shalt.err (!%p1268_p3)
}
 0x1f8   : > { %1199 = dma.vmem_to_hbm [thread:$0]  (%p1392_p5), %s855_s14, 16, %s857_s15, %s844_s16  }
 0x1f9 PF: > { %p1205_p4 = scmp.ge.s32.totalorder %s1321_s21, 2  ;;  %s868_s6 = sand.u32 1, %s1309_s18  }
 0x1fa   : > { %s869_s7 = scalar_lea.sflag [#allocation3], %s868_s6 }
 0x1fb   : > { %p1202_p7 = pnand %p1205_p4, %p1396_p6 }
 0x1fd   : > { %p1203_p8 = pneg %p1202_p7 }
 0x1ff   : > { %1289 = dma.done.wait (%p1203_p8), %s869_s7, 16  }
 0x200   : > { %1291 = vsyncadd (%p1203_p8), %s869_s7, 4294967280  ;;  %p15_p9 = scmp.ge.s32.totalorder %s1379_s24, 4   ;;  %s1646_s18 = smov %s1313_s19 }
 0x201   : > { %s1647_s19 = smov %s1317_s20  ;;  %s1648_s20 = smov %s1390_s27 }
 0x202   : > { %s1649_s21 = smov %s1379_s24  ;;  %17 = sbr.rel (!%p15_p9) target bundleno = 3 (0x3), region = 85 }
 0x207   :  { %874 = vsyncpa [#allocation3], 1 }
 0x208   :  { %876 = vsyncpa [#allocation3 + $0x1], 1 }

</bundles_post_ra>
